<compile_context>
chip_gen: v5e
topology: v5e:2x2
jax: 0.10.0
libtpu: 0.0.40
codegen_flags: <defaults>
</compile_context>

<pallas_src>
import math
import functools

import jax
import jax.numpy as jnp
from jax import lax
from jax.experimental import pallas as pl
from jax.experimental.pallas import tpu as pltpu

# ---- module hyperparameters (from gpt.py) ----
BLOCK_SIZE = 64
N_EMBD = 384
N_HEADS = 6
HEAD_SIZE = N_EMBD // N_HEADS  # 64


def _mha_kernel(x_ref, wqkv_ref, wproj_ref, bias_ref, o_ref, cat_ref,
                *, seq_len, n_heads, head_size, n_embd):
    """One grid point = one batch element: fused QKV projection, all heads' causal
    attention, and the output projection."""
    T, E, H = seq_len, n_embd, head_size

    x = x_ref[0]                                   # (T, C) f32
    xb = x.astype(jnp.bfloat16)

    # Fused QKV projection: (T, C) @ (C, 3C) on the MXU, f32 accumulation.
    qkv = jnp.dot(xb, wqkv_ref[...], preferred_element_type=jnp.float32)  # (T, 3C) f32

    # Exact PyTorch scaling: head_size * C ** (-0.5); fold it into q once.
    scale = jnp.float32(head_size) * jnp.float32(n_embd) ** jnp.float32(-0.5)
    q_all = qkv[:, 0 * E:1 * E] * scale            # (T, C) f32
    k_all = qkv[:, 1 * E:2 * E]                    # (T, C) f32
    v_all = qkv[:, 2 * E:3 * E].astype(jnp.bfloat16)  # (T, C) bf16

    # Causal mask, built once per kernel invocation; finite fill avoids inf arithmetic.
    row = lax.broadcasted_iota(jnp.int32, (T, T), 0)
    col = lax.broadcasted_iota(jnp.int32, (T, T), 1)
    causal = col <= row
    neg = jnp.float32(-1e30)

    # Per-head attention (statically unrolled; per-head tensors are tiny).
    for h in range(n_heads):
        q = q_all[:, h * H:(h + 1) * H]            # (T, H) f32
        k = k_all[:, h * H:(h + 1) * H]            # (T, H) f32
        v = v_all[:, h * H:(h + 1) * H]            # (T, H) bf16

        s = jnp.dot(q, k.T, preferred_element_type=jnp.float32)   # (T, T) f32
        s = jnp.where(causal, s, neg)
        # Numerically stable softmax, elementwise math in f32; reciprocal on the EUP.
        s = s - jnp.max(s, axis=-1, keepdims=True)
        p = jnp.exp(s)
        p = p * pl.reciprocal(jnp.sum(p, axis=-1, keepdims=True), approx=True)

        cat_ref[:, h * H:(h + 1) * H] = jnp.dot(
            p.astype(jnp.bfloat16), v, preferred_element_type=jnp.float32)

    # Head concat + output projection as one (T, C) @ (C, C) matmul, plus bias.
    cat = cat_ref[...].astype(jnp.bfloat16)
    out = jnp.dot(cat, wproj_ref[...], preferred_element_type=jnp.float32)
    o_ref[0] = out + bias_ref[...]                 # bias (1, E) broadcasts over T


def multi_head_attention(x, wq, wk, wv, w_proj, b_proj):
    """x: (B, T, C) f32; wq/wk/wv: (n_heads, C, H); w_proj: (E, E) PyTorch (out, in); b_proj: (E,)."""
    B, T, C = x.shape
    n_heads, _, H = wq.shape
    E = C

    # Stack per-head Q/K/V weights into one (C, 3C) matrix:
    # columns ordered [q_h0 .. q_h5 | k_h0 .. k_h5 | v_h0 .. v_h5], head-major in each group.
    def stack(w):  # (n_heads, C, H) -> (C, n_heads*H)
        return jnp.transpose(w, (1, 0, 2)).reshape(C, n_heads * H)

    wqkv = jnp.concatenate([stack(wq), stack(wk), stack(wv)], axis=1)
    # MXU operands in bf16 (f32 accumulation in-kernel); in a real model the weights
    # would already be stored in bf16, and this halves the weight DMA bytes.
    wqkv = wqkv.astype(jnp.bfloat16)
    # PyTorch Linear computes y = a @ W.T + b.
    wproj_t = jnp.transpose(w_proj).astype(jnp.bfloat16)   # (C, E)
    bias2d = b_proj.reshape(1, E).astype(jnp.float32)

    kernel = functools.partial(_mha_kernel, seq_len=T, n_heads=n_heads,
                               head_size=H, n_embd=C)

    return pl.pallas_call(
        kernel,
        out_shape=jax.ShapeDtypeStruct((B, T, E), jnp.float32),
        grid_spec=pltpu.PrefetchScalarGridSpec(
            num_scalar_prefetch=0,
            grid=(B,),                                           # one step per batch
            in_specs=[
                pl.BlockSpec((1, T, C), lambda b: (b, 0, 0)),    # x (per batch)
                pl.BlockSpec((C, 3 * E), lambda b: (0, 0)),      # W_qkv (bf16, resident)
                pl.BlockSpec((C, E), lambda b: (0, 0)),          # W_proj.T (bf16, resident)
                pl.BlockSpec((1, E), lambda b: (0, 0)),          # bias
            ],
            out_specs=pl.BlockSpec((1, T, E), lambda b: (b, 0, 0)),
            scratch_shapes=[pltpu.VMEM((T, E), jnp.float32)],    # concatenated head outputs
        ),
        compiler_params=pltpu.CompilerParams(
            dimension_semantics=("parallel",),                   # batch axis -> megacore on v7x
        ),
    )(x, wqkv, wproj_t, bias2d)


def _reference(x, wq, wk, wv, w_proj, b_proj):
    """Plain-JAX (f32) re-implementation of the PyTorch forward, for verification."""
    B, T, C = x.shape
    n_heads, _, H = wq.shape
    outs = []
    tril = jnp.tril(jnp.ones((T, T), dtype=bool))
    for h in range(n_heads):
        q = x @ wq[h]
        k = x @ wk[h]
        v = x @ wv[h]
        wei = (q @ jnp.swapaxes(k, -2, -1)) * H * C ** (-0.5)
        wei = jnp.where(tril, wei, -jnp.inf)
        wei = jax.nn.softmax(wei, axis=-1)
        outs.append(wei @ v)
    cat = jnp.concatenate(outs, axis=-1)
    return cat @ w_proj.T + b_proj


if __name__ == "__main__":
    key = jax.random.PRNGKey(0)
    k1, k2, k3, k4, k5, k6, k7 = jax.random.split(key, 7)

    B, T, C, H = 2, BLOCK_SIZE, N_EMBD, HEAD_SIZE

    x = jax.random.normal(k1, (B, T, C), dtype=jnp.float32)

    # Deterministic synthetic weights (Linear(n_embd, head_size, bias=False) per head).
    s_in = 1.0 / math.sqrt(C)
    wq = jax.random.uniform(k2, (N_HEADS, C, H), jnp.float32, -s_in, s_in)
    wk = jax.random.uniform(k3, (N_HEADS, C, H), jnp.float32, -s_in, s_in)
    wv = jax.random.uniform(k4, (N_HEADS, C, H), jnp.float32, -s_in, s_in)
    # proj: Linear(n_embd, n_embd) — PyTorch weight layout (out, in), plus bias.
    w_proj = jax.random.uniform(k5, (C, C), jnp.float32, -s_in, s_in)
    b_proj = jax.random.uniform(k6, (C,), jnp.float32, -s_in, s_in)

    out = multi_head_attention(x, wq, wk, wv, w_proj, b_proj)
    out = jax.block_until_ready(out)

    ref = _reference(x, wq, wk, wv, w_proj, b_proj)
    assert out.shape == (B, T, C)
    # bf16 MXU operands with f32 accumulation -> relaxed tolerance vs. the pure-f32 reference.
    assert jnp.allclose(out, ref, atol=2e-2, rtol=2e-2), (
        f"max abs diff {jnp.max(jnp.abs(out - ref))}")

    print("KERNEL_OK")
</pallas_src>

<mosaic_0001>
module attributes {stable_mosaic.version = 11 : i64} {
  func.func @_mha_kernel(%arg0: i32, %arg1: memref<1x64x384xf32, #tpu.memory_space<vmem>>, %arg2: memref<384x1152xbf16, #tpu.memory_space<vmem>>, %arg3: memref<384x384xbf16, #tpu.memory_space<vmem>>, %arg4: memref<1x384xf32, #tpu.memory_space<vmem>>, %arg5: memref<1x64x384xf32, #tpu.memory_space<vmem>>, %arg6: memref<64x384xf32, #tpu.memory_space<vmem>>) attributes {dimension_semantics = [#tpu.dimension_semantics<parallel>], iteration_bounds = array<i64: 2>, scalar_prefetch = 0 : i64, scratch_operands = 1 : i64, tpu.core_type = #tpu.core_type<tc>, window_params = [{transform_indices = @transform_0, window_bounds = array<i64: 1, 64, 384>}, {pipeline_mode = #tpu.pipeline_mode<synchronous>, transform_indices = @transform_1, window_bounds = array<i64: 384, 1152>}, {pipeline_mode = #tpu.pipeline_mode<synchronous>, transform_indices = @transform_2, window_bounds = array<i64: 384, 384>}, {pipeline_mode = #tpu.pipeline_mode<synchronous>, transform_indices = @transform_3, window_bounds = array<i64: 1, 384>}, {transform_indices = @transform_4, window_bounds = array<i64: 1, 64, 384>}]} {
    %c0 = arith.constant 0 : index
    %c0_0 = arith.constant 0 : index
    %c0_1 = arith.constant 0 : index
    %0 = vector.load %arg1[%c0, %c0_0, %c0_1] : memref<1x64x384xf32, #tpu.memory_space<vmem>>, vector<1x64x384xf32>
    %1 = vector.shape_cast %0 : vector<1x64x384xf32> to vector<64x384xf32>
    %2 = arith.truncf %1 : vector<64x384xf32> to vector<64x384xbf16>
    %c0_2 = arith.constant 0 : index
    %c0_3 = arith.constant 0 : index
    %3 = vector.load %arg2[%c0_2, %c0_3] : memref<384x1152xbf16, #tpu.memory_space<vmem>>, vector<384x1152xbf16>
    %cst = arith.constant dense<0.000000e+00> : vector<64x1152xf32>
    %4 = tpu.matmul %2, %3, %cst {dimension_numbers = #tpu.dot_dimension_numbers<[1], [0], [0], [1], [0, 0, 1, 1], [], []>} : vector<64x384xbf16>, vector<384x1152xbf16>, vector<64x1152xf32> -> vector<64x1152xf32>
    %cst_4 = arith.constant 3.840000e+02 : f32
    %cst_5 = arith.constant -5.000000e-01 : f32
    %5 = math.powf %cst_4, %cst_5 : f32
    %cst_6 = arith.constant 6.400000e+01 : f32
    %6 = arith.mulf %cst_6, %5 : f32
    %7 = vector.extract_strided_slice %4 {offsets = [0, 0], sizes = [64, 384], strides = [1, 1]} : vector<64x1152xf32> to vector<64x384xf32>
    %8 = vector.broadcast %6 : f32 to vector<64x384xf32>
    %9 = arith.mulf %7, %8 : vector<64x384xf32>
    %10 = vector.extract_strided_slice %4 {offsets = [0, 384], sizes = [64, 384], strides = [1, 1]} : vector<64x1152xf32> to vector<64x384xf32>
    %11 = vector.extract_strided_slice %4 {offsets = [0, 768], sizes = [64, 384], strides = [1, 1]} : vector<64x1152xf32> to vector<64x384xf32>
    %12 = arith.truncf %11 : vector<64x384xf32> to vector<64x384xbf16>
    %13 = tpu.iota {dimensions = array<i32: 0>} : vector<64x64xi32>
    %14 = tpu.iota {dimensions = array<i32: 1>} : vector<64x64xi32>
    %15 = arith.cmpi sle, %14, %13 : vector<64x64xi32>
    %16 = vector.extract_strided_slice %9 {offsets = [0, 0], sizes = [64, 64], strides = [1, 1]} : vector<64x384xf32> to vector<64x64xf32>
    %17 = vector.extract_strided_slice %10 {offsets = [0, 0], sizes = [64, 64], strides = [1, 1]} : vector<64x384xf32> to vector<64x64xf32>
    %18 = vector.extract_strided_slice %12 {offsets = [0, 0], sizes = [64, 64], strides = [1, 1]} : vector<64x384xbf16> to vector<64x64xbf16>
    %19 = tpu.transpose %17, [1, 0] : vector<64x64xf32> -> vector<64x64xf32>
    %cst_7 = arith.constant dense<0.000000e+00> : vector<64x64xf32>
    %20 = tpu.matmul %16, %19, %cst_7 {dimension_numbers = #tpu.dot_dimension_numbers<[1], [0], [0], [1], [0, 0, 1, 1], [], []>} : vector<64x64xf32>, vector<64x64xf32>, vector<64x64xf32> -> vector<64x64xf32>
    %cst_8 = arith.constant -1.000000e+30 : f32
    %21 = vector.broadcast %cst_8 : f32 to vector<64x64xf32>
    %22 = arith.select %15, %20, %21 : vector<64x64xi1>, vector<64x64xf32>
    %cst_9 = arith.constant dense<0xFF800000> : vector<64xf32>
    %23 = vector.multi_reduction <maximumf>, %22, %cst_9 [1] : vector<64x64xf32> to vector<64xf32>
    %24 = vector.shape_cast %23 : vector<64xf32> to vector<64x1xf32>
    %25 = vector.broadcast %24 : vector<64x1xf32> to vector<64x64xf32>
    %26 = arith.subf %22, %25 : vector<64x64xf32>
    %27 = math.exp %26 : vector<64x64xf32>
    %cst_10 = arith.constant dense<0.000000e+00> : vector<64xf32>
    %28 = vector.multi_reduction <add>, %27, %cst_10 [1] : vector<64x64xf32> to vector<64xf32>
    %29 = vector.shape_cast %28 : vector<64xf32> to vector<64x1xf32>
    %30 = tpu.reciprocal %29 {approx = true} : vector<64x1xf32> -> vector<64x1xf32>
    %31 = vector.broadcast %30 : vector<64x1xf32> to vector<64x64xf32>
    %32 = arith.mulf %27, %31 : vector<64x64xf32>
    %33 = arith.truncf %32 : vector<64x64xf32> to vector<64x64xbf16>
    %cst_11 = arith.constant dense<0.000000e+00> : vector<64x64xf32>
    %34 = tpu.matmul %33, %18, %cst_11 {dimension_numbers = #tpu.dot_dimension_numbers<[1], [0], [0], [1], [0, 0, 1, 1], [], []>} : vector<64x64xbf16>, vector<64x64xbf16>, vector<64x64xf32> -> vector<64x64xf32>
    %c0_12 = arith.constant 0 : index
    %c0_13 = arith.constant 0 : index
    %35 = vector.load %arg6[%c0_12, %c0_13] : memref<64x384xf32, #tpu.memory_space<vmem>>, vector<64x64xf32>
    tpu.vector_store %arg6[%c0_12, %c0_13], %34 {strides = array<i32>} : memref<64x384xf32, #tpu.memory_space<vmem>>, vector<64x64xf32>,
    %36 = vector.extract_strided_slice %9 {offsets = [0, 64], sizes = [64, 64], strides = [1, 1]} : vector<64x384xf32> to vector<64x64xf32>
    %37 = vector.extract_strided_slice %10 {offsets = [0, 64], sizes = [64, 64], strides = [1, 1]} : vector<64x384xf32> to vector<64x64xf32>
    %38 = vector.extract_strided_slice %12 {offsets = [0, 64], sizes = [64, 64], strides = [1, 1]} : vector<64x384xbf16> to vector<64x64xbf16>
    %39 = tpu.transpose %37, [1, 0] : vector<64x64xf32> -> vector<64x64xf32>
    %cst_14 = arith.constant dense<0.000000e+00> : vector<64x64xf32>
    %40 = tpu.matmul %36, %39, %cst_14 {dimension_numbers = #tpu.dot_dimension_numbers<[1], [0], [0], [1], [0, 0, 1, 1], [], []>} : vector<64x64xf32>, vector<64x64xf32>, vector<64x64xf32> -> vector<64x64xf32>
    %cst_15 = arith.constant -1.000000e+30 : f32
    %41 = vector.broadcast %cst_15 : f32 to vector<64x64xf32>
    %42 = arith.select %15, %40, %41 : vector<64x64xi1>, vector<64x64xf32>
    %cst_16 = arith.constant dense<0xFF800000> : vector<64xf32>
    %43 = vector.multi_reduction <maximumf>, %42, %cst_16 [1] : vector<64x64xf32> to vector<64xf32>
    %44 = vector.shape_cast %43 : vector<64xf32> to vector<64x1xf32>
    %45 = vector.broadcast %44 : vector<64x1xf32> to vector<64x64xf32>
    %46 = arith.subf %42, %45 : vector<64x64xf32>
    %47 = math.exp %46 : vector<64x64xf32>
    %cst_17 = arith.constant dense<0.000000e+00> : vector<64xf32>
    %48 = vector.multi_reduction <add>, %47, %cst_17 [1] : vector<64x64xf32> to vector<64xf32>
    %49 = vector.shape_cast %48 : vector<64xf32> to vector<64x1xf32>
    %50 = tpu.reciprocal %49 {approx = true} : vector<64x1xf32> -> vector<64x1xf32>
    %51 = vector.broadcast %50 : vector<64x1xf32> to vector<64x64xf32>
    %52 = arith.mulf %47, %51 : vector<64x64xf32>
    %53 = arith.truncf %52 : vector<64x64xf32> to vector<64x64xbf16>
    %cst_18 = arith.constant dense<0.000000e+00> : vector<64x64xf32>
    %54 = tpu.matmul %53, %38, %cst_18 {dimension_numbers = #tpu.dot_dimension_numbers<[1], [0], [0], [1], [0, 0, 1, 1], [], []>} : vector<64x64xbf16>, vector<64x64xbf16>, vector<64x64xf32> -> vector<64x64xf32>
    %c0_19 = arith.constant 0 : index
    %c64 = arith.constant 64 : index
    %55 = vector.load %arg6[%c0_19, %c64] : memref<64x384xf32, #tpu.memory_space<vmem>>, vector<64x64xf32>
    tpu.vector_store %arg6[%c0_19, %c64], %54 {strides = array<i32>} : memref<64x384xf32, #tpu.memory_space<vmem>>, vector<64x64xf32>,
    %56 = vector.extract_strided_slice %9 {offsets = [0, 128], sizes = [64, 64], strides = [1, 1]} : vector<64x384xf32> to vector<64x64xf32>
    %57 = vector.extract_strided_slice %10 {offsets = [0, 128], sizes = [64, 64], strides = [1, 1]} : vector<64x384xf32> to vector<64x64xf32>
    %58 = vector.extract_strided_slice %12 {offsets = [0, 128], sizes = [64, 64], strides = [1, 1]} : vector<64x384xbf16> to vector<64x64xbf16>
    %59 = tpu.transpose %57, [1, 0] : vector<64x64xf32> -> vector<64x64xf32>
    %cst_20 = arith.constant dense<0.000000e+00> : vector<64x64xf32>
    %60 = tpu.matmul %56, %59, %cst_20 {dimension_numbers = #tpu.dot_dimension_numbers<[1], [0], [0], [1], [0, 0, 1, 1], [], []>} : vector<64x64xf32>, vector<64x64xf32>, vector<64x64xf32> -> vector<64x64xf32>
    %cst_21 = arith.constant -1.000000e+30 : f32
    %61 = vector.broadcast %cst_21 : f32 to vector<64x64xf32>
    %62 = arith.select %15, %60, %61 : vector<64x64xi1>, vector<64x64xf32>
    %cst_22 = arith.constant dense<0xFF800000> : vector<64xf32>
    %63 = vector.multi_reduction <maximumf>, %62, %cst_22 [1] : vector<64x64xf32> to vector<64xf32>
    %64 = vector.shape_cast %63 : vector<64xf32> to vector<64x1xf32>
    %65 = vector.broadcast %64 : vector<64x1xf32> to vector<64x64xf32>
    %66 = arith.subf %62, %65 : vector<64x64xf32>
    %67 = math.exp %66 : vector<64x64xf32>
    %cst_23 = arith.constant dense<0.000000e+00> : vector<64xf32>
    %68 = vector.multi_reduction <add>, %67, %cst_23 [1] : vector<64x64xf32> to vector<64xf32>
    %69 = vector.shape_cast %68 : vector<64xf32> to vector<64x1xf32>
    %70 = tpu.reciprocal %69 {approx = true} : vector<64x1xf32> -> vector<64x1xf32>
    %71 = vector.broadcast %70 : vector<64x1xf32> to vector<64x64xf32>
    %72 = arith.mulf %67, %71 : vector<64x64xf32>
    %73 = arith.truncf %72 : vector<64x64xf32> to vector<64x64xbf16>
    %cst_24 = arith.constant dense<0.000000e+00> : vector<64x64xf32>
    %74 = tpu.matmul %73, %58, %cst_24 {dimension_numbers = #tpu.dot_dimension_numbers<[1], [0], [0], [1], [0, 0, 1, 1], [], []>} : vector<64x64xbf16>, vector<64x64xbf16>, vector<64x64xf32> -> vector<64x64xf32>
    %c0_25 = arith.constant 0 : index
    %c128 = arith.constant 128 : index
    %75 = vector.load %arg6[%c0_25, %c128] : memref<64x384xf32, #tpu.memory_space<vmem>>, vector<64x64xf32>
    tpu.vector_store %arg6[%c0_25, %c128], %74 {strides = array<i32>} : memref<64x384xf32, #tpu.memory_space<vmem>>, vector<64x64xf32>,
    %76 = vector.extract_strided_slice %9 {offsets = [0, 192], sizes = [64, 64], strides = [1, 1]} : vector<64x384xf32> to vector<64x64xf32>
    %77 = vector.extract_strided_slice %10 {offsets = [0, 192], sizes = [64, 64], strides = [1, 1]} : vector<64x384xf32> to vector<64x64xf32>
    %78 = vector.extract_strided_slice %12 {offsets = [0, 192], sizes = [64, 64], strides = [1, 1]} : vector<64x384xbf16> to vector<64x64xbf16>
    %79 = tpu.transpose %77, [1, 0] : vector<64x64xf32> -> vector<64x64xf32>
    %cst_26 = arith.constant dense<0.000000e+00> : vector<64x64xf32>
    %80 = tpu.matmul %76, %79, %cst_26 {dimension_numbers = #tpu.dot_dimension_numbers<[1], [0], [0], [1], [0, 0, 1, 1], [], []>} : vector<64x64xf32>, vector<64x64xf32>, vector<64x64xf32> -> vector<64x64xf32>
    %cst_27 = arith.constant -1.000000e+30 : f32
    %81 = vector.broadcast %cst_27 : f32 to vector<64x64xf32>
    %82 = arith.select %15, %80, %81 : vector<64x64xi1>, vector<64x64xf32>
    %cst_28 = arith.constant dense<0xFF800000> : vector<64xf32>
    %83 = vector.multi_reduction <maximumf>, %82, %cst_28 [1] : vector<64x64xf32> to vector<64xf32>
    %84 = vector.shape_cast %83 : vector<64xf32> to vector<64x1xf32>
    %85 = vector.broadcast %84 : vector<64x1xf32> to vector<64x64xf32>
    %86 = arith.subf %82, %85 : vector<64x64xf32>
    %87 = math.exp %86 : vector<64x64xf32>
    %cst_29 = arith.constant dense<0.000000e+00> : vector<64xf32>
    %88 = vector.multi_reduction <add>, %87, %cst_29 [1] : vector<64x64xf32> to vector<64xf32>
    %89 = vector.shape_cast %88 : vector<64xf32> to vector<64x1xf32>
    %90 = tpu.reciprocal %89 {approx = true} : vector<64x1xf32> -> vector<64x1xf32>
    %91 = vector.broadcast %90 : vector<64x1xf32> to vector<64x64xf32>
    %92 = arith.mulf %87, %91 : vector<64x64xf32>
    %93 = arith.truncf %92 : vector<64x64xf32> to vector<64x64xbf16>
    %cst_30 = arith.constant dense<0.000000e+00> : vector<64x64xf32>
    %94 = tpu.matmul %93, %78, %cst_30 {dimension_numbers = #tpu.dot_dimension_numbers<[1], [0], [0], [1], [0, 0, 1, 1], [], []>} : vector<64x64xbf16>, vector<64x64xbf16>, vector<64x64xf32> -> vector<64x64xf32>
    %c0_31 = arith.constant 0 : index
    %c192 = arith.constant 192 : index
    %95 = vector.load %arg6[%c0_31, %c192] : memref<64x384xf32, #tpu.memory_space<vmem>>, vector<64x64xf32>
    tpu.vector_store %arg6[%c0_31, %c192], %94 {strides = array<i32>} : memref<64x384xf32, #tpu.memory_space<vmem>>, vector<64x64xf32>,
    %96 = vector.extract_strided_slice %9 {offsets = [0, 256], sizes = [64, 64], strides = [1, 1]} : vector<64x384xf32> to vector<64x64xf32>
    %97 = vector.extract_strided_slice %10 {offsets = [0, 256], sizes = [64, 64], strides = [1, 1]} : vector<64x384xf32> to vector<64x64xf32>
    %98 = vector.extract_strided_slice %12 {offsets = [0, 256], sizes = [64, 64], strides = [1, 1]} : vector<64x384xbf16> to vector<64x64xbf16>
    %99 = tpu.transpose %97, [1, 0] : vector<64x64xf32> -> vector<64x64xf32>
    %cst_32 = arith.constant dense<0.000000e+00> : vector<64x64xf32>
    %100 = tpu.matmul %96, %99, %cst_32 {dimension_numbers = #tpu.dot_dimension_numbers<[1], [0], [0], [1], [0, 0, 1, 1], [], []>} : vector<64x64xf32>, vector<64x64xf32>, vector<64x64xf32> -> vector<64x64xf32>
    %cst_33 = arith.constant -1.000000e+30 : f32
    %101 = vector.broadcast %cst_33 : f32 to vector<64x64xf32>
    %102 = arith.select %15, %100, %101 : vector<64x64xi1>, vector<64x64xf32>
    %cst_34 = arith.constant dense<0xFF800000> : vector<64xf32>
    %103 = vector.multi_reduction <maximumf>, %102, %cst_34 [1] : vector<64x64xf32> to vector<64xf32>
    %104 = vector.shape_cast %103 : vector<64xf32> to vector<64x1xf32>
    %105 = vector.broadcast %104 : vector<64x1xf32> to vector<64x64xf32>
    %106 = arith.subf %102, %105 : vector<64x64xf32>
    %107 = math.exp %106 : vector<64x64xf32>
    %cst_35 = arith.constant dense<0.000000e+00> : vector<64xf32>
    %108 = vector.multi_reduction <add>, %107, %cst_35 [1] : vector<64x64xf32> to vector<64xf32>
    %109 = vector.shape_cast %108 : vector<64xf32> to vector<64x1xf32>
    %110 = tpu.reciprocal %109 {approx = true} : vector<64x1xf32> -> vector<64x1xf32>
    %111 = vector.broadcast %110 : vector<64x1xf32> to vector<64x64xf32>
    %112 = arith.mulf %107, %111 : vector<64x64xf32>
    %113 = arith.truncf %112 : vector<64x64xf32> to vector<64x64xbf16>
    %cst_36 = arith.constant dense<0.000000e+00> : vector<64x64xf32>
    %114 = tpu.matmul %113, %98, %cst_36 {dimension_numbers = #tpu.dot_dimension_numbers<[1], [0], [0], [1], [0, 0, 1, 1], [], []>} : vector<64x64xbf16>, vector<64x64xbf16>, vector<64x64xf32> -> vector<64x64xf32>
    %c0_37 = arith.constant 0 : index
    %c256 = arith.constant 256 : index
    %115 = vector.load %arg6[%c0_37, %c256] : memref<64x384xf32, #tpu.memory_space<vmem>>, vector<64x64xf32>
    tpu.vector_store %arg6[%c0_37, %c256], %114 {strides = array<i32>} : memref<64x384xf32, #tpu.memory_space<vmem>>, vector<64x64xf32>,
    %116 = vector.extract_strided_slice %9 {offsets = [0, 320], sizes = [64, 64], strides = [1, 1]} : vector<64x384xf32> to vector<64x64xf32>
    %117 = vector.extract_strided_slice %10 {offsets = [0, 320], sizes = [64, 64], strides = [1, 1]} : vector<64x384xf32> to vector<64x64xf32>
    %118 = vector.extract_strided_slice %12 {offsets = [0, 320], sizes = [64, 64], strides = [1, 1]} : vector<64x384xbf16> to vector<64x64xbf16>
    %119 = tpu.transpose %117, [1, 0] : vector<64x64xf32> -> vector<64x64xf32>
    %cst_38 = arith.constant dense<0.000000e+00> : vector<64x64xf32>
    %120 = tpu.matmul %116, %119, %cst_38 {dimension_numbers = #tpu.dot_dimension_numbers<[1], [0], [0], [1], [0, 0, 1, 1], [], []>} : vector<64x64xf32>, vector<64x64xf32>, vector<64x64xf32> -> vector<64x64xf32>
    %cst_39 = arith.constant -1.000000e+30 : f32
    %121 = vector.broadcast %cst_39 : f32 to vector<64x64xf32>
    %122 = arith.select %15, %120, %121 : vector<64x64xi1>, vector<64x64xf32>
    %cst_40 = arith.constant dense<0xFF800000> : vector<64xf32>
    %123 = vector.multi_reduction <maximumf>, %122, %cst_40 [1] : vector<64x64xf32> to vector<64xf32>
    %124 = vector.shape_cast %123 : vector<64xf32> to vector<64x1xf32>
    %125 = vector.broadcast %124 : vector<64x1xf32> to vector<64x64xf32>
    %126 = arith.subf %122, %125 : vector<64x64xf32>
    %127 = math.exp %126 : vector<64x64xf32>
    %cst_41 = arith.constant dense<0.000000e+00> : vector<64xf32>
    %128 = vector.multi_reduction <add>, %127, %cst_41 [1] : vector<64x64xf32> to vector<64xf32>
    %129 = vector.shape_cast %128 : vector<64xf32> to vector<64x1xf32>
    %130 = tpu.reciprocal %129 {approx = true} : vector<64x1xf32> -> vector<64x1xf32>
    %131 = vector.broadcast %130 : vector<64x1xf32> to vector<64x64xf32>
    %132 = arith.mulf %127, %131 : vector<64x64xf32>
    %133 = arith.truncf %132 : vector<64x64xf32> to vector<64x64xbf16>
    %cst_42 = arith.constant dense<0.000000e+00> : vector<64x64xf32>
    %134 = tpu.matmul %133, %118, %cst_42 {dimension_numbers = #tpu.dot_dimension_numbers<[1], [0], [0], [1], [0, 0, 1, 1], [], []>} : vector<64x64xbf16>, vector<64x64xbf16>, vector<64x64xf32> -> vector<64x64xf32>
    %c0_43 = arith.constant 0 : index
    %c320 = arith.constant 320 : index
    %135 = vector.load %arg6[%c0_43, %c320] : memref<64x384xf32, #tpu.memory_space<vmem>>, vector<64x64xf32>
    tpu.vector_store %arg6[%c0_43, %c320], %134 {strides = array<i32>} : memref<64x384xf32, #tpu.memory_space<vmem>>, vector<64x64xf32>,
    %c0_44 = arith.constant 0 : index
    %c0_45 = arith.constant 0 : index
    %136 = vector.load %arg6[%c0_44, %c0_45] : memref<64x384xf32, #tpu.memory_space<vmem>>, vector<64x384xf32>
    %137 = arith.truncf %136 : vector<64x384xf32> to vector<64x384xbf16>
    %c0_46 = arith.constant 0 : index
    %c0_47 = arith.constant 0 : index
    %138 = vector.load %arg3[%c0_46, %c0_47] : memref<384x384xbf16, #tpu.memory_space<vmem>>, vector<384x384xbf16>
    %cst_48 = arith.constant dense<0.000000e+00> : vector<64x384xf32>
    %139 = tpu.matmul %137, %138, %cst_48 {dimension_numbers = #tpu.dot_dimension_numbers<[1], [0], [0], [1], [0, 0, 1, 1], [], []>} : vector<64x384xbf16>, vector<384x384xbf16>, vector<64x384xf32> -> vector<64x384xf32>
    %c0_49 = arith.constant 0 : index
    %c0_50 = arith.constant 0 : index
    %140 = vector.load %arg4[%c0_49, %c0_50] : memref<1x384xf32, #tpu.memory_space<vmem>>, vector<1x384xf32>
    %141 = vector.broadcast %140 : vector<1x384xf32> to vector<64x384xf32>
    %142 = arith.addf %139, %141 : vector<64x384xf32>
    %c0_51 = arith.constant 0 : index
    %c0_52 = arith.constant 0 : index
    %c0_53 = arith.constant 0 : index
    %143 = vector.load %arg5[%c0_51, %c0_52, %c0_53] : memref<1x64x384xf32, #tpu.memory_space<vmem>>, vector<1x64x384xf32>
    %144 = vector.shape_cast %143 : vector<1x64x384xf32> to vector<64x384xf32>
    %145 = vector.shape_cast %142 : vector<64x384xf32> to vector<1x64x384xf32>
    tpu.vector_store %arg5[%c0_51, %c0_52, %c0_53], %145 {strides = array<i32>} : memref<1x64x384xf32, #tpu.memory_space<vmem>>, vector<1x64x384xf32>,
    return
  }
  func.func @transform_0(%arg0: i32) -> (i32, i32, i32) {
    %c0_i32 = arith.constant 0 : i32
    %c0_i32_0 = arith.constant 0 : i32
    %c0_i32_1 = arith.constant 0 : i32
    return %arg0, %c0_i32, %c0_i32_0 : i32, i32, i32
  }
  func.func @transform_1(%arg0: i32) -> (i32, i32) {
    %c0_i32 = arith.constant 0 : i32
    %c0_i32_0 = arith.constant 0 : i32
    %c0_i32_1 = arith.constant 0 : i32
    return %c0_i32, %c0_i32_0 : i32, i32
  }
  func.func @transform_2(%arg0: i32) -> (i32, i32) {
    %c0_i32 = arith.constant 0 : i32
    %c0_i32_0 = arith.constant 0 : i32
    %c0_i32_1 = arith.constant 0 : i32
    return %c0_i32, %c0_i32_0 : i32, i32
  }
  func.func @transform_3(%arg0: i32) -> (i32, i32) {
    %c0_i32 = arith.constant 0 : i32
    %c0_i32_0 = arith.constant 0 : i32
    %c0_i32_1 = arith.constant 0 : i32
    return %c0_i32, %c0_i32_0 : i32, i32
  }
  func.func @transform_4(%arg0: i32) -> (i32, i32, i32) {
    %c0_i32 = arith.constant 0 : i32
    %c0_i32_0 = arith.constant 0 : i32
    %c0_i32_1 = arith.constant 0 : i32
    return %arg0, %c0_i32, %c0_i32_0 : i32, i32, i32
  }
}

</mosaic_0001>

<bundles_post_ra>
// kernel: tpu_custom_call.1
= control target key start
LH: loop header
LB: loop body
LE: loop exit
PB: predicated region body
PF: predicated region fallthrough
CT: control target
= control target key end

     0   :  { %9 = vsyncpa [#allocation4], 0  ;;  %s9041_s0 = inlined_call_operand.hbm [shape: f32[2,64,384], index: 0, kind: input, shape index: {}]   ;;  %s9042_s1 = inlined_call_operand.hbm [shape: bf16[384,1152], index: 1, kind: input, shape index: {}]   ;;  %s9043_s2 = inlined_call_operand.hbm [shape: bf16[384,384], index: 2, kind: input, shape index: {}]   ;;  %s9044_s3 = inlined_call_operand.hbm [shape: f32[1,384], index: 3, kind: input, shape index: {}]   ;;  %s9045_s4 = inlined_call_operand.hbm [shape: f32[2,64,384], index: 4, kind: output, shape index: {}]  }
   0x1   :  { %11 = vsyncpa [#allocation4 + $0x1], 0 }
   0x2   :  { %12 = vsyncpa [#allocation7], 0 }
   0x3   :  { %13 = vsyncpa [#allocation10], 0 }
   0x4   :  { %14 = vsyncpa [#allocation5], 0 }
   0x5   :  { %16 = vsyncpa [#allocation5 + $0x1], 0  ;;  %s7179_s15 = smov 0   ;;  %s7181_s16 = smov 0  }
   0x6   :  { %s7183_s17 = smov 0   ;;  %s7185_s18 = smov 0  }
   0x7 LB: > { %s7200_s19 = sadd.s32 4294967295, %s7140_s18   ;;  %s5090_s20 = sadd.s32 4294967294, %s7140_s18   ;;  %s7140_s18 = sphi %s7185_s18, %s9138_s18   ;;  %s7136_s17 = sphi %s7183_s17, %s9137_s17   ;;  %s7132_s16 = sphi %s7181_s16, %s9136_s16   ;;  %s7128_s15 = sphi %s7179_s15, %s9135_s15  }
   0x8   : > { %p42_p0 = scmp.ne.s32.totalorder %s7132_s16, %s7128_s15  ;;  %p43_p1 = scmp.eq.s32.totalorder %s7200_s19, 0 }
   0x9   : > { %p129_p2 = scmp.eq.s32.totalorder %s7200_s19, 1  ;;  %p135_p3 = scmp.eq.s32.totalorder %s5090_s20, 1 }
   0xa   : > { %p7209_p4 = por %p43_p1, %p42_p0  ;;  %p5091_p5 = scmp.ge.s32.totalorder %s7140_s18, 1 }
   0xb   : > { %p7214_p6 = por %p135_p3, %p42_p0  ;;  %p142_p7 = scmp.lt.s32.totalorder %s7140_s18, 3 }
   0xc   : > { %s153_s25 = sshll.u32 %s9042_s1, 4  ;;  %s7142_s27 = smov [#allocation6]   ;;  %s154_s25 = int_to_ptr.hbm [resolvable:$true] %s153_s25 }
   0xd   : > { %p7222_p8 = pnand %p5091_p5, %p142_p7  ;;  %s155_s28 = sshll.u32 %s7142_s27, 4  ;;  %s156_s28 = int_to_ptr.vmem [resolvable:$true] %s155_s28 }
   0xe   : > { %s167_s6 = sshll.u32 %s9043_s2, 4  ;;  %s7143_s7 = smov 576   ;;  %s168_s6 = int_to_ptr.hbm [resolvable:$true] %s167_s6 }
   0xf   : > { %p6684_p9 = pneg %p7222_p8  ;;  %s7144_s8 = smov 36  }
  0x10   : > { %s7145_s9 = smov [#allocation8]   ;;  %s7146_s11 = smov 192  }
  0x11   : > { %p7230_p10 = pnand %p6684_p9, %p43_p1  ;;  %s169_s10 = sshll.u32 %s7145_s9, 4  ;;  %s170_s10 = int_to_ptr.vmem [resolvable:$true] %s169_s10 }
  0x12   : > { %s7147_s12 = smov 12   ;;  %s182_s20 = sshll.u32 %s9044_s3, 4  ;;  %s183_s20 = int_to_ptr.hbm [resolvable:$true] %s182_s20 }
  0x13   : > { %6687 = dma.hbm_to_vmem [thread:$0]  (!%p7230_p10), %s154_s25, 27648, %s156_s28, [#allocation7], %s7143_s7, %s7143_s7, %s7144_s8  }
  0x14   : > { %6690 = dma.hbm_to_vmem [thread:$0]  (!%p7230_p10), %s168_s6, 9216, %s170_s10, [#allocation7], %s7146_s11, %s7146_s11, %s7147_s12  }
  0x15   : > { %s7148_s23 = smov [#allocation9]   ;;  %s7248_s25 = sadd.s32 1, %s7140_s18  }
  0x16   : > { %s184_s24 = sshll.u32 %s7148_s23, 4  ;;  %s26_s27 = ssub.s32 %s7140_s18, %s7248_s25  ;;  %s185_s24 = int_to_ptr.vmem [resolvable:$true] %s184_s24 }
  0x17   : > { %6693 = dma.hbm_to_vmem [thread:$0]  (!%p7230_p10), %s183_s20, 48, %s185_s24, [#allocation10]  }
  0x18   : > { %s29_s28 = sadd.s32 1, %s7136_s17  ;;  %p27_p12 = scmp.eq.s32.totalorder %s26_s27, 0 }
  0x19   : > { %p36_p13 = scmp.ne.s32.totalorder %s7136_s17, %s7132_s16  ;;  %p37_p0 = scmp.eq.s32.totalorder %s7140_s18, 0 }
  0x1a   : > { %p6705_p3 = scmp.lt.s32.totalorder %s7140_s18, 2  ;;  %s195_s6 = sand.u32 1, %s7136_s17  }
  0x1b   : > { %s7258_s30 = scalar_select %p27_p12, %s7136_s17, %s29_s28  }
  0x1c   : > { %p38_p5 = por %p37_p0, %p36_p13  ;;  %p7262_p7 = por %p129_p2, %p36_p13 }
  0x1d   : > { %s6665_s29 = smul.u32 192, %s7140_s18  ;;  %s196_s20 = scalar_lea.sflag [#allocation4], %s195_s6 }
  0x1e   : > { %s6664_s7 = smul.u32 192, %s195_s6  ;;  %p7271_p9 = pnand %p6705_p3, %p38_p5 }
  0x1f   : > { %s204_s10 = scalar_lea.hbm %s9041_s0, %s6665_s29  ;;  %s7043_s29 = scalar_lea.hbm %s9041_s0, 384 }
  0x20   : > { %s205_s12 = sshll.u32 %s204_s10, 4  ;;  %s199_s13 = scalar_lea.vmem [#allocation3], %s6664_s7  ;;  %s206_s12 = int_to_ptr.hbm [resolvable:$true] %s205_s12 }
  0x21   : > { %s207_s14 = sshll.u32 %s199_s13, 4  ;;  %s7036_s23 = sshra.s32 %s206_s12, 4  ;;  %s208_s14 = int_to_ptr.vmem [resolvable:$true] %s207_s14  ;;  %s7037_s23 = int_to_ptr.hbm [resolvable:$true] %s7036_s23 }
  0x22   : > { %s7038_s24 = scalar_lea.hbm %s7037_s23, 192  ;;  %p7040_p10 = pneg %p7271_p9 }
  0x23   : > { %p7039_p2 = scmp.ne.s32.totalorder %s7037_s23, %s7038_s24  ;;  %p7044_p0 = scmp.lt.s32.totalorder %s7037_s23, %s9041_s0 }
  0x24   : > { %p7045_p3 = scmp.lt.s32.totalorder %s7043_s29, %s7038_s24 }
  0x25   : > { %p7041_p12 = pnand %p7040_p10, %p7039_p2 }
  0x26   : > { %p7046_p5 = por %p7045_p3, %p7044_p0 }
  0x27   : > { %p7042_p13 = pneg %p7041_p12 }
  0x29   : > { %p7047_p11 = pnand %p7046_p5, %p7042_p13 }
  0x2b   : > { %7050 = shalt.err (!%p7047_p11)
}
  0x2c   : > { %s7149_s6 = smov 384   ;;  %s7150_s7 = smov 24  }
  0x2d   : > { %6697 = dma.hbm_to_vmem [thread:$0]  (!%p7271_p9), %s206_s12, 3072, %s208_s14, %s196_s20, %s7149_s6, %s7149_s6, %s7150_s7  }
  0x2e   : > { %219 = sbr.rel (%p7222_p8) target bundleno = 1691 (0x69b), region = 36 }
  0x33   : > { %s7288_s10 = sand.u32 1, %s7132_s16  }
  0x34   : > { %s6666_s13 = smul.u32 192, %s7288_s10  ;;  %s222_s23 = scalar_lea.sflag [#allocation4], %s7288_s10 }
  0x36   : > { %s7294_s24 = scalar_lea.vmem [#allocation3], %s6666_s13 }
  0x37   : > { %7111 = dma.done.wait (%p7209_p4), %s222_s23, 3072  }
  0x38   : > { %7113 = vsyncadd (%p7209_p4), %s222_s23, 4294964224 }
  0x39   : > { %7115 = dma.done.wait (%p43_p1), [#allocation7], 36864  }
  0x3a   : > { %7117 = vsyncadd (%p43_p1), [#allocation7], 4294930432 }
  0x3b   : > { %7119 = dma.done.wait (%p43_p1), [#allocation10], 48  }
  0x3c   : > { %7121 = vsyncadd (%p43_p1), [#allocation10], 4294967248  ;;  %v5355_v0 = vld [vmem:[#allocation6 + $0x1f8] sm:$0xf]  ;;  %v6443_v1 = vld [vmem:[#allocation6 + $0x218] sm:$0xf0] }
  0x3d   : > { %v5643_v2 = vld [vmem:[#allocation6 + $0x438] sm:$0xf]  ;;  %v5356_v3 = vor.u32 %v6443_v1, %v5355_v0  ;;  %v6515_v4 = vld [vmem:[#allocation6 + $0x458] sm:$0xf0]  ;;  %v5357_v10 = vld [vmem:[#allocation6 + $0x21c] sm:$0xf0] }
  0x3e   : > { %v5931_v5 = vld [vmem:[#allocation6 + $0x678] sm:$0xf]  ;;  %v6587_v6 = vld [vmem:[#allocation6 + $0x698] sm:$0xf0]  ;;  %v5644_v7 = vor.u32 %v6515_v4, %v5643_v2  ;;  %v5319_v11 = vld [vmem:[#allocation6 + $0x1b0] sm:$0xf] }
  0x3f   : > { %v5932_v8 = vor.u32 %v6587_v6, %v5931_v5  ;;  %v6439_v9 = vld [vmem:[#allocation6 + $0x1fc] sm:$0xf]  ;;  %1647 = vmatpush.bf16.msra.mxu0 %v5356_v3  ;;  %v6434_v13 = vld [vmem:[#allocation6 + $0x1d0] sm:$0xf0]  ;;  %v5607_v14 = vld [vmem:[#allocation6 + $0x3f0] sm:$0xf] }
  0x40   : > { %v5360_v12 = vor.u32 %v6439_v9, %v5357_v10  ;;  %v6506_v15 = vld [vmem:[#allocation6 + $0x410] sm:$0xf0]  ;;  %1676 = vmatpush.bf16.msra.mxu1 %v5644_v7  ;;  %v5320_v16 = vor.u32 %v6434_v13, %v5319_v11  ;;  %v5895_v18 = vld [vmem:[#allocation6 + $0x630] sm:$0xf]  ;;  %v5321_v22 = vld [vmem:[#allocation6 + $0x1d4] sm:$0xf0] }
  0x41   : > { %1705 = vmatpush.bf16.msra.mxu2 %v5932_v8  ;;  %v5608_v17 = vor.u32 %v6506_v15, %v5607_v14  ;;  %v6578_v19 = vld [vmem:[#allocation6 + $0x650] sm:$0xf0]  ;;  %v5283_v23 = vld [vmem:[#allocation6 + $0x168] sm:$0xf]  ;;  %v6425_v24 = vld [vmem:[#allocation6 + $0x188] sm:$0xf0] }
  0x42   : > { %v6430_v20 = vld [vmem:[#allocation6 + $0x1b4] sm:$0xf]  ;;  %1734 = vmatpush.bf16.msra.mxu3 %v5360_v12  ;;  %v5896_v21 = vor.u32 %v6578_v19, %v5895_v18  ;;  %v5571_v26 = vld [vmem:[#allocation6 + $0x3a8] sm:$0xf]  ;;  %v6497_v27 = vld [vmem:[#allocation6 + $0x3c8] sm:$0xf0]  ;;  %v5284_v29 = vor.u32 %v6425_v24, %v5283_v23 }
  0x43   : > { %v5324_v25 = vor.u32 %v6430_v20, %v5321_v22  ;;  %v5859_v28 = vld [vmem:[#allocation6 + $0x5e8] sm:$0xf]  ;;  %1648 = vmatpush.bf16.msra.mxu0 %v5320_v16  ;;  %v6569_v30 = vld [vmem:[#allocation6 + $0x608] sm:$0xf0]  ;;  %v5285_v32 = vld [vmem:[#allocation6 + $0x18c] sm:$0xf0]  ;;  %v5572_v33 = vor.u32 %v6497_v27, %v5571_v26 }
  0x44   : > { %v6421_v31 = vld [vmem:[#allocation6 + $0x16c] sm:$0xf]  ;;  %1677 = vmatpush.bf16.msra.mxu1 %v5608_v17  ;;  %v5860_v34 = vor.u32 %v6569_v30, %v5859_v28  ;;  %v5247_v35 = vld [vmem:[#allocation6 + $0x120] sm:$0xf]  ;;  %v6416_v36 = vld [vmem:[#allocation6 + $0x140] sm:$0xf0] }
  0x45   : > { %1706 = vmatpush.bf16.msra.mxu2 %v5896_v21  ;;  %v5535_v37 = vld [vmem:[#allocation6 + $0x360] sm:$0xf]  ;;  %v5288_v38 = vor.u32 %v6421_v31, %v5285_v32  ;;  %v6488_v39 = vld [vmem:[#allocation6 + $0x380] sm:$0xf0]  ;;  %v5249_v43 = vld [vmem:[#allocation6 + $0x144] sm:$0xf0]  ;;  %v5248_v44 = vor.u32 %v6416_v36, %v5247_v35 }
  0x46   : > { %1735 = vmatpush.bf16.msra.mxu3 %v5324_v25  ;;  %v5823_v40 = vld [vmem:[#allocation6 + $0x5a0] sm:$0xf]  ;;  %v6560_v41 = vld [vmem:[#allocation6 + $0x5c0] sm:$0xf0]  ;;  %v5536_v45 = vor.u32 %v6488_v39, %v5535_v37  ;;  %v5211_v47 = vld [vmem:[#allocation6 + $0xd8] sm:$0xf] }
  0x47   : > { %v6412_v42 = vld [vmem:[#allocation6 + $0x124] sm:$0xf]  ;;  %1649 = vmatpush.bf16.msra.mxu0 %v5284_v29  ;;  %v5824_v46 = vor.u32 %v6560_v41, %v5823_v40  ;;  %v6407_v48 = vld [vmem:[#allocation6 + $0xf8] sm:$0xf0]  ;;  %v5499_v49 = vld [vmem:[#allocation6 + $0x318] sm:$0xf] }
  0x48   : > { %1678 = vmatpush.bf16.msra.mxu1 %v5572_v33  ;;  %v5252_v50 = vor.u32 %v6412_v42, %v5249_v43  ;;  %v6479_v51 = vld [vmem:[#allocation6 + $0x338] sm:$0xf0]  ;;  %v5787_v52 = vld [vmem:[#allocation6 + $0x558] sm:$0xf]  ;;  %v5213_v55 = vld [vmem:[#allocation6 + $0xfc] sm:$0xf0]  ;;  %v5212_v56 = vor.u32 %v6407_v48, %v5211_v47 }
  0x49   : > { %1707 = vmatpush.bf16.msra.mxu2 %v5860_v34  ;;  %v6551_v53 = vld [vmem:[#allocation6 + $0x578] sm:$0xf0]  ;;  %v5500_v57 = vor.u32 %v6479_v51, %v5499_v49  ;;  %v5175_v59 = vld [vmem:[#allocation6 + $0x90] sm:$0xf]  ;;  %v6398_v60 = vld [vmem:[#allocation6 + $0xb0] sm:$0xf0] }
  0x4a   : > { %1736 = vmatpush.bf16.msra.mxu3 %v5288_v38  ;;  %v6403_v54 = vld [vmem:[#allocation6 + $0xdc] sm:$0xf]  ;;  %v5788_v58 = vor.u32 %v6551_v53, %v5787_v52  ;;  %v5463_v61 = vld [vmem:[#allocation6 + $0x2d0] sm:$0xf]  ;;  %v6470_v63 = vld [vmem:[#allocation6 + $0x2f0] sm:$0xf0]  ;;  %v5176_v4 = vor.u32 %v6398_v60, %v5175_v59 }
  0x4b   : > { %1650 = vmatpush.bf16.msra.mxu0 %v5248_v44  ;;  %v5216_v62 = vor.u32 %v6403_v54, %v5213_v55  ;;  %v5751_v0 = vld [vmem:[#allocation6 + $0x510] sm:$0xf]  ;;  %v6542_v1 = vld [vmem:[#allocation6 + $0x530] sm:$0xf0]  ;;  %v5177_v3 = vld [vmem:[#allocation6 + $0xb4] sm:$0xf0]  ;;  %v5464_v5 = vor.u32 %v6470_v63, %v5463_v61 }
  0x4c   : > { %1679 = vmatpush.bf16.msra.mxu1 %v5536_v45  ;;  %v6394_v2 = vld [vmem:[#allocation6 + $0x94] sm:$0xf]  ;;  %v5752_v6 = vor.u32 %v6542_v1, %v5751_v0  ;;  %v5139_v7 = vld [vmem:[#allocation6 + $0x48] sm:$0xf]  ;;  %v6389_v8 = vld [vmem:[#allocation6 + $0x68] sm:$0xf0] }
  0x4d   : > { %1708 = vmatpush.bf16.msra.mxu2 %v5824_v46  ;;  %v5427_v9 = vld [vmem:[#allocation6 + $0x288] sm:$0xf]  ;;  %v5180_v10 = vor.u32 %v6394_v2, %v5177_v3  ;;  %v6461_v11 = vld [vmem:[#allocation6 + $0x2a8] sm:$0xf0]  ;;  %v5141_v15 = vld [vmem:[#allocation6 + $0x6c] sm:$0xf0]  ;;  %v5140_v16 = vor.u32 %v6389_v8, %v5139_v7 }
  0x4e   : > { %1737 = vmatpush.bf16.msra.mxu3 %v5252_v50  ;;  %v5715_v12 = vld [vmem:[#allocation6 + $0x4c8] sm:$0xf]  ;;  %v6533_v13 = vld [vmem:[#allocation6 + $0x4e8] sm:$0xf0]  ;;  %v5103_v17 = vld [vmem:[#allocation6] sm:$0xf]  ;;  %v5428_v20 = vor.u32 %v6461_v11, %v5427_v9 }
  0x4f   : > { %1651 = vmatpush.bf16.msra.mxu0 %v5212_v56  ;;  %v6385_v14 = vld [vmem:[#allocation6 + $0x4c] sm:$0xf]  ;;  %v6380_v18 = vld [vmem:[#allocation6 + $0x20] sm:$0xf0]  ;;  %v5391_v19 = vld [vmem:[#allocation6 + $0x240] sm:$0xf]  ;;  %v5716_v21 = vor.u32 %v6533_v13, %v5715_v12 }
  0x50   : > { %1680 = vmatpush.bf16.msra.mxu1 %v5500_v57  ;;  %v6452_v22 = vld [vmem:[#allocation6 + $0x260] sm:$0xf0]  ;;  %v5679_v23 = vld [vmem:[#allocation6 + $0x480] sm:$0xf]  ;;  %v5144_v25 = vor.u32 %v6385_v14, %v5141_v15  ;;  %v5105_v27 = vld [vmem:[#allocation6 + $0x24] sm:$0xf0]  ;;  %v5104_v32 = vor.u32 %v6380_v18, %v5103_v17 }
  0x51   : > { %1709 = vmatpush.bf16.msra.mxu2 %v5788_v58  ;;  %v6524_v24 = vld [vmem:[#allocation6 + $0x4a0] sm:$0xf0]  ;;  %v270_v29 = vld [vmem:[%s7294_s24 + $0x18] sm:$0xff]  ;;  %v5363_v30 = vld [vmem:[#allocation6 + $0x200] sm:$0xf]  ;;  %v5392_v36 = vor.u32 %v6452_v22, %v5391_v19  ;;  %s7151_s21 = smov 64  }
  0x52   : > { %1738 = vmatpush.bf16.msra.mxu3 %v5216_v62  ;;  %v6376_v26 = vld [vmem:[#allocation6 + $0x4] sm:$0xf]  ;;  %v268_v33 = vld [vmem:[%s7294_s24 + $0x8] sm:$0xff]  ;;  %v5651_v34 = vld [vmem:[#allocation6 + $0x440] sm:$0xf]  ;;  %v5680_v37 = vor.u32 %v6524_v24, %v5679_v23  ;;  %vm2489_vm0 = vcmask 523264  }
  0x53   : > { %1652 = vmatpush.bf16.msra.mxu0 %v5176_v4  ;;  %v267_v28 = vld [vmem:[%s7294_s24] sm:$0xff]  ;;  %v269_v39 = vld [vmem:[%s7294_s24 + $0x10] sm:$0xff]  ;;  %v272_v40 = vld [vmem:[%s7294_s24 + $0x28] sm:$0xff]  ;;  %v5108_v41 = vor.u32 %v6376_v26, %v5105_v27  ;;  %vm3042_vm9 = vcmask 1048064   ;;  %s8926_s26 = scalar_lea.vmem [#allocation11], %s6666_s13  ;;  %s6667_s11 = smul.u32 192, %s7200_s19 }
  0x54   : > { %1681 = vmatpush.bf16.msra.mxu1 %v5464_v5  ;;  %v6444_v31 = vld [vmem:[#allocation6 + $0x220] sm:$0xf0]  ;;  %v6583_v43 = vld [vmem:[#allocation6 + $0x67c] sm:$0xf]  ;;  %v5933_v44 = vld [vmem:[#allocation6 + $0x69c] sm:$0xf0]  ;;  %v7314_v46 = vpack.c.bf16 %v270_v29, %v267_v28  ;;  %v7318_v52 = vpack.c.bf16 %v272_v40, %v269_v39 }
  0x55   : > { %1710 = vmatpush.bf16.msra.mxu2 %v5752_v6  ;;  %v6516_v35 = vld [vmem:[#allocation6 + $0x460] sm:$0xf0]  ;;  %v5364_v42 = vor.u32 %v6444_v31, %v5363_v30  ;;  %v6511_v45 = vld [vmem:[#allocation6 + $0x43c] sm:$0xf]  ;;  %v5645_v48 = vld [vmem:[#allocation6 + $0x45c] sm:$0xf0]  ;;  %v5936_v55 = vor.u32 %v6583_v43, %v5933_v44  ;;  %s4984_s20 = scalar_lea.hbm %s9045_s4, %s6667_s11 }
  0x56   : > { %1739 = vmatpush.bf16.msra.mxu3 %v5180_v10  ;;  %v271_v38 = vld [vmem:[%s7294_s24 + $0x20] sm:$0xff]  ;;  %v5652_v47 = vor.u32 %v6516_v35, %v5651_v34  ;;  %v5327_v49 = vld [vmem:[#allocation6 + $0x1b8] sm:$0xf]  ;;  %v6435_v50 = vld [vmem:[#allocation6 + $0x1d8] sm:$0xf0]  ;;  %v5648_v56 = vor.u32 %v6511_v45, %v5645_v48  ;;  %s4985_s27 = sshll.u32 %s8926_s26, 4  ;;  %s4986_s27 = int_to_ptr.vmem [resolvable:$true] %s4985_s27 }
  0x57   : > { %1653 = vmatpush.bf16.msra.mxu0 %v5140_v16  ;;  %v7316_v51 = vpack.c.bf16 %v271_v38, %v268_v33  ;;  %v5615_v53 = vld [vmem:[#allocation6 + $0x3f8] sm:$0xf]  ;;  %v6507_v54 = vld [vmem:[#allocation6 + $0x418] sm:$0xf0]  ;;  %v5328_v57 = vor.u32 %v6435_v50, %v5327_v49  ;;  %v6574_v59 = vld [vmem:[#allocation6 + $0x634] sm:$0xf] }
  0x58   : > { %1682 = vmatpush.bf16.msra.mxu1 %v5428_v20  ;;  %v5616_v58 = vor.u32 %v6507_v54, %v5615_v53  ;;  %v5897_v60 = vld [vmem:[#allocation6 + $0x654] sm:$0xf0]  ;;  %v6502_v61 = vld [vmem:[#allocation6 + $0x3f4] sm:$0xf]  ;;  %v5291_v0 = vld [vmem:[#allocation6 + $0x170] sm:$0xf] }
  0x59   : > { %1711 = vmatpush.bf16.msra.mxu2 %v5716_v21  ;;  %v5900_v62 = vor.u32 %v6574_v59, %v5897_v60  ;;  %v5609_v63 = vld [vmem:[#allocation6 + $0x414] sm:$0xf0]  ;;  %v6426_v1 = vld [vmem:[#allocation6 + $0x190] sm:$0xf0]  ;;  %v5579_v4 = vld [vmem:[#allocation6 + $0x3b0] sm:$0xf] }
  0x5a   : > { %1740 = vmatpush.bf16.msra.mxu3 %v5144_v25  ;;  %v5612_v2 = vor.u32 %v6502_v61, %v5609_v63  ;;  %v5292_v3 = vor.u32 %v6426_v1, %v5291_v0  ;;  %v6498_v5 = vld [vmem:[#allocation6 + $0x3d0] sm:$0xf0]  ;;  %v6493_v6 = vld [vmem:[#allocation6 + $0x3ac] sm:$0xf]  ;;  %v5573_v8 = vld [vmem:[#allocation6 + $0x3cc] sm:$0xf0] }
  0x5b   : > { %1654 = vmatpush.bf16.msra.mxu0 %v5104_v32  ;;  %v5580_v7 = vor.u32 %v6498_v5, %v5579_v4  ;;  %v6565_v9 = vld [vmem:[#allocation6 + $0x5ec] sm:$0xf]  ;;  %v5861_v10 = vld [vmem:[#allocation6 + $0x60c] sm:$0xf0]  ;;  %v5255_v12 = vld [vmem:[#allocation6 + $0x128] sm:$0xf]  ;;  %v5576_v14 = vor.u32 %v6493_v6, %v5573_v8 }
  0x5c   : > { %1683 = vmatpush.bf16.msra.mxu1 %v5392_v36  ;;  %v5864_v11 = vor.u32 %v6565_v9, %v5861_v10  ;;  %v6417_v13 = vld [vmem:[#allocation6 + $0x148] sm:$0xf0]  ;;  %v6484_v16 = vld [vmem:[#allocation6 + $0x364] sm:$0xf]  ;;  %v5825_v18 = vld [vmem:[#allocation6 + $0x5c4] sm:$0xf0] }
  0x5d   : > { %1712 = vmatpush.bf16.msra.mxu2 %v5680_v37  ;;  %v5256_v15 = vor.u32 %v6417_v13, %v5255_v12  ;;  %v6556_v17 = vld [vmem:[#allocation6 + $0x5a4] sm:$0xf]  ;;  %v5537_v19 = vld [vmem:[#allocation6 + $0x384] sm:$0xf0]  ;;  %v6489_v21 = vld [vmem:[#allocation6 + $0x388] sm:$0xf0] }
  0x5e   : > { %1741 = vmatpush.bf16.msra.mxu3 %v5108_v41  ;;  %1655 = vmatmul.bf16.vlgmr.msra.gmra.mxu0 %v7314_v46  ;;  %v5543_v20 = vld [vmem:[#allocation6 + $0x368] sm:$0xf]  ;;  %v273_v22 = vld [vmem:[%s7294_s24 + $0x30] sm:$0xff]  ;;  %v274_v24 = vld [vmem:[%s7294_s24 + $0x38] sm:$0xff]  ;;  %v5828_v29 = vor.u32 %v6556_v17, %v5825_v18  ;;  %v5540_v30 = vor.u32 %v6484_v16, %v5537_v19  ;;  %s4987_s28 = sshll.u32 %s4984_s20, 4  ;;  %s4973_s19 = scalar_lea.sflag [#allocation5], %s7288_s10  ;;  %s4988_s28 = int_to_ptr.hbm [resolvable:$true] %s4987_s28 }
  0x5f   : > { %1684 = vmatmul.bf16.vlgmr.msra.gmra.mxu1 %v7316_v51  ;;  %1763 = vmatpush.bf16.msrb.mxu0 %v5648_v56  ;;  %v276_v23 = vld [vmem:[%s7294_s24 + $0x48] sm:$0xff]  ;;  %v5544_v25 = vor.u32 %v6489_v21, %v5543_v20  ;;  %v277_v26 = vld [vmem:[%s7294_s24 + $0x50] sm:$0xff]  ;;  %v275_v27 = vld [vmem:[%s7294_s24 + $0x40] sm:$0xff]  ;;  %s7080_s29 = sshra.s32 %s4988_s28, 4  ;;  %s7086_s7 = scalar_lea.hbm %s9045_s4, 384  ;;  %s7081_s29 = int_to_ptr.hbm [resolvable:$true] %s7080_s29 }
  0x60   : > { %1713 = vmatmul.bf16.vlgmr.msra.gmra.mxu2 %v7318_v52  ;;  %1792 = vmatpush.bf16.msrb.mxu1 %v5936_v55  ;;  %v278_v28 = vld [vmem:[%s7294_s24 + $0x58] sm:$0xff]  ;;  %v7330_v31 = vpack.c.bf16 %v276_v23, %v273_v22  ;;  %v7332_v32 = vpack.c.bf16 %v277_v26, %v274_v24  ;;  %v5501_v35 = vld [vmem:[#allocation6 + $0x33c] sm:$0xf0]  ;;  %v6408_v41 = vld [vmem:[#allocation6 + $0x100] sm:$0xf0]  ;;  %s7082_s8 = scalar_lea.hbm %s7081_s29, 192  ;;  %p7087_p11 = scmp.lt.s32.totalorder %s7081_s29, %s9045_s4 }
  0x61   : > { %1821 = vmatpush.bf16.msrb.mxu2 %v5364_v42  ;;  %1742 = vmatmul.bf16.vlgmr.msra.gmra.mxu3 %v7314_v46  ;;  %v7334_v33 = vpack.c.bf16 %v278_v28, %v275_v27  ;;  %v6475_v34 = vld [vmem:[#allocation6 + $0x31c] sm:$0xf]  ;;  %v5789_v38 = vld [vmem:[#allocation6 + $0x57c] sm:$0xf0]  ;;  %v6480_v43 = vld [vmem:[#allocation6 + $0x340] sm:$0xf0]  ;;  %p7083_p1 = scmp.ne.s32.totalorder %s7081_s29, %s7082_s8  ;;  %p7088_p9 = scmp.lt.s32.totalorder %s7086_s7, %s7082_s8 }
  0x62   : > { %1850 = vmatpush.bf16.msrb.mxu3 %v5652_v47  ;;  %v5504_v36 = vor.u32 %v6475_v34, %v5501_v35  ;;  %v6547_v37 = vld [vmem:[#allocation6 + $0x55c] sm:$0xf]  ;;  %v5219_v39 = vld [vmem:[#allocation6 + $0xe0] sm:$0xf]  ;;  %v6466_v47 = vld [vmem:[#allocation6 + $0x2d4] sm:$0xf] }
  0x63   : > { %1764 = vmatpush.bf16.msrb.mxu0 %v5612_v2  ;;  %v5792_v40 = vor.u32 %v6547_v37, %v5789_v38  ;;  %v5507_v42 = vld [vmem:[#allocation6 + $0x320] sm:$0xf]  ;;  %v5220_v44 = vor.u32 %v6408_v41, %v5219_v39  ;;  %v5465_v48 = vld [vmem:[#allocation6 + $0x2f4] sm:$0xf0]  ;;  %v6538_v49 = vld [vmem:[#allocation6 + $0x514] sm:$0xf]  ;;  %p7084_p4 = pnand %p7083_p1, %p7262_p7  ;;  %p7089_p2 = por %p7088_p9, %p7087_p11 }
  0x64   : > { %1793 = vmatpush.bf16.msrb.mxu1 %v5900_v62  ;;  %v5508_v45 = vor.u32 %v6480_v43, %v5507_v42  ;;  %v5468_v50 = vor.u32 %v6466_v47, %v5465_v48  ;;  %v5753_v53 = vld [vmem:[#allocation6 + $0x534] sm:$0xf0]  ;;  %v6399_v55 = vld [vmem:[#allocation6 + $0xb8] sm:$0xf0]  ;;  %v6457_v60 = vld [vmem:[#allocation6 + $0x28c] sm:$0xf] }
  0x65   : > { %1822 = vmatpush.bf16.msrb.mxu2 %v5328_v57  ;;  %v5183_v54 = vld [vmem:[#allocation6 + $0x98] sm:$0xf]  ;;  %v5756_v56 = vor.u32 %v6538_v49, %v5753_v53  ;;  %v6471_v59 = vld [vmem:[#allocation6 + $0x2f8] sm:$0xf0]  ;;  %v5429_v62 = vld [vmem:[#allocation6 + $0x2ac] sm:$0xf0]  ;;  %p7085_p8 = pneg %p7084_p4 }
  0x66   : > { %1851 = vmatpush.bf16.msrb.mxu3 %v5616_v58  ;;  %v5184_v57 = vor.u32 %v6399_v55, %v5183_v54  ;;  %v5471_v58 = vld [vmem:[#allocation6 + $0x2d8] sm:$0xf]  ;;  %v6529_v63 = vld [vmem:[#allocation6 + $0x4cc] sm:$0xf]  ;;  %v5717_v0 = vld [vmem:[#allocation6 + $0x4ec] sm:$0xf0] }
  0x67   : > { %1765 = vmatpush.bf16.msrb.mxu0 %v5576_v14  ;;  %v5472_v61 = vor.u32 %v6471_v59, %v5471_v58  ;;  %v279_v1 = vld [vmem:[%s7294_s24 + $0x60] sm:$0xff]  ;;  %v282_v2 = vld [vmem:[%s7294_s24 + $0x78] sm:$0xff]  ;;  %v5147_v4 = vld [vmem:[#allocation6 + $0x50] sm:$0xf]  ;;  %p7090_p10 = pnand %p7089_p2, %p7085_p8 }
  0x68   : > { %1794 = vmatpush.bf16.msrb.mxu1 %v5864_v11  ;;  %v6390_v5 = vld [vmem:[#allocation6 + $0x70] sm:$0xf0]  ;;  %v5435_v6 = vld [vmem:[#allocation6 + $0x290] sm:$0xf]  ;;  %v6448_v9 = vld [vmem:[#allocation6 + $0x244] sm:$0xf]  ;;  %v7346_v22 = vpack.c.bf16 %v282_v2, %v279_v1 }
  0x69   : > { %1823 = vmatpush.bf16.msrb.mxu2 %v5292_v3  ;;  %v5432_v3 = vor.u32 %v6457_v60, %v5429_v62  ;;  %v6462_v8 = vld [vmem:[#allocation6 + $0x2b0] sm:$0xf0]  ;;  %v5393_v10 = vld [vmem:[#allocation6 + $0x264] sm:$0xf0]  ;;  %v5148_v12 = vor.u32 %v6390_v5, %v5147_v4  ;;  %v6520_v14 = vld [vmem:[#allocation6 + $0x484] sm:$0xf] }
  0x6a   : > { %1852 = vmatpush.bf16.msrb.mxu3 %v5580_v7  ;;  %v5720_v7 = vor.u32 %v6529_v63, %v5717_v0  ;;  %v280_v11 = vld [vmem:[%s7294_s24 + $0x68] sm:$0xff]  ;;  %v5436_v13 = vor.u32 %v6462_v8, %v5435_v6  ;;  %v283_v16 = vld [vmem:[%s7294_s24 + $0x80] sm:$0xff]  ;;  %v281_v17 = vld [vmem:[%s7294_s24 + $0x70] sm:$0xff]  ;;  %v5396_v19 = vor.u32 %v6448_v9, %v5393_v10 }
  0x6b   : > { %1766 = vmatpush.bf16.msrb.mxu0 %v5540_v30  ;;  %v284_v18 = vld [vmem:[%s7294_s24 + $0x88] sm:$0xff]  ;;  %v7348_v26 = vpack.c.bf16 %v283_v16, %v280_v11  ;;  %v285_v30 = vld [vmem:[%s7294_s24 + $0x90] sm:$0xff]  ;;  %v286_v35 = vld [vmem:[%s7294_s24 + $0x98] sm:$0xff] }
  0x6c   : > { %1795 = vmatpush.bf16.msrb.mxu1 %v5828_v29  ;;  %v5111_v20 = vld [vmem:[#allocation6 + $0x8] sm:$0xf]  ;;  %v6381_v21 = vld [vmem:[#allocation6 + $0x28] sm:$0xf0]  ;;  %v7350_v27 = vpack.c.bf16 %v284_v18, %v281_v17  ;;  %v287_v37 = vld [vmem:[%s7294_s24 + $0xa0] sm:$0xff] }
  0x6d   : > { %1824 = vmatpush.bf16.msrb.mxu2 %v5256_v15  ;;  %v5681_v15 = vld [vmem:[#allocation6 + $0x4a4] sm:$0xf0]  ;;  %v5112_v28 = vor.u32 %v6381_v21, %v5111_v20  ;;  %v290_v38 = vld [vmem:[%s7294_s24 + $0xb8] sm:$0xff]  ;;  %v6512_v42 = vld [vmem:[#allocation6 + $0x444] sm:$0xf] }
  0x6e   : > { %1853 = vmatpush.bf16.msrb.mxu3 %v5544_v25  ;;  %1660 = vmatmul.bf16.gmra.mxu0 %v7330_v31  ;;  %v5684_v23 = vor.u32 %v6520_v14, %v5681_v15  ;;  %v5399_v24 = vld [vmem:[#allocation6 + $0x248] sm:$0xf]  ;;  %v6453_v25 = vld [vmem:[#allocation6 + $0x268] sm:$0xf0]  ;;  %v7366_v41 = vpack.c.bf16 %v290_v38, %v287_v37  ;;  %v6440_v48 = vld [vmem:[#allocation6 + $0x204] sm:$0xf] }
  0x6f   : > { %1689 = vmatmul.bf16.gmra.mxu1 %v7332_v32  ;;  %1767 = vmatpush.bf16.msrb.mxu0 %v5504_v36  ;;  %v5400_v29 = vor.u32 %v6453_v25, %v5399_v24  ;;  %v288_v34 = vld [vmem:[%s7294_s24 + $0xa8] sm:$0xff]  ;;  %v289_v36 = vld [vmem:[%s7294_s24 + $0xb0] sm:$0xff]  ;;  %v5939_v54 = vld [vmem:[#allocation6 + $0x680] sm:$0xf] }
  0x70   : > { %1718 = vmatmul.bf16.gmra.mxu2 %v7334_v33  ;;  %1796 = vmatpush.bf16.msrb.mxu1 %v5792_v40  ;;  %v7362_v39 = vpack.c.bf16 %v288_v34, %v285_v30  ;;  %v7364_v40 = vpack.c.bf16 %v289_v36, %v286_v35  ;;  %v5653_v43 = vld [vmem:[#allocation6 + $0x464] sm:$0xf0]  ;;  %v6588_v55 = vld [vmem:[#allocation6 + $0x6a0] sm:$0xf0]  ;;  %v5617_v58 = vld [vmem:[#allocation6 + $0x41c] sm:$0xf0] }
  0x71   : > { %1747 = vmatmul.bf16.gmra.mxu3 %v7330_v31  ;;  %1825 = vmatpush.bf16.msrb.mxu2 %v5220_v44  ;;  %v6584_v44 = vld [vmem:[#allocation6 + $0x684] sm:$0xf]  ;;  %v5941_v47 = vld [vmem:[#allocation6 + $0x6a4] sm:$0xf0]  ;;  %v6575_v59 = vld [vmem:[#allocation6 + $0x63c] sm:$0xf] }
  0x72   : > { %1854 = vmatpush.bf16.msrb.mxu3 %v5508_v45  ;;  %v5656_v45 = vor.u32 %v6512_v42, %v5653_v43  ;;  %v5365_v49 = vld [vmem:[#allocation6 + $0x224] sm:$0xf0]  ;;  %v5905_v60 = vld [vmem:[#allocation6 + $0x65c] sm:$0xf0]  ;;  %v6431_v63 = vld [vmem:[#allocation6 + $0x1bc] sm:$0xf] }
  0x73   : > { %1768 = vmatpush.bf16.msrb.mxu0 %v5468_v50  ;;  %v5944_v50 = vor.u32 %v6584_v44, %v5941_v47  ;;  %v5368_v53 = vor.u32 %v6440_v48, %v5365_v49  ;;  %v5908_v62 = vor.u32 %v6575_v59, %v5905_v60  ;;  %v5329_v0 = vld [vmem:[#allocation6 + $0x1dc] sm:$0xf0]  ;;  %v5903_v1 = vld [vmem:[#allocation6 + $0x638] sm:$0xf]  ;;  %v6494_v4 = vld [vmem:[#allocation6 + $0x3b4] sm:$0xf] }
  0x74   : > { %1797 = vmatpush.bf16.msrb.mxu1 %v5756_v56  ;;  %v6503_v56 = vld [vmem:[#allocation6 + $0x3fc] sm:$0xf]  ;;  %v5332_v2 = vor.u32 %v6431_v63, %v5329_v0  ;;  %v5581_v5 = vld [vmem:[#allocation6 + $0x3d4] sm:$0xf0]  ;;  %v6566_v8 = vld [vmem:[#allocation6 + $0x5f4] sm:$0xf] }
  0x75   : > { %1826 = vmatpush.bf16.msrb.mxu2 %v5184_v57  ;;  %v5940_v57 = vor.u32 %v6588_v55, %v5939_v54  ;;  %v5869_v9 = vld [vmem:[#allocation6 + $0x614] sm:$0xf0]  ;;  %v5867_v10 = vld [vmem:[#allocation6 + $0x5f0] sm:$0xf]  ;;  %v6485_v17 = vld [vmem:[#allocation6 + $0x36c] sm:$0xf] }
  0x76   : > { %1855 = vmatpush.bf16.msrb.mxu3 %v5472_v61  ;;  %v5620_v61 = vor.u32 %v6503_v56, %v5617_v58  ;;  %v5872_v11 = vor.u32 %v6566_v8, %v5869_v9  ;;  %v5293_v14 = vld [vmem:[#allocation6 + $0x194] sm:$0xf0]  ;;  %v5545_v18 = vld [vmem:[#allocation6 + $0x38c] sm:$0xf0]  ;;  %v6561_v21 = vld [vmem:[#allocation6 + $0x5c8] sm:$0xf0] }
  0x77   : > { %1769 = vmatpush.bf16.msrb.mxu0 %v5432_v3  ;;  %v6579_v3 = vld [vmem:[#allocation6 + $0x658] sm:$0xf0]  ;;  %v5548_v20 = vor.u32 %v6485_v17, %v5545_v18  ;;  %v5257_v24 = vld [vmem:[#allocation6 + $0x14c] sm:$0xf0]  ;;  %v6557_v25 = vld [vmem:[#allocation6 + $0x5ac] sm:$0xf] }
  0x78   : > { %1798 = vmatpush.bf16.msrb.mxu1 %v5720_v7  ;;  %v5904_v6 = vor.u32 %v6579_v3, %v5903_v1  ;;  %v5584_v7 = vor.u32 %v6494_v4, %v5581_v5  ;;  %v5795_v35 = vld [vmem:[#allocation6 + $0x560] sm:$0xf]  ;;  %v6552_v36 = vld [vmem:[#allocation6 + $0x580] sm:$0xf0]  ;;  %v5221_v42 = vld [vmem:[#allocation6 + $0x104] sm:$0xf0] }
  0x79   : > { %1827 = vmatpush.bf16.msrb.mxu2 %v5148_v12  ;;  %v6570_v12 = vld [vmem:[#allocation6 + $0x610] sm:$0xf0]  ;;  %v6404_v37 = vld [vmem:[#allocation6 + $0xe4] sm:$0xf]  ;;  %v5796_v38 = vor.u32 %v6552_v36, %v5795_v35  ;;  %v5509_v44 = vld [vmem:[#allocation6 + $0x344] sm:$0xf0] }
  0x7a   : > { %1856 = vmatpush.bf16.msrb.mxu3 %v5436_v13  ;;  %v6422_v13 = vld [vmem:[#allocation6 + $0x174] sm:$0xf]  ;;  %v5868_v15 = vor.u32 %v6570_v12, %v5867_v10  ;;  %v6476_v43 = vld [vmem:[#allocation6 + $0x324] sm:$0xf]  ;;  %v5797_v49 = vld [vmem:[#allocation6 + $0x584] sm:$0xf0] }
  0x7b   : > { %1770 = vmatpush.bf16.msrb.mxu0 %v5396_v19  ;;  %v5296_v16 = vor.u32 %v6422_v13, %v5293_v14  ;;  %v5831_v19 = vld [vmem:[#allocation6 + $0x5a8] sm:$0xf]  ;;  %v5512_v47 = vor.u32 %v6476_v43, %v5509_v44  ;;  %v6548_v48 = vld [vmem:[#allocation6 + $0x564] sm:$0xf]  ;;  %v6543_v54 = vld [vmem:[#allocation6 + $0x538] sm:$0xf0] }
  0x7c   : > { %1799 = vmatpush.bf16.msrb.mxu1 %v5684_v23  ;;  %v6413_v23 = vld [vmem:[#allocation6 + $0x12c] sm:$0xf]  ;;  %v5832_v34 = vor.u32 %v6561_v21, %v5831_v19  ;;  %v6395_v55 = vld [vmem:[#allocation6 + $0x9c] sm:$0xf]  ;;  %v5185_v56 = vld [vmem:[#allocation6 + $0xbc] sm:$0xf0] }
  0x7d   : > { %1828 = vmatpush.bf16.msrb.mxu2 %v5112_v28  ;;  %v5833_v28 = vld [vmem:[#allocation6 + $0x5cc] sm:$0xf0]  ;;  %v5188_v58 = vor.u32 %v6395_v55, %v5185_v56  ;;  %v6467_v59 = vld [vmem:[#allocation6 + $0x2dc] sm:$0xf]  ;;  %v5473_v60 = vld [vmem:[#allocation6 + $0x2fc] sm:$0xf0] }
  0x7e   : > { %1665 = vmatmul.bf16.gmra.mxu0 %v7346_v22  ;;  %1857 = vmatpush.bf16.msrb.mxu3 %v5400_v29  ;;  %v5260_v29 = vor.u32 %v6413_v23, %v5257_v24  ;;  %v5836_v30 = vor.u32 %v6557_v25, %v5833_v28  ;;  %v5761_v63 = vld [vmem:[#allocation6 + $0x53c] sm:$0xf0]  ;;  %v5723_v0 = vld [vmem:[#allocation6 + $0x4d0] sm:$0xf]  ;;  %v6534_v1 = vld [vmem:[#allocation6 + $0x4f0] sm:$0xf0] }
  0x7f   : > { %1694 = vmatmul.bf16.gmra.mxu1 %v7348_v26  ;;  %1879 = vmatpush.bf16.msra.mxu0 %v5940_v57  ;;  %v6386_v3 = vld [vmem:[#allocation6 + $0x54] sm:$0xf]  ;;  %v5149_v4 = vld [vmem:[#allocation6 + $0x74] sm:$0xf0]  ;;  %v5687_v13 = vld [vmem:[#allocation6 + $0x488] sm:$0xf] }
  0x80   : > { %1723 = vmatmul.bf16.gmra.mxu2 %v7350_v27  ;;  %1908 = vmatpush.bf16.msra.mxu1 %v5368_v53  ;;  %v5800_v53 = vor.u32 %v6548_v48, %v5797_v49  ;;  %v6458_v5 = vld [vmem:[#allocation6 + $0x294] sm:$0xf]  ;;  %v5725_v9 = vld [vmem:[#allocation6 + $0x4f4] sm:$0xf0]  ;;  %v5152_v10 = vor.u32 %v6386_v3, %v5149_v4  ;;  %v6525_v14 = vld [vmem:[#allocation6 + $0x4a8] sm:$0xf0] }
  0x81   : > { %1752 = vmatmul.bf16.gmra.mxu3 %v7346_v22  ;;  %1937 = vmatpush.bf16.msra.mxu2 %v5656_v45  ;;  %v5224_v45 = vor.u32 %v6404_v37, %v5221_v42  ;;  %v6530_v8 = vld [vmem:[#allocation6 + $0x4d4] sm:$0xf]  ;;  %v5113_v17 = vld [vmem:[#allocation6 + $0x2c] sm:$0xf0]  ;;  %v6449_v18 = vld [vmem:[#allocation6 + $0x24c] sm:$0xf] }
  0x82   : > { %1966 = vmatpush.bf16.msra.mxu3 %v5944_v50  ;;  %v5759_v50 = vld [vmem:[#allocation6 + $0x518] sm:$0xf]  ;;  %v5728_v12 = vor.u32 %v6530_v8, %v5725_v9  ;;  %v5401_v19 = vld [vmem:[#allocation6 + $0x26c] sm:$0xf0]  ;;  %v6521_v23 = vld [vmem:[#allocation6 + $0x48c] sm:$0xf] }
  0x83   : > { %1880 = vmatpush.bf16.msra.mxu0 %v5904_v6  ;;  %v5760_v57 = vor.u32 %v6543_v54, %v5759_v50  ;;  %v5724_v6 = vor.u32 %v6534_v1, %v5723_v0  ;;  %v5404_v21 = vor.u32 %v6449_v18, %v5401_v19  ;;  %v5689_v24 = vld [vmem:[#allocation6 + $0x4ac] sm:$0xf0]  ;;  %v5947_v28 = vld [vmem:[#allocation6 + $0x688] sm:$0xf]  ;;  %v5911_v48 = vld [vmem:[#allocation6 + $0x640] sm:$0xf] }
  0x84   : > { %1909 = vmatpush.bf16.msra.mxu1 %v5332_v2  ;;  %v5692_v25 = vor.u32 %v6521_v23, %v5689_v24  ;;  %v5373_v35 = vld [vmem:[#allocation6 + $0x22c] sm:$0xf0]  ;;  %v5659_v37 = vld [vmem:[#allocation6 + $0x448] sm:$0xf]  ;;  %v6580_v50 = vld [vmem:[#allocation6 + $0x660] sm:$0xf0] }
  0x85   : > { %1938 = vmatpush.bf16.msra.mxu2 %v5620_v61  ;;  %v6539_v61 = vld [vmem:[#allocation6 + $0x51c] sm:$0xf]  ;;  %v5337_v54 = vld [vmem:[#allocation6 + $0x1e4] sm:$0xf0]  ;;  %v5912_v56 = vor.u32 %v6580_v50, %v5911_v48  ;;  %v5263_v23 = vld [vmem:[#allocation6 + $0x130] sm:$0xf] }
  0x86   : > { %1967 = vmatpush.bf16.msra.mxu3 %v5908_v62  ;;  %v5476_v62 = vor.u32 %v6467_v59, %v5473_v60  ;;  %v5764_v2 = vor.u32 %v6539_v61, %v5761_v63  ;;  %v6508_v59 = vld [vmem:[#allocation6 + $0x420] sm:$0xf0]  ;;  %v6423_v9 = vld [vmem:[#allocation6 + $0x17c] sm:$0xf]  ;;  %v6409_v48 = vld [vmem:[#allocation6 + $0x108] sm:$0xf0] }
  0x87   : > { %1881 = vmatpush.bf16.msra.mxu0 %v5868_v15  ;;  %v6377_v15 = vld [vmem:[#allocation6 + $0xc] sm:$0xf]  ;;  %v6436_v63 = vld [vmem:[#allocation6 + $0x1e0] sm:$0xf0] }
  0x88   : > { %1910 = vmatpush.bf16.msra.mxu1 %v5296_v16  ;;  %v5688_v16 = vor.u32 %v6525_v14, %v5687_v13  ;;  %v6427_v13 = vld [vmem:[#allocation6 + $0x198] sm:$0xf0]  ;;  %v5587_v14 = vld [vmem:[#allocation6 + $0x3b8] sm:$0xf] }
  0x89   : > { %1939 = vmatpush.bf16.msra.mxu2 %v5584_v7  ;;  %v5437_v7 = vld [vmem:[#allocation6 + $0x2b4] sm:$0xf0] }
  0x8a   : > { %1968 = vmatpush.bf16.msra.mxu3 %v5872_v11  ;;  %v5440_v11 = vor.u32 %v6458_v5, %v5437_v7  ;;  %v6571_v7 = vld [vmem:[#allocation6 + $0x618] sm:$0xf0] }
  0x8b   : > { %1882 = vmatpush.bf16.msra.mxu0 %v5832_v34 }
  0x8c   : > { %1911 = vmatpush.bf16.msra.mxu1 %v5260_v29  ;;  %v6589_v29 = vld [vmem:[#allocation6 + $0x6a8] sm:$0xf0] }
  0x8d   : > { %1940 = vmatpush.bf16.msra.mxu2 %v5548_v20  ;;  %v5116_v20 = vor.u32 %v6377_v15, %v5113_v17  ;;  %v5948_v34 = vor.u32 %v6589_v29, %v5947_v28  ;;  %v6499_v15 = vld [vmem:[#allocation6 + $0x3d8] sm:$0xf0] }
  0x8e   : > { %1670 = vmatmul.bf16.gmra.mxu0 %v7362_v39  ;;  %1969 = vmatpush.bf16.msra.mxu3 %v5836_v30  ;;  %v6441_v30 = vld [vmem:[#allocation6 + $0x20c] sm:$0xf]  ;;  %v5588_v17 = vor.u32 %v6499_v15, %v5587_v14  ;;  %v5193_v14 = vld [vmem:[#allocation6 + $0xc4] sm:$0xf0] }
  0x8f   : > { %1699 = vmatmul.bf16.gmra.mxu1 %v7364_v40  ;;  %1883 = vmatpush.bf16.msra.mxu0 %v5796_v38  ;;  %v5376_v36 = vor.u32 %v6441_v30, %v5373_v35  ;;  %v6517_v38 = vld [vmem:[#allocation6 + $0x468] sm:$0xf0]  ;;  %v6418_v30 = vld [vmem:[#allocation6 + $0x150] sm:$0xf0] }
  0x90   : > { %1728 = vmatmul.bf16.gmra.mxu2 %v7366_v41  ;;  %1912 = vmatpush.bf16.msra.mxu1 %v5224_v45  ;;  %v5660_v42 = vor.u32 %v6517_v38, %v5659_v37  ;;  %v5371_v45 = vld [vmem:[#allocation6 + $0x208] sm:$0xf]  ;;  %v6490_v35 = vld [vmem:[#allocation6 + $0x390] sm:$0xf0] }
  0x91   : > { %1757 = vmatmul.bf16.gmra.mxu3 %v7362_v39  ;;  %1941 = vmatpush.bf16.msra.mxu2 %v5512_v47  ;;  %v6445_v47 = vld [vmem:[#allocation6 + $0x228] sm:$0xf0]  ;;  %v6414_v38 = vld [vmem:[#allocation6 + $0x134] sm:$0xf] }
  0x92   : > { %1970 = vmatpush.bf16.msra.mxu3 %v5800_v53  ;;  %v5372_v49 = vor.u32 %v6445_v47, %v5371_v45  ;;  %v6432_v53 = vld [vmem:[#allocation6 + $0x1c4] sm:$0xf]  ;;  %v5227_v47 = vld [vmem:[#allocation6 + $0xe8] sm:$0xf] }
  0x93   : > { %1884 = vmatpush.bf16.msra.mxu0 %v5760_v57  ;;  %v5340_v57 = vor.u32 %v6432_v53, %v5337_v54  ;;  %v6481_v53 = vld [vmem:[#allocation6 + $0x348] sm:$0xf0]  ;;  %v5803_v54 = vld [vmem:[#allocation6 + $0x568] sm:$0xf] }
  0x94   : > { %1913 = vmatpush.bf16.msra.mxu1 %v5188_v58  ;;  %v5623_v58 = vld [vmem:[#allocation6 + $0x400] sm:$0xf] }
  0x95   : > { %1942 = vmatpush.bf16.msra.mxu2 %v5476_v62  ;;  %v5624_v60 = vor.u32 %v6508_v59, %v5623_v58  ;;  %v5335_v62 = vld [vmem:[#allocation6 + $0x1c0] sm:$0xf]  ;;  %v6405_v58 = vld [vmem:[#allocation6 + $0xec] sm:$0xf]  ;;  %v5229_v59 = vld [vmem:[#allocation6 + $0x10c] sm:$0xf0] }
  0x96   : > { %1971 = vmatpush.bf16.msra.mxu3 %v5764_v2  ;;  %v5336_v3 = vor.u32 %v6436_v63, %v5335_v62  ;;  %v5191_v63 = vld [vmem:[#allocation6 + $0xa0] sm:$0xf] }
  0x97   : > { %1885 = vmatpush.bf16.msra.mxu0 %v5724_v6  ;;  %v5875_v6 = vld [vmem:[#allocation6 + $0x5f8] sm:$0xf] }
  0x98   : > { %1914 = vmatpush.bf16.msra.mxu1 %v5152_v10  ;;  %v5876_v8 = vor.u32 %v6571_v7, %v5875_v6  ;;  %v5301_v10 = vld [vmem:[#allocation6 + $0x19c] sm:$0xf0]  ;;  %v6472_v7 = vld [vmem:[#allocation6 + $0x300] sm:$0xf0] }
  0x99   : > { %1943 = vmatpush.bf16.msra.mxu2 %v5440_v11  ;;  %v5299_v11 = vld [vmem:[#allocation6 + $0x178] sm:$0xf] }
  0x9a   : > { %1972 = vmatpush.bf16.msra.mxu3 %v5728_v12  ;;  %v5304_v12 = vor.u32 %v6423_v9, %v5301_v10  ;;  %v6544_v9 = vld [vmem:[#allocation6 + $0x540] sm:$0xf0] }
  0x9b   : > { %1886 = vmatpush.bf16.msra.mxu0 %v5688_v16  ;;  %v5300_v16 = vor.u32 %v6427_v13, %v5299_v11  ;;  %v6396_v13 = vld [vmem:[#allocation6 + $0xa4] sm:$0xf] }
  0x9c   : > { %1915 = vmatpush.bf16.msra.mxu1 %v5116_v20  ;;  %v5839_v20 = vld [vmem:[#allocation6 + $0x5b0] sm:$0xf] }
  0x9d   : > { %1944 = vmatpush.bf16.msra.mxu2 %v5404_v21  ;;  %v6562_v21 = vld [vmem:[#allocation6 + $0x5d0] sm:$0xf0] }
  0x9e   : > { %1771 = vmatmul.bf16.vlgmr.msrb.gmra.mxu0 %v7316_v51  ;;  %1973 = vmatpush.bf16.msra.mxu3 %v5692_v25  ;;  %v5840_v29 = vor.u32 %v6562_v21, %v5839_v20  ;;  %v5443_v20 = vld [vmem:[#allocation6 + $0x298] sm:$0xf]  ;;  %v6463_v21 = vld [vmem:[#allocation6 + $0x2b8] sm:$0xf0] }
  0x9f   : > { %1800 = vmatmul.bf16.vlgmr.msrb.gmra.mxu1 %v7318_v52  ;;  %1995 = vmatpush.bf16.msrb.mxu0 %v5372_v49  ;;  %v5515_v49 = vld [vmem:[#allocation6 + $0x328] sm:$0xf] }
  0xa0   : > { %1829 = vmatmul.bf16.vlgmr.msrb.gmra.mxu2 %v7314_v46  ;;  %2024 = vmatpush.bf16.msrb.mxu1 %v5660_v42  ;;  %v5265_v42 = vld [vmem:[#allocation6 + $0x154] sm:$0xf0] }
  0xa1   : > { %1858 = vmatmul.bf16.vlgmr.msrb.gmra.mxu3 %v7316_v51  ;;  %2053 = vmatpush.bf16.msrb.mxu2 %v5948_v34  ;;  %v5551_v34 = vld [vmem:[#allocation6 + $0x370] sm:$0xf]  ;;  %v5268_v45 = vor.u32 %v6414_v38, %v5265_v42 }
  0xa2   : > { %2082 = vmatpush.bf16.msrb.mxu3 %v5376_v36  ;;  %v5552_v37 = vor.u32 %v6490_v35, %v5551_v34  ;;  %v5119_v42 = vld [vmem:[#allocation6 + $0x10] sm:$0xf] }
  0xa3   : > { %1996 = vmatpush.bf16.msrb.mxu0 %v5336_v3 }
  0xa4   : > { %2025 = vmatpush.bf16.msrb.mxu1 %v5624_v60  ;;  %v5228_v60 = vor.u32 %v6409_v48, %v5227_v47 }
  0xa5   : > { %2054 = vmatpush.bf16.msrb.mxu2 %v5912_v56  ;;  %v5516_v56 = vor.u32 %v6481_v53, %v5515_v49  ;;  %v5695_v53 = vld [vmem:[#allocation6 + $0x490] sm:$0xf] }
  0xa6   : > { %2083 = vmatpush.bf16.msrb.mxu3 %v5340_v57 }
  0xa7   : > { %1997 = vmatpush.bf16.msrb.mxu0 %v5300_v16 }
  0xa8   : > { %2026 = vmatpush.bf16.msrb.mxu1 %v5588_v17  ;;  %v5196_v17 = vor.u32 %v6396_v13, %v5193_v14 }
  0xa9   : > { %2055 = vmatpush.bf16.msrb.mxu2 %v5876_v8  ;;  %v5767_v8 = vld [vmem:[#allocation6 + $0x520] sm:$0xf] }
  0xaa   : > { %2084 = vmatpush.bf16.msrb.mxu3 %v5304_v12  ;;  %v5768_v12 = vor.u32 %v6544_v9, %v5767_v8 }
  0xac   : > { %2027 = vmatpush.bf16.msrb.mxu1 %v5552_v37 }
  0xad   : > { %2056 = vmatpush.bf16.msrb.mxu2 %v5840_v29  ;;  %v6387_v29 = vld [vmem:[#allocation6 + $0x5c] sm:$0xf] }
  0xae   : > { %1776 = vmatmul.bf16.gmra.mxu0 %v7332_v32  ;;  %2085 = vmatpush.bf16.msrb.mxu3 %v5268_v45  ;;  %v5407_v45 = vld [vmem:[#allocation6 + $0x250] sm:$0xf] }
  0xaf   : > { %1805 = vmatmul.bf16.gmra.mxu1 %v7334_v33 }
  0xb0   : > { %1834 = vmatmul.bf16.gmra.mxu2 %v7330_v31  ;;  %2028 = vmatpush.bf16.msrb.mxu1 %v5516_v56 }
  0xb1   : > { %1863 = vmatmul.bf16.gmra.mxu3 %v7332_v32 }
  0xbe   : > { %1781 = vmatmul.bf16.gmra.mxu0 %v7348_v26 }
  0xbf   : > { %1810 = vmatmul.bf16.gmra.mxu1 %v7350_v27 }
  0xc0   : > { %1839 = vmatmul.bf16.gmra.mxu2 %v7346_v22 }
  0xc1   : > { %1868 = vmatmul.bf16.gmra.mxu3 %v7348_v26 }
  0xce   : > { %1786 = vmatmul.bf16.gmra.mxu0 %v7364_v40 }
  0xcf   : > { %1815 = vmatmul.bf16.gmra.mxu1 %v7366_v41 }
  0xd0   : > { %1844 = vmatmul.bf16.gmra.mxu2 %v7362_v39 }
  0xd1   : > { %1873 = vmatmul.bf16.gmra.mxu3 %v7364_v40 }
  0xdb   : > { %v1656_v43 = vpop.f32.mrf.mxu0 }
  0xdc   : > { %v1685_v44 = vpop.f32.mrf.mxu1 }
  0xdd   : > { %v1686_v55 = vadd.f32 %v1685_v44, %v1656_v43  ;;  %v5264_v44 = vor.u32 %v6418_v30, %v5263_v23  ;;  %v5731_v23 = vld [vmem:[#allocation6 + $0x4d8] sm:$0xf]  ;;  %v5157_v30 = vld [vmem:[#allocation6 + $0x7c] sm:$0xf0] }
  0xde   : > { %1887 = vmatmul.bf16.vlgmr.msra.gmra.mxu0 %v7318_v52  ;;  %v5160_v37 = vor.u32 %v6387_v29, %v5157_v30  ;;  %v5667_v29 = vld [vmem:[#allocation6 + $0x450] sm:$0xf]  ;;  %v6518_v30 = vld [vmem:[#allocation6 + $0x470] sm:$0xf0] }
  0xdf   : > { %1916 = vmatmul.bf16.vlgmr.msra.gmra.mxu1 %v7314_v46  ;;  %1998 = vmatpush.bf16.msrb.mxu0 %v5264_v44  ;;  %v6382_v44 = vld [vmem:[#allocation6 + $0x30] sm:$0xf0] }
  0xe0   : > { %1945 = vmatmul.bf16.vlgmr.msra.gmra.mxu2 %v7316_v51 }
  0xe1   : > { %1974 = vmatmul.bf16.vlgmr.msra.gmra.mxu3 %v7318_v52 }
  0xe3   : > { %v1714_v61 = vpop.f32.mrf.mxu2  ;;  %v1658_v2 = vpop.f32.mrf.mxu0  ;;  %1999 = vmatpush.bf16.msrb.mxu0 %v5228_v60 }
  0xe4   : > { %v1715_v0 = vadd.f32 %v1714_v61, %v1686_v55  ;;  %v7392_v1 = vpop.f32.mrf.mxu3  ;;  %v1687_v4 = vpop.f32.mrf.mxu1  ;;  %v6553_v55 = vld [vmem:[#allocation6 + $0x588] sm:$0xf0]  ;;  %v5232_v61 = vor.u32 %v6405_v58, %v5229_v59  ;;  %v5121_v58 = vld [vmem:[#allocation6 + $0x34] sm:$0xf0] }
  0xe5   : > { %v1688_v18 = vadd.f32 %v1687_v4, %v1658_v2  ;;  %v5804_v57 = vor.u32 %v6553_v55, %v5803_v54  ;;  %v5479_v2 = vld [vmem:[#allocation6 + $0x2e0] sm:$0xf]  ;;  %v6526_v54 = vld [vmem:[#allocation6 + $0x4b0] sm:$0xf0] }
  0xe6   : > { %v7394_v5 = vmul.f32 3.2659864, %v1715_v0  ;;  %v6400_v0 = vld [vmem:[#allocation6 + $0xc0] sm:$0xf0]  ;;  %v5480_v11 = vor.u32 %v6472_v7, %v5479_v2  ;;  %2086 = vmatpush.bf16.msrb.mxu3 %v5232_v61  ;;  %v5120_v61 = vor.u32 %v6382_v44, %v5119_v42 }
  0xe7   : > { %2057 = vmatpush.bf16.msrb.mxu2 %v5804_v57  ;;  %v5192_v16 = vor.u32 %v6400_v0, %v5191_v63  ;;  %v6378_v57 = vld [vmem:[#allocation6 + $0x14] sm:$0xf] }
  0xe8   : > { %2752 = vrot.lane.b32.xlu2 %v7394_v5, %s7151_s21  ;;  %2029 = vmatpush.bf16.msrb.mxu1 %v5480_v11  ;;  %v5124_v63 = vor.u32 %v6378_v57, %v5121_v58 }
  0xe9   : > { %2000 = vmatpush.bf16.msrb.mxu0 %v5192_v16 }
  0xea   : > { %2087 = vmatpush.bf16.msrb.mxu3 %v5196_v17 }
  0xeb   : > { %v1716_v19 = vpop.f32.mrf.mxu2  ;;  %v1661_v28 = vpop.f32.mrf.mxu0  ;;  %2058 = vmatpush.bf16.msrb.mxu2 %v5768_v12 }
  0xec   : > { %v1717_v24 = vadd.f32 %v1716_v19, %v1688_v18  ;;  %v7398_v25 = vpop.f32.mrf.mxu3  ;;  %v1690_v36 = vpop.f32.mrf.mxu1  ;;  %v5155_v18 = vld [vmem:[#allocation6 + $0x58] sm:$0xf]  ;;  %v6391_v19 = vld [vmem:[#allocation6 + $0x78] sm:$0xf0] }
  0xed   : > { %v1691_v50 = vadd.f32 %v1690_v36, %v1661_v28  ;;  %v6535_v28 = vld [vmem:[#allocation6 + $0x4f8] sm:$0xf0]  ;;  %v5156_v36 = vor.u32 %v6391_v19, %v5155_v18 }
  0xee   : > { %v7400_v43 = vmul.f32 3.2659864, %v1717_v24  ;;  %1892 = vmatmul.bf16.gmra.mxu0 %v7334_v33  ;;  %v5444_v24 = vor.u32 %v6463_v21, %v5443_v20  ;;  %v5732_v34 = vor.u32 %v6535_v28, %v5731_v23  ;;  %2088 = vmatpush.bf16.msrb.mxu3 %v5160_v37  ;;  %v5379_v21 = vld [vmem:[#allocation6 + $0x210] sm:$0xf]  ;;  %v6446_v23 = vld [vmem:[#allocation6 + $0x230] sm:$0xf0] }
  0xef   : > { %1921 = vmatmul.bf16.gmra.mxu1 %v7330_v31  ;;  %2001 = vmatpush.bf16.msrb.mxu0 %v5156_v36  ;;  %v5380_v28 = vor.u32 %v6446_v23, %v5379_v21  ;;  %v5949_v36 = vld [vmem:[#allocation6 + $0x6ac] sm:$0xf0]  ;;  %v6428_v21 = vld [vmem:[#allocation6 + $0x1a0] sm:$0xf0] }
  0xf0   : > { %1950 = vmatmul.bf16.gmra.mxu2 %v7332_v32  ;;  %2754 = vrot.lane.b32.xlu0 %v7400_v43, %s7151_s21 }
  0xf1   : > { %1979 = vmatmul.bf16.gmra.mxu3 %v7334_v33  ;;  %2030 = vmatpush.bf16.msrb.mxu1 %v5444_v24 }
  0xf2   : > { %2059 = vmatpush.bf16.msrb.mxu2 %v5732_v34  ;;  %2089 = vmatpush.bf16.msrb.mxu3 %v5124_v63  ;;  %v6585_v34 = vld [vmem:[#allocation6 + $0x68c] sm:$0xf]  ;;  %v5913_v63 = vld [vmem:[#allocation6 + $0x664] sm:$0xf0] }
  0xf3   : > { %v1719_v62 = vpop.f32.mrf.mxu2  ;;  %v1663_v6 = vpop.f32.mrf.mxu0  ;;  %2002 = vmatpush.bf16.msrb.mxu0 %v5120_v61 }
  0xf4   : > { %v1720_v3 = vadd.f32 %v1719_v62, %v1691_v50  ;;  %v7408_v4 = vpop.f32.mrf.mxu3  ;;  %v1692_v10 = vpop.f32.mrf.mxu1  ;;  %v6454_v50 = vld [vmem:[#allocation6 + $0x270] sm:$0xf0]  ;;  %v5696_v62 = vor.u32 %v6526_v54, %v5695_v53  ;;  %v5661_v53 = vld [vmem:[#allocation6 + $0x46c] sm:$0xf0]  ;;  %v5343_v54 = vld [vmem:[#allocation6 + $0x1c8] sm:$0xf] }
  0xf5   : > { %v1693_v35 = vadd.f32 %v1692_v10, %v1663_v6  ;;  %v5408_v56 = vor.u32 %v6454_v50, %v5407_v45  ;;  %v6513_v50 = vld [vmem:[#allocation6 + $0x44c] sm:$0xf] }
  0xf6   : > { %v7410_v15 = vmul.f32 3.2659864, %v1720_v3  ;;  %2060 = vmatpush.bf16.msrb.mxu2 %v5696_v62  ;;  %v6576_v62 = vld [vmem:[#allocation6 + $0x644] sm:$0xf] }
  0xf7   : > { %2031 = vmatpush.bf16.msrb.mxu1 %v5408_v56  ;;  %v6437_v56 = vld [vmem:[#allocation6 + $0x1e8] sm:$0xf0] }
  0xf8   : > { %2756 = vrot.lane.b32.xlu1 %v7410_v15, %s7151_s21  ;;  %v5344_v58 = vor.u32 %v6437_v56, %v5343_v54  ;;  %v5553_v56 = vld [vmem:[#allocation6 + $0x394] sm:$0xf0] }
  0xfa   : > { %2169 = vmatpush.bf16.msra.mxu2 %v5380_v28  ;;  %v5595_v28 = vld [vmem:[#allocation6 + $0x3c0] sm:$0xf] }
  0xfb   : > { %v1721_v38 = vpop.f32.mrf.mxu2  ;;  %v1666_v49 = vpop.f32.mrf.mxu0 }
  0xfc   : > { %v1722_v47 = vadd.f32 %v1721_v38, %v1693_v35  ;;  %v7414_v48 = vpop.f32.mrf.mxu3  ;;  %v1695_v55 = vpop.f32.mrf.mxu1  ;;  %v5668_v35 = vor.u32 %v6518_v30, %v5667_v29  ;;  %v5952_v38 = vor.u32 %v6585_v34, %v5949_v36  ;;  %v6500_v29 = vld [vmem:[#allocation6 + $0x3e0] sm:$0xf0]  ;;  %v6495_v30 = vld [vmem:[#allocation6 + $0x3bc] sm:$0xf] }
  0xfd   : > { %v1696_v60 = vadd.f32 %v1695_v55, %v1666_v49  ;;  %v5664_v55 = vor.u32 %v6513_v50, %v5661_v53  ;;  %v5596_v34 = vor.u32 %v6500_v29, %v5595_v28  ;;  %v6567_v36 = vld [vmem:[#allocation6 + $0x5fc] sm:$0xf]  ;;  %v6486_v50 = vld [vmem:[#allocation6 + $0x374] sm:$0xf]  ;;  %v6549_v29 = vld [vmem:[#allocation6 + $0x56c] sm:$0xf] }
  0xfe   : > { %v7416_v59 = vmul.f32 3.2659864, %v1722_v47  ;;  %1897 = vmatmul.bf16.gmra.mxu0 %v7350_v27  ;;  %2198 = vmatpush.bf16.msra.mxu3 %v5668_v35  ;;  %v5589_v35 = vld [vmem:[#allocation6 + $0x3dc] sm:$0xf0] }
  0xff   : > { %1926 = vmatmul.bf16.gmra.mxu1 %v7346_v22  ;;  %2111 = vmatpush.bf16.msra.mxu0 %v5664_v55 }
 0x100   : > { %1955 = vmatmul.bf16.gmra.mxu2 %v7348_v26  ;;  %2758 = vrot.lane.b32.xlu2 %v7416_v59, %s7151_s21 }
 0x101   : > { %1984 = vmatmul.bf16.gmra.mxu3 %v7350_v27  ;;  %2140 = vmatpush.bf16.msra.mxu1 %v5952_v38  ;;  %v5592_v38 = vor.u32 %v6495_v30, %v5589_v35  ;;  %v5805_v30 = vld [vmem:[#allocation6 + $0x58c] sm:$0xf0] }
 0x102   : > { %2170 = vmatpush.bf16.msra.mxu2 %v5344_v58  ;;  %v5559_v58 = vld [vmem:[#allocation6 + $0x378] sm:$0xf] }
 0x103   : > { %v1724_v0 = vpop.f32.mrf.mxu2  ;;  %v1668_v6 = vpop.f32.mrf.mxu0 }
 0x104   : > { %v7424_v2 = vadd.f32 %v1724_v0, %v1696_v60  ;;  %v7426_v3 = vpop.f32.mrf.mxu3  ;;  %v1697_v7 = vpop.f32.mrf.mxu1  ;;  %v6509_v60 = vld [vmem:[#allocation6 + $0x428] sm:$0xf0] }
 0x105   : > { %v1698_v8 = vadd.f32 %v1697_v7, %v1668_v6  ;;  %v5916_v6 = vor.u32 %v6576_v62, %v5913_v63  ;;  %v6504_v7 = vld [vmem:[#allocation6 + $0x404] sm:$0xf]  ;;  %v5556_v63 = vor.u32 %v6486_v50, %v5553_v56  ;;  %v5487_v50 = vld [vmem:[#allocation6 + $0x2e8] sm:$0xf] }
 0x107   : > { %2141 = vmatpush.bf16.msra.mxu1 %v5916_v6  ;;  %v6558_v6 = vld [vmem:[#allocation6 + $0x5b4] sm:$0xf] }
 0x10b   : > { %v1726_v9 = vpop.f32.mrf.mxu2  ;;  %v1671_v12 = vpop.f32.mrf.mxu0 }
 0x10c   : > { %v7428_v10 = vadd.f32 %v1726_v9, %v1698_v8  ;;  %v7430_v11 = vpop.f32.mrf.mxu3  ;;  %v1700_v13 = vpop.f32.mrf.mxu1  ;;  %v5625_v8 = vld [vmem:[#allocation6 + $0x424] sm:$0xf0] }
 0x10d   : > { %v1701_v14 = vadd.f32 %v1700_v13, %v1671_v12  ;;  %v5628_v13 = vor.u32 %v6504_v7, %v5625_v8  ;;  %v5841_v7 = vld [vmem:[#allocation6 + $0x5d4] sm:$0xf0] }
 0x10e   : > { %1902 = vmatmul.bf16.gmra.mxu0 %v7366_v41  ;;  %v5844_v8 = vor.u32 %v6558_v6, %v5841_v7  ;;  %v6459_v6 = vld [vmem:[#allocation6 + $0x29c] sm:$0xf]  ;;  %v5445_v7 = vld [vmem:[#allocation6 + $0x2bc] sm:$0xf0] }
 0x10f   : > { %1931 = vmatmul.bf16.gmra.mxu1 %v7362_v39  ;;  %2112 = vmatpush.bf16.msra.mxu0 %v5628_v13  ;;  %v5517_v13 = vld [vmem:[#allocation6 + $0x34c] sm:$0xf0] }
 0x110   : > { %1960 = vmatmul.bf16.gmra.mxu2 %v7364_v40 }
 0x111   : > { %1989 = vmatmul.bf16.gmra.mxu3 %v7366_v41 }
 0x113   : > { %v1729_v16 = vpop.f32.mrf.mxu2  ;;  %v1673_v19 = vpop.f32.mrf.mxu0  ;;  %2113 = vmatpush.bf16.msra.mxu0 %v5592_v38  ;;  %v5199_v38 = vld [vmem:[#allocation6 + $0xa8] sm:$0xf] }
 0x114   : > { %v7436_v17 = vadd.f32 %v1729_v16, %v1701_v14  ;;  %v7438_v18 = vpop.f32.mrf.mxu3  ;;  %v1702_v20 = vpop.f32.mrf.mxu1 }
 0x115   : > { %v1703_v24 = vadd.f32 %v1702_v20, %v1673_v19  ;;  %v5307_v20 = vld [vmem:[#allocation6 + $0x180] sm:$0xf] }
 0x116   : > { %v5308_v23 = vor.u32 %v6428_v21, %v5307_v20  ;;  %v6482_v20 = vld [vmem:[#allocation6 + $0x350] sm:$0xf0] }
 0x117   : > { %2114 = vmatpush.bf16.msra.mxu0 %v5556_v63 }
 0x118   : > { %2171 = vmatpush.bf16.msra.mxu2 %v5308_v23 }
 0x11b   : > { %v1731_v37 = vpop.f32.mrf.mxu2  ;;  %v1772_v45 = vpop.f32.mrf.mxu0 }
 0x11c   : > { %v7440_v42 = vadd.f32 %v1731_v37, %v1703_v24  ;;  %v7442_v44 = vpop.f32.mrf.mxu3  ;;  %v1773_v47 = vadd.f32 %v1772_v45, %v7392_v1  ;;  %v1801_v49 = vpop.f32.mrf.mxu1  ;;  %v5631_v1 = vld [vmem:[#allocation6 + $0x408] sm:$0xf]  ;;  %v5877_v37 = vld [vmem:[#allocation6 + $0x61c] sm:$0xf0] }
 0x11d   : > { %v5632_v61 = vor.u32 %v6509_v60, %v5631_v1  ;;  %v5880_v45 = vor.u32 %v6567_v36, %v5877_v37  ;;  %v6491_v1 = vld [vmem:[#allocation6 + $0x398] sm:$0xf0]  ;;  %v6468_v36 = vld [vmem:[#allocation6 + $0x2e4] sm:$0xf]  ;;  %v5481_v37 = vld [vmem:[#allocation6 + $0x304] sm:$0xf0] }
 0x11e   : > { %v7445_v57 = vadd.f32 %v1801_v49, %v1773_v47  ;;  %2003 = vmatmul.bf16.vlgmr.msrb.gmra.mxu0 %v7314_v46  ;;  %v5271_v47 = vld [vmem:[#allocation6 + $0x138] sm:$0xf]  ;;  %v6419_v49 = vld [vmem:[#allocation6 + $0x158] sm:$0xf0] }
 0x11f   : > { %2032 = vmatmul.bf16.vlgmr.msrb.gmra.mxu1 %v7316_v51  ;;  %2199 = vmatpush.bf16.msra.mxu3 %v5632_v61  ;;  %v5272_v55 = vor.u32 %v6419_v49, %v5271_v47  ;;  %v5484_v47 = vor.u32 %v6468_v36, %v5481_v37  ;;  %v6401_v49 = vld [vmem:[#allocation6 + $0xc8] sm:$0xf0]  ;;  %v6383_v37 = vld [vmem:[#allocation6 + $0x38] sm:$0xf0] }
 0x120   : > { %2061 = vmatmul.bf16.vlgmr.msrb.gmra.mxu2 %v7318_v52  ;;  %2142 = vmatpush.bf16.msra.mxu1 %v5880_v45 }
 0x121   : > { %2090 = vmatmul.bf16.vlgmr.msrb.gmra.mxu3 %v7314_v46  ;;  %2172 = vmatpush.bf16.msra.mxu2 %v5272_v55 }
 0x123   : > { %v1830_v0 = vpop.f32.mrf.mxu2  ;;  %v1774_v12 = vpop.f32.mrf.mxu0  ;;  %2200 = vmatpush.bf16.msra.mxu3 %v5596_v34  ;;  %v5808_v34 = vor.u32 %v6549_v29, %v5805_v30  ;;  %v6450_v29 = vld [vmem:[#allocation6 + $0x254] sm:$0xf]  ;;  %v5409_v30 = vld [vmem:[#allocation6 + $0x274] sm:$0xf0] }
 0x124   : > { %v1859_v9 = vpop.f32.mrf.mxu3  ;;  %v1775_v16 = vadd.f32 %v1774_v12, %v7398_v25  ;;  %v1803_v19 = vpop.f32.mrf.mxu1  ;;  %v6477_v12 = vld [vmem:[#allocation6 + $0x32c] sm:$0xf]  ;;  %2143 = vmatpush.bf16.msra.mxu1 %v5844_v8  ;;  %v5163_v8 = vld [vmem:[#allocation6 + $0x60] sm:$0xf] }
 0x125   : > { %v7451_v14 = vadd.f32 %v1859_v9, %v1830_v0  ;;  %v5560_v0 = vor.u32 %v6491_v1, %v5559_v58  ;;  %v5520_v21 = vor.u32 %v6477_v12, %v5517_v13  ;;  %v5200_v58 = vor.u32 %v6401_v49, %v5199_v38  ;;  %v6392_v12 = vld [vmem:[#allocation6 + $0x80] sm:$0xf0]  ;;  %v5451_v13 = vld [vmem:[#allocation6 + $0x2a0] sm:$0xf]  ;;  %v5415_v38 = vld [vmem:[#allocation6 + $0x258] sm:$0xf] }
 0x126   : > { %v7454_v24 = vadd.f32 %v1803_v19, %v1775_v16  ;;  %v5235_v16 = vld [vmem:[#allocation6 + $0xf0] sm:$0xf] }
 0x127   : > { %2201 = vmatpush.bf16.msra.mxu3 %v5560_v0  ;;  %v5523_v19 = vld [vmem:[#allocation6 + $0x330] sm:$0xf]  ;;  %2115 = vmatpush.bf16.msra.mxu0 %v5520_v21  ;;  %v5733_v21 = vld [vmem:[#allocation6 + $0x4fc] sm:$0xf0] }
 0x128   : > { %v5524_v28 = vor.u32 %v6482_v20, %v5523_v19  ;;  %2144 = vmatpush.bf16.msra.mxu1 %v5808_v34  ;;  %v6531_v20 = vld [vmem:[#allocation6 + $0x4dc] sm:$0xf]  ;;  %v5127_v34 = vld [vmem:[#allocation6 + $0x18] sm:$0xf] }
 0x12b   : > { %v1832_v25 = vpop.f32.mrf.mxu2  ;;  %v1777_v54 = vpop.f32.mrf.mxu0  ;;  %2202 = vmatpush.bf16.msra.mxu3 %v5524_v28  ;;  %2116 = vmatpush.bf16.msra.mxu0 %v5484_v47 }
 0x12c   : > { %v1861_v53 = vpop.f32.mrf.mxu3  ;;  %v1778_v61 = vadd.f32 %v1777_v54, %v7408_v4  ;;  %v1806_v62 = vpop.f32.mrf.mxu1  ;;  %v6410_v4 = vld [vmem:[#allocation6 + $0x110] sm:$0xf0] }
 0x12d   : > { %v7456_v60 = vadd.f32 %v1861_v53, %v1832_v25  ;;  %v5236_v23 = vor.u32 %v6410_v4, %v5235_v16  ;;  %v6473_v53 = vld [vmem:[#allocation6 + $0x308] sm:$0xf0]  ;;  %v6464_v16 = vld [vmem:[#allocation6 + $0x2c0] sm:$0xf0]  ;;  %v5164_v4 = vor.u32 %v6392_v12, %v5163_v8 }
 0x12e   : > { %v7459_v9 = vadd.f32 %v1806_v62, %v1778_v61  ;;  %2008 = vmatmul.bf16.gmra.mxu0 %v7330_v31  ;;  %v5488_v1 = vor.u32 %v6473_v53, %v5487_v50  ;;  %v6540_v61 = vld [vmem:[#allocation6 + $0x524] sm:$0xf]  ;;  %v5769_v62 = vld [vmem:[#allocation6 + $0x544] sm:$0xf0]  ;;  %v5452_v19 = vor.u32 %v6464_v16, %v5451_v13  ;;  %v5412_v50 = vor.u32 %v6450_v29, %v5409_v30 }
 0x12f   : > { %2037 = vmatmul.bf16.gmra.mxu1 %v7332_v32  ;;  %2173 = vmatpush.bf16.msra.mxu2 %v5236_v23  ;;  %v5772_v63 = vor.u32 %v6540_v61, %v5769_v62  ;;  %v5736_v23 = vor.u32 %v6531_v20, %v5733_v21  ;;  %v5128_v53 = vor.u32 %v6383_v37, %v5127_v34 }
 0x130   : > { %2066 = vmatmul.bf16.gmra.mxu2 %v7334_v33  ;;  %2203 = vmatpush.bf16.msra.mxu3 %v5488_v1 }
 0x131   : > { %2095 = vmatmul.bf16.gmra.mxu3 %v7330_v31  ;;  %2145 = vmatpush.bf16.msra.mxu1 %v5772_v63 }
 0x133   : > { %v1835_v35 = vpop.f32.mrf.mxu2  ;;  %v1779_v25 = vpop.f32.mrf.mxu0  ;;  %2174 = vmatpush.bf16.msra.mxu2 %v5200_v58 }
 0x134   : > { %v1864_v45 = vpop.f32.mrf.mxu3  ;;  %v1780_v55 = vadd.f32 %v1779_v25, %v7414_v48  ;;  %v1808_v56 = vpop.f32.mrf.mxu1  ;;  %v5448_v48 = vor.u32 %v6459_v6, %v5445_v7  ;;  %2204 = vmatpush.bf16.msra.mxu3 %v5452_v19 }
 0x135   : > { %v7465_v54 = vadd.f32 %v1864_v45, %v1835_v35  ;;  %v6455_v45 = vld [vmem:[#allocation6 + $0x278] sm:$0xf0]  ;;  %2146 = vmatpush.bf16.msra.mxu1 %v5736_v23 }
 0x136   : > { %v7468_v0 = vadd.f32 %v1808_v56, %v1780_v55  ;;  %2117 = vmatpush.bf16.msra.mxu0 %v5448_v48  ;;  %v6522_v55 = vld [vmem:[#allocation6 + $0x494] sm:$0xf]  ;;  %v5697_v56 = vld [vmem:[#allocation6 + $0x4b4] sm:$0xf0]  ;;  %v5416_v58 = vor.u32 %v6455_v45, %v5415_v38 }
 0x137   : > { %2175 = vmatpush.bf16.msra.mxu2 %v5164_v4  ;;  %v5700_v1 = vor.u32 %v6522_v55, %v5697_v56  ;;  %v6586_v38 = vld [vmem:[#allocation6 + $0x694] sm:$0xf]  ;;  %v5957_v45 = vld [vmem:[#allocation6 + $0x6b4] sm:$0xf0] }
 0x138   : > { %2205 = vmatpush.bf16.msra.mxu3 %v5416_v58 }
 0x139   : > { %2147 = vmatpush.bf16.msra.mxu1 %v5700_v1 }
 0x13a   : > { %2118 = vmatpush.bf16.msra.mxu0 %v5412_v50  ;;  %v5381_v50 = vld [vmem:[#allocation6 + $0x234] sm:$0xf0] }
 0x13b   : > { %v1837_v28 = vpop.f32.mrf.mxu2  ;;  %v1782_v36 = vpop.f32.mrf.mxu0  ;;  %2176 = vmatpush.bf16.msra.mxu2 %v5128_v53 }
 0x13c   : > { %v1866_v35 = vpop.f32.mrf.mxu3  ;;  %v1783_v47 = vadd.f32 %v1782_v36, %v7426_v3  ;;  %v1811_v49 = vpop.f32.mrf.mxu1 }
 0x13d   : > { %v7470_v25 = vadd.f32 %v1866_v35, %v1837_v28  ;;  %v5669_v35 = vld [vmem:[#allocation6 + $0x474] sm:$0xf0] }
 0x13e   : > { %v7473_v61 = vadd.f32 %v1811_v49, %v1783_v47  ;;  %2013 = vmatmul.bf16.gmra.mxu0 %v7346_v22  ;;  %v5960_v47 = vor.u32 %v6586_v38, %v5957_v45  ;;  %v6442_v49 = vld [vmem:[#allocation6 + $0x214] sm:$0xf] }
 0x13f   : > { %2042 = vmatmul.bf16.gmra.mxu1 %v7348_v26  ;;  %v5384_v53 = vor.u32 %v6442_v49, %v5381_v50  ;;  %v6496_v50 = vld [vmem:[#allocation6 + $0x3c4] sm:$0xf] }
 0x140   : > { %2071 = vmatmul.bf16.gmra.mxu2 %v7350_v27  ;;  %2314 = vmatpush.bf16.msrb.mxu3 %v5960_v47 }
 0x141   : > { %2100 = vmatmul.bf16.gmra.mxu3 %v7346_v22  ;;  %2256 = vmatpush.bf16.msrb.mxu1 %v5384_v53  ;;  %v5597_v53 = vld [vmem:[#allocation6 + $0x3e4] sm:$0xf0] }
 0x143   : > { %v1840_v3 = vpop.f32.mrf.mxu2  ;;  %v1784_v63 = vpop.f32.mrf.mxu0 }
 0x144   : > { %v1869_v62 = vpop.f32.mrf.mxu3  ;;  %v1785_v7 = vadd.f32 %v1784_v63, %v7430_v11  ;;  %v1813_v8 = vpop.f32.mrf.mxu1  ;;  %v6590_v63 = vld [vmem:[#allocation6 + $0x6b0] sm:$0xf0] }
 0x145   : > { %v7479_v6 = vadd.f32 %v1869_v62, %v1840_v3  ;;  %v5955_v62 = vld [vmem:[#allocation6 + $0x690] sm:$0xf] }
 0x146   : > { %v7482_v12 = vadd.f32 %v1813_v8, %v1785_v7  ;;  %v6505_v7 = vld [vmem:[#allocation6 + $0x40c] sm:$0xf]  ;;  %v5956_v8 = vor.u32 %v6590_v63, %v5955_v62  ;;  %v5883_v62 = vld [vmem:[#allocation6 + $0x600] sm:$0xf]  ;;  %v6572_v63 = vld [vmem:[#allocation6 + $0x620] sm:$0xf0] }
 0x148   : > { %2227 = vmatpush.bf16.msrb.mxu0 %v5956_v8  ;;  %v5884_v8 = vor.u32 %v6572_v63, %v5883_v62  ;;  %v5525_v62 = vld [vmem:[#allocation6 + $0x354] sm:$0xf0]  ;;  %v6550_v63 = vld [vmem:[#allocation6 + $0x574] sm:$0xf] }
 0x14b   : > { %v1842_v13 = vpop.f32.mrf.mxu2  ;;  %v1787_v48 = vpop.f32.mrf.mxu0 }
 0x14c   : > { %v1871_v16 = vpop.f32.mrf.mxu3  ;;  %v1788_v19 = vadd.f32 %v1787_v48, %v7438_v18  ;;  %v1816_v20 = vpop.f32.mrf.mxu1  ;;  %v6514_v18 = vld [vmem:[#allocation6 + $0x454] sm:$0xf] }
 0x14d   : > { %v7484_v4 = vadd.f32 %v1871_v16, %v1842_v13  ;;  %v5672_v37 = vor.u32 %v6514_v18, %v5669_v35  ;;  %v5633_v13 = vld [vmem:[#allocation6 + $0x42c] sm:$0xf0]  ;;  %v6577_v16 = vld [vmem:[#allocation6 + $0x64c] sm:$0xf] }
 0x14e   : > { %v7487_v21 = vadd.f32 %v1816_v20, %v1788_v19  ;;  %2018 = vmatmul.bf16.gmra.mxu0 %v7362_v39  ;;  %v5636_v48 = vor.u32 %v6505_v7, %v5633_v13  ;;  %v5921_v19 = vld [vmem:[#allocation6 + $0x66c] sm:$0xf0]  ;;  %v6433_v20 = vld [vmem:[#allocation6 + $0x1cc] sm:$0xf]  ;;  %v6424_v7 = vld [vmem:[#allocation6 + $0x184] sm:$0xf] }
 0x14f   : > { %2047 = vmatmul.bf16.gmra.mxu1 %v7364_v40  ;;  %2285 = vmatpush.bf16.msrb.mxu2 %v5672_v37 }
 0x150   : > { %2076 = vmatmul.bf16.gmra.mxu2 %v7366_v41 }
 0x151   : > { %2105 = vmatmul.bf16.gmra.mxu3 %v7362_v39 }
 0x153   : > { %v1845_v11 = vpop.f32.mrf.mxu2  ;;  %v1789_v28 = vpop.f32.mrf.mxu0  ;;  %2286 = vmatpush.bf16.msrb.mxu2 %v5636_v48  ;;  %v6487_v48 = vld [vmem:[#allocation6 + $0x37c] sm:$0xf] }
 0x154   : > { %v1874_v23 = vpop.f32.mrf.mxu3  ;;  %v1790_v30 = vadd.f32 %v1789_v28, %v7442_v44  ;;  %v1818_v34 = vpop.f32.mrf.mxu1 }
 0x155   : > { %v7493_v29 = vadd.f32 %v1874_v23, %v1845_v11  ;;  %v5345_v11 = vld [vmem:[#allocation6 + $0x1ec] sm:$0xf0] }
 0x156   : > { %v7496_v36 = vadd.f32 %v1818_v34, %v1790_v30  ;;  %v5348_v23 = vor.u32 %v6433_v20, %v5345_v11  ;;  %v5919_v30 = vld [vmem:[#allocation6 + $0x648] sm:$0xf]  ;;  %v6581_v34 = vld [vmem:[#allocation6 + $0x668] sm:$0xf0] }
 0x157   : > { %v5920_v38 = vor.u32 %v6581_v34, %v5919_v30  ;;  %v6563_v30 = vld [vmem:[#allocation6 + $0x5d8] sm:$0xf0] }
 0x158   : > { %2257 = vmatpush.bf16.msrb.mxu1 %v5348_v23  ;;  %v6559_v34 = vld [vmem:[#allocation6 + $0x5bc] sm:$0xf] }
 0x159   : > { %2228 = vmatpush.bf16.msrb.mxu0 %v5920_v38 }
 0x15b   : > { %v1847_v55 = vpop.f32.mrf.mxu2  ;;  %v1888_v58 = vpop.f32.mrf.mxu0 }
 0x15c   : > { %v1876_v56 = vpop.f32.mrf.mxu3  ;;  %v7501_v44 = vadd.f32 %v1888_v58, %v7451_v14  ;;  %v1917_v3 = vpop.f32.mrf.mxu1  ;;  %v5924_v14 = vor.u32 %v6577_v16, %v5921_v19  ;;  %v5885_v58 = vld [vmem:[#allocation6 + $0x624] sm:$0xf0]  ;;  %v5561_v19 = vld [vmem:[#allocation6 + $0x39c] sm:$0xf0] }
 0x15d   : > { %v7498_v1 = vadd.f32 %v1876_v56, %v1847_v55  ;;  %v5600_v55 = vor.u32 %v6496_v50, %v5597_v53  ;;  %v6568_v56 = vld [vmem:[#allocation6 + $0x604] sm:$0xf]  ;;  %2229 = vmatpush.bf16.msrb.mxu0 %v5884_v8  ;;  %v6415_v50 = vld [vmem:[#allocation6 + $0x13c] sm:$0xf]  ;;  %v5273_v53 = vld [vmem:[#allocation6 + $0x15c] sm:$0xf0] }
 0x15e   : > { %2119 = vmatmul.bf16.vlgmr.msra.gmra.mxu0 %v7316_v51  ;;  %2315 = vmatpush.bf16.msrb.mxu3 %v5924_v14  ;;  %v5847_v14 = vld [vmem:[#allocation6 + $0x5b8] sm:$0xf] }
 0x15f   : > { %2148 = vmatmul.bf16.vlgmr.msra.gmra.mxu1 %v7318_v52  ;;  %2287 = vmatpush.bf16.msrb.mxu2 %v5600_v55  ;;  %v5813_v8 = vld [vmem:[#allocation6 + $0x594] sm:$0xf0] }
 0x160   : > { %2177 = vmatmul.bf16.vlgmr.msra.gmra.mxu2 %v7314_v46 }
 0x161   : > { %2206 = vmatmul.bf16.vlgmr.msra.gmra.mxu3 %v7316_v51 }
 0x163   : > { %v1946_v28 = vpop.f32.mrf.mxu2  ;;  %v1890_v37 = vpop.f32.mrf.mxu0 }
 0x164   : > { %v1947_v18 = vadd.f32 %v1946_v28, %v1917_v3  ;;  %v1975_v35 = vpop.f32.mrf.mxu3  ;;  %v7508_v45 = vadd.f32 %v1890_v37, %v7456_v60  ;;  %v1919_v47 = vpop.f32.mrf.mxu1  ;;  %v5888_v3 = vor.u32 %v6568_v56, %v5885_v58  ;;  %v5309_v60 = vld [vmem:[#allocation6 + $0x1a4] sm:$0xf0]  ;;  %v5564_v28 = vor.u32 %v6487_v48, %v5561_v19 }
 0x165   : > { %v5312_v13 = vor.u32 %v6424_v7, %v5309_v60  ;;  %v5848_v56 = vor.u32 %v6563_v30, %v5847_v14  ;;  %v5276_v58 = vor.u32 %v6415_v50, %v5273_v53  ;;  %v6406_v60 = vld [vmem:[#allocation6 + $0xf4] sm:$0xf]  ;;  %v5816_v48 = vor.u32 %v6550_v63, %v5813_v8  ;;  %v5777_v50 = vld [vmem:[#allocation6 + $0x54c] sm:$0xf0]  ;;  %v6536_v8 = vld [vmem:[#allocation6 + $0x500] sm:$0xf0] }
 0x166   : > { %v7510_v49 = vadd.f32 %v1975_v35, %v1947_v18  ;;  %2316 = vmatpush.bf16.msrb.mxu3 %v5888_v3  ;;  %v5849_v18 = vld [vmem:[#allocation6 + $0x5dc] sm:$0xf0]  ;;  %2288 = vmatpush.bf16.msrb.mxu2 %v5564_v28  ;;  %v6554_v3 = vld [vmem:[#allocation6 + $0x590] sm:$0xf0] }
 0x167   : > { %2258 = vmatpush.bf16.msrb.mxu1 %v5312_v13  ;;  %v5852_v38 = vor.u32 %v6559_v34, %v5849_v18  ;;  %v5237_v13 = vld [vmem:[#allocation6 + $0x114] sm:$0xf0]  ;;  %2230 = vmatpush.bf16.msrb.mxu0 %v5848_v56  ;;  %v5489_v18 = vld [vmem:[#allocation6 + $0x30c] sm:$0xf0] }
 0x168   : > { %2768 = vrot.lane.b32.xlu1 %v7510_v49, %s7151_s21  ;;  %v5240_v19 = vor.u32 %v6406_v60, %v5237_v13  ;;  %v5453_v60 = vld [vmem:[#allocation6 + $0x2c4] sm:$0xf0]  ;;  %v6532_v13 = vld [vmem:[#allocation6 + $0x4e4] sm:$0xf] }
 0x16a   : > { %2317 = vmatpush.bf16.msrb.mxu3 %v5852_v38  ;;  %v6541_v38 = vld [vmem:[#allocation6 + $0x52c] sm:$0xf] }
 0x16b   : > { %v1948_v16 = vpop.f32.mrf.mxu2  ;;  %v1893_v23 = vpop.f32.mrf.mxu0  ;;  %2259 = vmatpush.bf16.msrb.mxu1 %v5276_v58  ;;  %v6397_v58 = vld [vmem:[#allocation6 + $0xac] sm:$0xf] }
 0x16c   : > { %v1949_v20 = vadd.f32 %v1948_v16, %v1919_v47  ;;  %v1977_v11 = vpop.f32.mrf.mxu3  ;;  %v7515_v35 = vadd.f32 %v1893_v23, %v7465_v54  ;;  %v1922_v37 = vpop.f32.mrf.mxu1  ;;  %v5811_v47 = vld [vmem:[#allocation6 + $0x570] sm:$0xf]  ;;  %v6478_v54 = vld [vmem:[#allocation6 + $0x334] sm:$0xf]  ;;  %v6469_v23 = vld [vmem:[#allocation6 + $0x2ec] sm:$0xf] }
 0x16d   : > { %v5528_v7 = vor.u32 %v6478_v54, %v5525_v62  ;;  %v5812_v16 = vor.u32 %v6554_v3, %v5811_v47  ;;  %v5492_v47 = vor.u32 %v6469_v23, %v5489_v18  ;;  %v5780_v3 = vor.u32 %v6541_v38, %v5777_v50  ;;  %v5201_v54 = vld [vmem:[#allocation6 + $0xcc] sm:$0xf0]  ;;  %v6388_v23 = vld [vmem:[#allocation6 + $0x64] sm:$0xf]  ;;  %v6451_v18 = vld [vmem:[#allocation6 + $0x25c] sm:$0xf] }
 0x16e   : > { %v7517_v55 = vadd.f32 %v1977_v11, %v1949_v20  ;;  %2124 = vmatmul.bf16.gmra.mxu0 %v7332_v32  ;;  %v5775_v20 = vld [vmem:[#allocation6 + $0x528] sm:$0xf]  ;;  %v6545_v11 = vld [vmem:[#allocation6 + $0x548] sm:$0xf0]  ;;  %2318 = vmatpush.bf16.msrb.mxu3 %v5816_v48 }
 0x16f   : > { %2153 = vmatmul.bf16.gmra.mxu1 %v7334_v33  ;;  %2289 = vmatpush.bf16.msrb.mxu2 %v5528_v7  ;;  %v5776_v63 = vor.u32 %v6545_v11, %v5775_v20  ;;  %v5739_v7 = vld [vmem:[#allocation6 + $0x4e0] sm:$0xf]  ;;  %v5703_v11 = vld [vmem:[#allocation6 + $0x498] sm:$0xf] }
 0x170   : > { %2182 = vmatmul.bf16.gmra.mxu2 %v7330_v31  ;;  %2770 = vrot.lane.b32.xlu0 %v7517_v55, %s7151_s21 }
 0x171   : > { %2211 = vmatmul.bf16.gmra.mxu3 %v7332_v32  ;;  %2231 = vmatpush.bf16.msrb.mxu0 %v5812_v16 }
 0x172   : > { %2260 = vmatpush.bf16.msrb.mxu1 %v5240_v19  ;;  %2319 = vmatpush.bf16.msrb.mxu3 %v5780_v3  ;;  %v5417_v3 = vld [vmem:[#allocation6 + $0x27c] sm:$0xf0] }
 0x173   : > { %v1951_v14 = vpop.f32.mrf.mxu2  ;;  %v1895_v34 = vpop.f32.mrf.mxu0  ;;  %2290 = vmatpush.bf16.msrb.mxu2 %v5492_v47 }
 0x174   : > { %v1952_v28 = vadd.f32 %v1951_v14, %v1922_v37  ;;  %v1980_v30 = vpop.f32.mrf.mxu3  ;;  %v7526_v53 = vadd.f32 %v1895_v34, %v7470_v25  ;;  %v1924_v56 = vpop.f32.mrf.mxu1  ;;  %v5204_v37 = vor.u32 %v6397_v58, %v5201_v54  ;;  %v6460_v25 = vld [vmem:[#allocation6 + $0x2a4] sm:$0xf]  ;;  %v5741_v14 = vld [vmem:[#allocation6 + $0x504] sm:$0xf0]  ;;  %v6523_v58 = vld [vmem:[#allocation6 + $0x49c] sm:$0xf] }
 0x175   : > { %v5456_v48 = vor.u32 %v6460_v25, %v5453_v60  ;;  %v5165_v34 = vld [vmem:[#allocation6 + $0x84] sm:$0xf0]  ;;  %2232 = vmatpush.bf16.msrb.mxu0 %v5776_v63  ;;  %v5744_v16 = vor.u32 %v6532_v13, %v5741_v14  ;;  %v5705_v54 = vld [vmem:[#allocation6 + $0x4bc] sm:$0xf0] }
 0x176   : > { %v7528_v62 = vadd.f32 %v1980_v30, %v1952_v28  ;;  %v5740_v28 = vor.u32 %v6536_v8, %v5739_v7  ;;  %2261 = vmatpush.bf16.msrb.mxu1 %v5204_v37  ;;  %v5168_v19 = vor.u32 %v6388_v23, %v5165_v34  ;;  %v6527_v30 = vld [vmem:[#allocation6 + $0x4b8] sm:$0xf0]  ;;  %v5420_v7 = vor.u32 %v6451_v18, %v5417_v3  ;;  %v5129_v37 = vld [vmem:[#allocation6 + $0x3c] sm:$0xf0] }
 0x177   : > { %2291 = vmatpush.bf16.msrb.mxu2 %v5456_v48  ;;  %2320 = vmatpush.bf16.msrb.mxu3 %v5744_v16  ;;  %v6379_v8 = vld [vmem:[#allocation6 + $0x1c] sm:$0xf]  ;;  %v5704_v13 = vor.u32 %v6527_v30, %v5703_v11  ;;  %v5708_v48 = vor.u32 %v6523_v58, %v5705_v54 }
 0x178   : > { %2772 = vrot.lane.b32.xlu2 %v7528_v62, %s7151_s21 }
 0x179   : > { %2233 = vmatpush.bf16.msrb.mxu0 %v5740_v28 }
 0x17a   : > { %2262 = vmatpush.bf16.msrb.mxu1 %v5168_v19  ;;  %v7547_v19 = vmul.f32 3.2659864, %v7459_v9 }
 0x17b   : > { %v1953_v20 = vpop.f32.mrf.mxu2  ;;  %v1898_v47 = vpop.f32.mrf.mxu0  ;;  %2292 = vmatpush.bf16.msrb.mxu2 %v5420_v7  ;;  %2321 = vmatpush.bf16.msrb.mxu3 %v5708_v48  ;;  %v7564_v7 = vmul.f32 3.2659864, %v7454_v24 }
 0x17c   : > { %v1954_v38 = vadd.f32 %v1953_v20, %v1924_v56  ;;  %v1982_v50 = vpop.f32.mrf.mxu3  ;;  %v7533_v25 = vadd.f32 %v1898_v47, %v7479_v6  ;;  %v1927_v63 = vpop.f32.mrf.mxu1  ;;  %v5132_v56 = vor.u32 %v6379_v8, %v5129_v37  ;;  %9072 = vst [vmem:[#allocation16_spill] sm:$0xff] %v7547_v19 }
 0x17d   : > { %2234 = vmatpush.bf16.msrb.mxu0 %v5704_v13 }
 0x17e   : > { %v7535_v60 = vadd.f32 %v1982_v50, %v1954_v38  ;;  %2129 = vmatmul.bf16.gmra.mxu0 %v7348_v26  ;;  %2263 = vmatpush.bf16.msrb.mxu1 %v5132_v56 }
 0x17f   : > { %2158 = vmatmul.bf16.gmra.mxu1 %v7350_v27 }
 0x180   : > { %2187 = vmatmul.bf16.gmra.mxu2 %v7346_v22  ;;  %2774 = vrot.lane.b32.xlu2 %v7535_v60, %s7151_s21 }
 0x181   : > { %2216 = vmatmul.bf16.gmra.mxu3 %v7348_v26 }
 0x183   : > { %v1956_v6 = vpop.f32.mrf.mxu2  ;;  %v1900_v34 = vpop.f32.mrf.mxu0 }
 0x184   : > { %v1957_v14 = vadd.f32 %v1956_v6, %v1927_v63  ;;  %v1985_v23 = vpop.f32.mrf.mxu3  ;;  %v7544_v28 = vadd.f32 %v1900_v34, %v7484_v4  ;;  %v1929_v16 = vpop.f32.mrf.mxu1 }
 0x186   : > { %v1986_v20 = vadd.f32 %v1985_v23, %v1957_v14 }
 0x188   : > { %2776 = vrot.lane.b32.xlu1 %v1986_v20, %s7151_s21  ;;  %3309 = vrot.lane.b32.xlu2 %v7547_v19, %s7151_s21 }
 0x18b   : > { %v1958_v11 = vpop.f32.mrf.mxu2  ;;  %v1903_v38 = vpop.f32.mrf.mxu0 }
 0x18c   : > { %v1959_v30 = vadd.f32 %v1958_v11, %v1929_v16  ;;  %v1987_v18 = vpop.f32.mrf.mxu3  ;;  %v7553_v50 = vadd.f32 %v1903_v38, %v7493_v29  ;;  %v1932_v47 = vpop.f32.mrf.mxu1 }
 0x18e   : > { %v1988_v4 = vadd.f32 %v1987_v18, %v1959_v30  ;;  %2134 = vmatmul.bf16.gmra.mxu0 %v7364_v40  ;;  %v7588_v30 = vmul.f32 3.2659864, %v7424_v2  ;;  %v7591_v18 = vmul.f32 3.2659864, %v7482_v12 }
 0x18f   : > { %2163 = vmatmul.bf16.gmra.mxu1 %v7366_v41 }
 0x190   : > { %2192 = vmatmul.bf16.gmra.mxu2 %v7362_v39  ;;  %2778 = vrot.lane.b32.xlu1 %v1988_v4, %s7151_s21  ;;  %9074 = vst [vmem:[#allocation18_spill] sm:$0xff] %v7591_v18 }
 0x191   : > { %2221 = vmatmul.bf16.gmra.mxu3 %v7364_v40 }
 0x193   : > { %v1961_v9 = vpop.f32.mrf.mxu2  ;;  %v1905_v54 = vpop.f32.mrf.mxu0 }
 0x194   : > { %v1962_v3 = vadd.f32 %v1961_v9, %v1932_v47  ;;  %v1990_v58 = vpop.f32.mrf.mxu3  ;;  %v7561_v63 = vadd.f32 %v1905_v54, %v7498_v1  ;;  %v1934_v29 = vpop.f32.mrf.mxu1  ;;  %v7571_v1 = vmul.f32 3.2659864, %v7473_v61 }
 0x196   : > { %v1991_v8 = vadd.f32 %v1990_v58, %v1962_v3  ;;  %9073 = vst [vmem:[#allocation17_spill] sm:$0xff] %v7571_v1  ;;  %v7602_v58 = vmul.f32 3.2659864, %v7428_v10  ;;  %v5675_v10 = vld [vmem:[#allocation6 + $0x458] sm:$0xf] }
 0x198   : > { %2780 = vrot.lane.b32.xlu0 %v1991_v8, %s7151_s21  ;;  %3307 = vrot.lane.b32.xlu1 %v7564_v7, %s7151_s21 }
 0x19b   : > { %v1963_v37 = vpop.f32.mrf.mxu2  ;;  %v2004_v56 = vpop.f32.mrf.mxu0 }
 0x19c   : > { %v1964_v13 = vadd.f32 %v1963_v37, %v1934_v29  ;;  %v1992_v48 = vpop.f32.mrf.mxu3  ;;  %v2033_v6 = vpop.f32.mrf.mxu1  ;;  %v6591_v37 = vld [vmem:[#allocation6 + $0x6b8] sm:$0xf0] }
 0x19d   : > { %v2034_v24 = vadd.f32 %v2033_v6, %v2004_v56 }
 0x19e   : > { %v1993_v14 = vadd.f32 %v1992_v48, %v1964_v13  ;;  %2235 = vmatmul.bf16.vlgmr.msrb.gmra.mxu0 %v7318_v52 }
 0x19f   : > { %2264 = vmatmul.bf16.vlgmr.msrb.gmra.mxu1 %v7314_v46 }
 0x1a0   : > { %2293 = vmatmul.bf16.vlgmr.msrb.gmra.mxu2 %v7316_v51  ;;  %5965 = vmatpush.xpose.msk.msra.mxu3 %vm2489_vm0, %v1993_v14 }
 0x1a1   : > { %2322 = vmatmul.bf16.vlgmr.msrb.gmra.mxu3 %v7318_v52  ;;  %2782 = vrot.lane.b32.xlu0 %v1993_v14, %s7151_s21  ;;  %v7623_v14 = vmul.f32 3.2659864, %v7436_v17 }
 0x1a2   : > { %3313 = vrot.lane.b32.xlu1 %v7571_v1, %s7151_s21  ;;  %v6537_v1 = vld [vmem:[#allocation6 + $0x508] sm:$0xf0] }
 0x1a3   : > { %v2062_v23 = vpop.f32.mrf.mxu2  ;;  %v2006_v61 = vpop.f32.mrf.mxu0 }
 0x1a4   : > { %v7580_v34 = vadd.f32 %v2062_v23, %v2034_v24  ;;  %v7582_v16 = vpop.f32.mrf.mxu3  ;;  %5966 = vmatpush.xpose.msk.msra.mxu3 %vm2489_vm0, %v1991_v8  ;;  %v2035_v11 = vpop.f32.mrf.mxu1  ;;  %v5963_v8 = vld [vmem:[#allocation6 + $0x698] sm:$0xf]  ;;  %v5639_v24 = vld [vmem:[#allocation6 + $0x410] sm:$0xf]  ;;  %v6510_v23 = vld [vmem:[#allocation6 + $0x430] sm:$0xf0] }
 0x1a5   : > { %v2036_v2 = vadd.f32 %v2035_v11, %v2006_v61  ;;  %v5964_v56 = vor.u32 %v6591_v37, %v5963_v8  ;;  %v5640_v61 = vor.u32 %v6510_v23, %v5639_v24  ;;  %v5387_v11 = vld [vmem:[#allocation6 + $0x218] sm:$0xf]  ;;  %v6438_v8 = vld [vmem:[#allocation6 + $0x1f0] sm:$0xf0]  ;;  %v5891_v37 = vld [vmem:[#allocation6 + $0x608] sm:$0xf] }
 0x1a6   : > { %3321 = vrot.lane.b32.xlu2 %v7580_v34, %s7151_s21 }
 0x1a7   : > { %2401 = vmatpush.bf16.msra.mxu2 %v5964_v56 }
 0x1a8   : > { %5967 = vmatpush.xpose.msk.msra.mxu3 %vm2489_vm0, %v1988_v4 }
 0x1a9   : > { %2760 = vrot.lane.b32.xlu0 %v7588_v30, %s7151_s21 }
 0x1aa   : > { %3315 = vrot.lane.b32.xlu1 %v7591_v18, %s7151_s21 }
 0x1ab   : > { %v2064_v38 = vpop.f32.mrf.mxu2  ;;  %v2009_v9 = vpop.f32.mrf.mxu0 }
 0x1ac   : > { %v7598_v47 = vpop.f32.mrf.mxu3  ;;  %5968 = vmatpush.xpose.msk.msra.mxu3 %vm2489_vm0, %v1986_v20  ;;  %v2038_v3 = vpop.f32.mrf.mxu1  ;;  %v7605_v12 = vadd.f32 %v2064_v38, %v2036_v2  ;;  %v6519_v20 = vld [vmem:[#allocation6 + $0x478] sm:$0xf0] }
 0x1ad   : > { %v2039_v4 = vadd.f32 %v2038_v3, %v2009_v9  ;;  %v5676_v29 = vor.u32 %v6519_v20, %v5675_v10  ;;  %v6447_v38 = vld [vmem:[#allocation6 + $0x238] sm:$0xf0]  ;;  %v5927_v9 = vld [vmem:[#allocation6 + $0x650] sm:$0xf]  ;;  %v6582_v3 = vld [vmem:[#allocation6 + $0x670] sm:$0xf0] }
 0x1ae   : > { %2240 = vmatmul.bf16.gmra.mxu0 %v7334_v33  ;;  %v5928_v17 = vor.u32 %v6582_v3, %v5927_v9  ;;  %v6501_v10 = vld [vmem:[#allocation6 + $0x3e8] sm:$0xf0]  ;;  %v6492_v9 = vld [vmem:[#allocation6 + $0x3a0] sm:$0xf0] }
 0x1af   : > { %2269 = vmatmul.bf16.gmra.mxu1 %v7330_v31  ;;  %v6429_v3 = vld [vmem:[#allocation6 + $0x1a8] sm:$0xf0] }
 0x1b0   : > { %2298 = vmatmul.bf16.gmra.mxu2 %v7332_v32  ;;  %5969 = vmatpush.xpose.msk.msra.mxu3 %vm2489_vm0, %v7535_v60 }
 0x1b1   : > { %2327 = vmatmul.bf16.gmra.mxu3 %v7334_v33  ;;  %2762 = vrot.lane.b32.xlu0 %v7602_v58, %s7151_s21 }
 0x1b2   : > { %3323 = vrot.lane.b32.xlu1 %v7605_v12, %s7151_s21  ;;  %2372 = vmatpush.bf16.msra.mxu1 %v5676_v29  ;;  %v5351_v29 = vld [vmem:[#allocation6 + $0x1d0] sm:$0xf] }
 0x1b3   : > { %v2067_v54 = vpop.f32.mrf.mxu2  ;;  %v2011_v60 = vpop.f32.mrf.mxu0  ;;  %2402 = vmatpush.bf16.msra.mxu2 %v5928_v17  ;;  %v5352_v23 = vor.u32 %v6438_v8, %v5351_v29  ;;  %v5855_v17 = vld [vmem:[#allocation6 + $0x5c0] sm:$0xf] }
 0x1b4   : > { %v7616_v13 = vadd.f32 %v2067_v54, %v2039_v4  ;;  %v7618_v48 = vpop.f32.mrf.mxu3  ;;  %5970 = vmatpush.xpose.msk.msra.mxu3 %vm2489_vm0, %v7528_v62  ;;  %v2040_v6 = vpop.f32.mrf.mxu1  ;;  %v5388_v62 = vor.u32 %v6447_v38, %v5387_v11  ;;  %v5603_v4 = vld [vmem:[#allocation6 + $0x3c8] sm:$0xf]  ;;  %v7638_v11 = vmul.f32 3.2659864, %v7440_v42  ;;  %v5567_v38 = vld [vmem:[#allocation6 + $0x380] sm:$0xf] }
 0x1b5   : > { %v2041_v2 = vadd.f32 %v2040_v6, %v2011_v60  ;;  %v5604_v54 = vor.u32 %v6501_v10, %v5603_v4  ;;  %v6564_v10 = vld [vmem:[#allocation6 + $0x5e0] sm:$0xf0] }
 0x1b6   : > { %3325 = vrot.lane.b32.xlu2 %v7616_v13, %s7151_s21  ;;  %2373 = vmatpush.bf16.msra.mxu1 %v5640_v61  ;;  %v6573_v61 = vld [vmem:[#allocation6 + $0x628] sm:$0xf0]  ;;  %v5856_v42 = vor.u32 %v6564_v10, %v5855_v17  ;;  %v7653_v17 = vmul.f32 3.2659864, %v7445_v57 }
 0x1b7   : > { %2343 = vmatpush.bf16.msra.mxu0 %v5388_v62  ;;  %v5892_v6 = vor.u32 %v6573_v61, %v5891_v37  ;;  %v5568_v62 = vor.u32 %v6492_v9, %v5567_v38  ;;  %v5279_v37 = vld [vmem:[#allocation6 + $0x140] sm:$0xf]  ;;  %v6555_v9 = vld [vmem:[#allocation6 + $0x598] sm:$0xf0] }
 0x1b8   : > { %5971 = vmatpush.xpose.msk.msra.mxu3 %vm2489_vm0, %v7517_v55 }
 0x1b9   : > { %2764 = vrot.lane.b32.xlu0 %v7623_v14, %s7151_s21  ;;  %2403 = vmatpush.bf16.msra.mxu2 %v5892_v6 }
 0x1ba   : > { %2374 = vmatpush.bf16.msra.mxu1 %v5604_v54  ;;  %v6483_v54 = vld [vmem:[#allocation6 + $0x358] sm:$0xf0] }
 0x1bb   : > { %v2069_v20 = vpop.f32.mrf.mxu2  ;;  %v2014_v24 = vpop.f32.mrf.mxu0  ;;  %2344 = vmatpush.bf16.msra.mxu0 %v5352_v23  ;;  %v5819_v23 = vld [vmem:[#allocation6 + $0x578] sm:$0xf] }
 0x1bc   : > { %v7631_v56 = vadd.f32 %v2069_v20, %v2041_v2  ;;  %v7633_v55 = vpop.f32.mrf.mxu3  ;;  %5972 = vmatpush.xpose.msk.msra.mxu3 %vm2489_vm0, %v7510_v49  ;;  %v2043_v60 = vpop.f32.mrf.mxu1  ;;  %v5315_v49 = vld [vmem:[#allocation6 + $0x188] sm:$0xf]  ;;  %v5531_v20 = vld [vmem:[#allocation6 + $0x338] sm:$0xf] }
 0x1bd   : > { %v2044_v2 = vadd.f32 %v2043_v60, %v2014_v24  ;;  %v5316_v4 = vor.u32 %v6429_v3, %v5315_v49  ;;  %v5532_v8 = vor.u32 %v6483_v54, %v5531_v20  ;;  %2404 = vmatpush.bf16.msra.mxu2 %v5856_v42  ;;  %v6420_v24 = vld [vmem:[#allocation6 + $0x160] sm:$0xf0]  ;;  %v5820_v3 = vor.u32 %v6555_v9, %v5819_v23  ;;  %v6411_v42 = vld [vmem:[#allocation6 + $0x118] sm:$0xf0]  ;;  %v5783_v20 = vld [vmem:[#allocation6 + $0x530] sm:$0xf] }
 0x1be   : > { %3327 = vrot.lane.b32.xlu1 %v7631_v56, %s7151_s21  ;;  %2245 = vmatmul.bf16.gmra.mxu0 %v7350_v27  ;;  %v5280_v38 = vor.u32 %v6420_v24, %v5279_v37  ;;  %v5459_v24 = vld [vmem:[#allocation6 + $0x2a8] sm:$0xf]  ;;  %v6465_v23 = vld [vmem:[#allocation6 + $0x2c8] sm:$0xf0] }
 0x1bf   : > { %2274 = vmatmul.bf16.gmra.mxu1 %v7346_v22  ;;  %2345 = vmatpush.bf16.msra.mxu0 %v5316_v4  ;;  %v6474_v4 = vld [vmem:[#allocation6 + $0x310] sm:$0xf0]  ;;  %v5460_v18 = vor.u32 %v6465_v23, %v5459_v24 }
 0x1c0   : > { %2303 = vmatmul.bf16.gmra.mxu2 %v7348_v26  ;;  %2375 = vmatpush.bf16.msra.mxu1 %v5568_v62  ;;  %v5495_v62 = vld [vmem:[#allocation6 + $0x2f0] sm:$0xf] }
 0x1c1   : > { %2332 = vmatmul.bf16.gmra.mxu3 %v7350_v27  ;;  %2766 = vrot.lane.b32.xlu0 %v7638_v11, %s7151_s21  ;;  %v5496_v10 = vor.u32 %v6474_v4, %v5495_v62 }
 0x1c2   : > { %2405 = vmatpush.bf16.msra.mxu2 %v5820_v3  ;;  %v5747_v3 = vld [vmem:[#allocation6 + $0x4e8] sm:$0xf] }
 0x1c3   : > { %v2072_v29 = vpop.f32.mrf.mxu2  ;;  %v2016_v6 = vpop.f32.mrf.mxu0  ;;  %2346 = vmatpush.bf16.msra.mxu0 %v5280_v38  ;;  %v6402_v38 = vld [vmem:[#allocation6 + $0xd0] sm:$0xf0] }
 0x1c4   : > { %v7648_v61 = vadd.f32 %v2072_v29, %v2044_v2  ;;  %v7650_v60 = vpop.f32.mrf.mxu3  ;;  %v2045_v49 = vpop.f32.mrf.mxu1  ;;  %2376 = vmatpush.bf16.msra.mxu1 %v5532_v8  ;;  %v5243_v2 = vld [vmem:[#allocation6 + $0xf8] sm:$0xf]  ;;  %v6546_v29 = vld [vmem:[#allocation6 + $0x550] sm:$0xf0]  ;;  %v5207_v8 = vld [vmem:[#allocation6 + $0xb0] sm:$0xf] }
 0x1c5   : > { %v5244_v54 = vor.u32 %v6411_v42, %v5243_v2  ;;  %v5784_v37 = vor.u32 %v6546_v29, %v5783_v20  ;;  %v2046_v57 = vadd.f32 %v2045_v49, %v2016_v6  ;;  %v5208_v42 = vor.u32 %v6402_v38, %v5207_v8  ;;  %v5423_v49 = vld [vmem:[#allocation6 + $0x260] sm:$0xf]  ;;  %v5171_v29 = vld [vmem:[#allocation6 + $0x68] sm:$0xf]  ;;  %v6384_v8 = vld [vmem:[#allocation6 + $0x40] sm:$0xf0] }
 0x1c6   : > { %3329 = vrot.lane.b32.xlu2 %v7648_v61, %s7151_s21  ;;  %v7664_v6 = vmul.f32 3.2659864, %v7468_v0  ;;  %v5748_v20 = vor.u32 %v6537_v1, %v5747_v3  ;;  %v6528_v0 = vld [vmem:[#allocation6 + $0x4c0] sm:$0xf0] }
 0x1c7   : > { %2347 = vmatpush.bf16.msra.mxu0 %v5244_v54  ;;  %2406 = vmatpush.bf16.msra.mxu2 %v5784_v37  ;;  %v6393_v37 = vld [vmem:[#allocation6 + $0x88] sm:$0xf0] }
 0x1c8   : > { %2377 = vmatpush.bf16.msra.mxu1 %v5496_v10  ;;  %v6456_v10 = vld [vmem:[#allocation6 + $0x280] sm:$0xf0]  ;;  %v5172_v23 = vor.u32 %v6393_v37, %v5171_v29 }
 0x1c9   : > { %3305 = vrot.lane.b32.xlu0 %v7653_v17, %s7151_s21  ;;  %v5424_v54 = vor.u32 %v6456_v10, %v5423_v49  ;;  %v7678_v49 = vmul.f32 3.2659864, %v7515_v35  ;;  %v7691_v35 = vmul.f32 3.2659864, %v7544_v28  ;;  %v7703_v28 = vmul.f32 3.2659864, %v7533_v25 }
 0x1cb   : > { %v2074_v9 = vpop.f32.mrf.mxu2  ;;  %v2019_v2 = vpop.f32.mrf.mxu0  ;;  %2348 = vmatpush.bf16.msra.mxu0 %v5208_v42  ;;  %2407 = vmatpush.bf16.msra.mxu2 %v5748_v20 }
 0x1cc   : > { %v7659_v62 = vadd.f32 %v2074_v9, %v2046_v57  ;;  %v7661_v4 = vpop.f32.mrf.mxu3  ;;  %v2048_v19 = vpop.f32.mrf.mxu1  ;;  %2378 = vmatpush.bf16.msra.mxu1 %v5460_v18  ;;  %v5711_v57 = vld [vmem:[#allocation6 + $0x4a0] sm:$0xf] }
 0x1cd   : > { %v2049_v24 = vadd.f32 %v2048_v19, %v2019_v2  ;;  %v5712_v1 = vor.u32 %v6528_v0, %v5711_v57  ;;  %v5135_v18 = vld [vmem:[#allocation6 + $0x20] sm:$0xf] }
 0x1ce   : > { %3331 = vrot.lane.b32.xlu1 %v7659_v62, %s7151_s21  ;;  %2250 = vmatmul.bf16.gmra.mxu0 %v7366_v41  ;;  %v5136_v2 = vor.u32 %v6384_v8, %v5135_v18  ;;  %v7760_v18 = vpop.permute.xlu1 %2756 }
 0x1cf   : > { %2279 = vmatmul.bf16.gmra.mxu1 %v7362_v39  ;;  %2349 = vmatpush.bf16.msra.mxu0 %v5172_v23 }
 0x1d0   : > { %2308 = vmatmul.bf16.gmra.mxu2 %v7364_v40  ;;  %2379 = vmatpush.bf16.msra.mxu1 %v5424_v54  ;;  %v7683_v54 = vmul.f32 3.2659864, %v7508_v45 }
 0x1d1   : > { %2337 = vmatmul.bf16.gmra.mxu3 %v7366_v41  ;;  %3311 = vrot.lane.b32.xlu0 %v7664_v6, %s7151_s21 }
 0x1d2   : > { %2408 = vmatpush.bf16.msra.mxu2 %v5712_v1 }
 0x1d3   : > { %v2077_v9 = vpop.f32.mrf.mxu2  ;;  %v2021_v3 = vpop.f32.mrf.mxu0  ;;  %2350 = vmatpush.bf16.msra.mxu0 %v5136_v2 }
 0x1d4   : > { %v2078_v38 = vadd.f32 %v2077_v9, %v2049_v24  ;;  %v7674_v19 = vpop.f32.mrf.mxu3  ;;  %v2050_v42 = vpop.f32.mrf.mxu1  ;;  %v7733_v9 = vmul.f32 3.2659864, %v7496_v36 }
 0x1d5   : > { %v2051_v10 = vadd.f32 %v2050_v42, %v2021_v3  ;;  %v7788_v3 = vmul.f32 3.2659864, %v7526_v53 }
 0x1d6   : > { %3333 = vrot.lane.b32.xlu2 %v2078_v38, %s7151_s21 }
 0x1d9   : > { %3869 = vrot.lane.b32.xlu0 %v7678_v49, %s7151_s21 }
 0x1da   : > { %v7790_v2 = vpop.permute.xlu1 %2768 }
 0x1db   : > { %v2079_v20 = vpop.f32.mrf.mxu2  ;;  %v2120_v57 = vpop.f32.mrf.mxu0 }
 0x1dc   : > { %v2080_v29 = vadd.f32 %v2079_v20, %v2051_v10  ;;  %v7685_v37 = vpop.f32.mrf.mxu3  ;;  %v2149_v24 = vpop.f32.mrf.mxu1  ;;  %v2121_v36 = vadd.f32 %v2120_v57, %v7582_v16 }
 0x1dd   : > { %v7776_v16 = vpop.permute.xlu0 %2754 }
 0x1de   : > { %6005 = vmatpush.xpose.msk.msrb.mxu3 %vm2489_vm0, %v2080_v29  ;;  %3867 = vrot.lane.b32.xlu2 %v7683_v54, %s7151_s21  ;;  %v7764_v8 = vadd.f32 %v2149_v24, %v2121_v36 }
 0x1df   : > { %3335 = vrot.lane.b32.xlu1 %v2080_v29, %s7151_s21  ;;  %2351 = vmatmul.bf16.vlgmr.msra.gmra.mxu0 %v7314_v46  ;;  %v7706_v46 = vmul.f32 3.2659864, %v7487_v21 }
 0x1e0   : > { %2409 = vmatmul.bf16.vlgmr.msra.gmra.mxu2 %v7318_v52  ;;  %2380 = vmatmul.bf16.vlgmr.msra.gmra.mxu1 %v7316_v51  ;;  %v7715_v51 = vmul.f32 3.2659864, %v7553_v50 }
 0x1e1   : > { %5973 = vmatmul.msk.f32.vlgmr.msra.gmra.mxu3 %vm2489_vm0, %v7394_v5  ;;  %3875 = vrot.lane.b32.xlu0 %v7691_v35, %s7151_s21 }
 0x1e2   : > { %6006 = vmatpush.xpose.msk.msrb.mxu3 %vm2489_vm0, %v2078_v38 }
 0x1e3   : > { %v2178_v45 = vpop.f32.mrf.mxu2  ;;  %v2122_v0 = vpop.f32.mrf.mxu0 }
 0x1e4   : > { %v2207_v23 = vpop.f32.mrf.mxu3  ;;  %v2151_v1 = vpop.f32.mrf.mxu1  ;;  %v2123_v5 = vadd.f32 %v2122_v0, %v7598_v47  ;;  %v7740_v47 = vmul.f32 3.2659864, %v7561_v63 }
 0x1e5   : > { %v7708_v52 = vadd.f32 %v2207_v23, %v2178_v45 }
 0x1e6   : > { %6007 = vmatpush.xpose.msk.msrb.mxu3 %vm2489_vm0, %v7659_v62  ;;  %3873 = vrot.lane.b32.xlu2 %v7703_v28, %s7151_s21  ;;  %v7728_v25 = vadd.f32 %v2151_v1, %v2123_v5 }
 0x1e7   : > { %3317 = vrot.lane.b32.xlu1 %v7706_v46, %s7151_s21 }
 0x1e9   : > { %5974 = vmatmul.msk.f32.gmra.mxu3 %vm2489_vm0, %v7400_v43  ;;  %3877 = vrot.lane.b32.xlu0 %v7715_v51, %s7151_s21 }
 0x1ea   : > { %6008 = vmatpush.xpose.msk.msrb.mxu3 %vm2489_vm0, %v7648_v61 }
 0x1eb   : > { %v7726_v21 = vpop.f32.mrf.mxu2  ;;  %v2125_v62 = vpop.f32.mrf.mxu0 }
 0x1ec   : > { %v7730_v50 = vpop.f32.mrf.mxu3  ;;  %v2154_v43 = vpop.f32.mrf.mxu1 }
 0x1ee   : > { %6009 = vmatpush.xpose.msk.msrb.mxu3 %vm2489_vm0, %v7631_v56  ;;  %3883 = vrot.lane.b32.xlu2 %v7728_v25, %s7151_s21 }
 0x1ef   : > { %3319 = vrot.lane.b32.xlu1 %v7733_v9, %s7151_s21  ;;  %2356 = vmatmul.bf16.gmra.mxu0 %v7330_v31  ;;  %v7755_v31 = vmul.f32 3.2659864, %v7501_v44  ;;  %v7774_v44 = vpop.permute.xlu2 %2752 }
 0x1f0   : > { %2414 = vmatmul.bf16.gmra.mxu2 %v7334_v33  ;;  %2385 = vmatmul.bf16.gmra.mxu1 %v7332_v32 }
 0x1f1   : > { %5975 = vmatmul.msk.f32.gmra.mxu3 %vm2489_vm0, %v7410_v15  ;;  %3879 = vrot.lane.b32.xlu0 %v7740_v47, %s7151_s21 }
 0x1f2   : > { %6010 = vmatpush.xpose.msk.msrb.mxu3 %vm2489_vm0, %v7616_v13 }
 0x1f3   : > { %v2183_v63 = vpop.f32.mrf.mxu2  ;;  %v2127_v61 = vpop.f32.mrf.mxu0 }
 0x1f4   : > { %v2212_v56 = vpop.f32.mrf.mxu3  ;;  %v2128_v15 = vadd.f32 %v2127_v61, %v7633_v55  ;;  %v2156_v13 = vpop.f32.mrf.mxu1 }
 0x1f5   : > { %v7757_v33 = vadd.f32 %v2212_v56, %v2183_v63 }
 0x1f6   : > { %6011 = vmatpush.xpose.msk.msrb.mxu3 %vm2489_vm0, %v7605_v12  ;;  %v7768_v32 = vadd.f32 %v2156_v13, %v2128_v15  ;;  %v2126_v12 = vadd.f32 %v2125_v62, %v7618_v48 }
 0x1f7   : > { %3865 = vrot.lane.b32.xlu1 %v7755_v31, %s7151_s21  ;;  %v7802_v53 = vpop.permute.xlu2 %2758 }
 0x1f8   : > { %3887 = vrot.lane.b32.xlu2 %v7768_v32, %s7151_s21  ;;  %v7792_v10 = vadd.f32 %v2154_v43, %v2126_v12 }
 0x1f9   : > { %5976 = vmatmul.msk.f32.gmra.mxu3 %vm2489_vm0, %v7416_v59  ;;  %3881 = vrot.lane.b32.xlu0 %v7764_v8, %s7151_s21 }
 0x1fa   : > { %6012 = vmatpush.xpose.msk.msrb.mxu3 %vm2489_vm0, %v7580_v34  ;;  %v7804_v34 = vpop.permute.xlu0 %2770  ;;  %v2777_v24 = vpop.permute.xlu1 %2776 }
 0x1fb   : > { %v7783_v55 = vpop.f32.mrf.mxu2  ;;  %v2130_v59 = vpop.f32.mrf.mxu0 }
 0x1fc   : > { %v7785_v38 = vpop.f32.mrf.mxu3  ;;  %v2159_v42 = vpop.f32.mrf.mxu1  ;;  %v2131_v48 = vadd.f32 %v2130_v59, %v7650_v60 }
 0x1fe   : > { %v2160_v45 = vadd.f32 %v2159_v42, %v2131_v48 }
 0x1ff   : > { %3871 = vrot.lane.b32.xlu1 %v7788_v3, %s7151_s21  ;;  %2361 = vmatmul.bf16.gmra.mxu0 %v7346_v22  ;;  %v2773_v0 = vpop.permute.xlu2 %2772 }
 0x200   : > { %2419 = vmatmul.bf16.gmra.mxu2 %v7350_v27  ;;  %2390 = vmatmul.bf16.gmra.mxu1 %v7348_v26 }
 0x201   : > { %5977 = vmatmul.msk.f32.gmra.mxu3 %vm2489_vm0, %v7588_v30  ;;  %3885 = vrot.lane.b32.xlu0 %v7792_v10, %s7151_s21 }
 0x202   : > { %v2779_v36 = vpop.permute.xlu1 %2778 }
 0x203   : > { %v2188_v20 = vpop.f32.mrf.mxu2  ;;  %v2132_v57 = vpop.f32.mrf.mxu0 }
 0x204   : > { %v2217_v29 = vpop.f32.mrf.mxu3  ;;  %v2133_v27 = vadd.f32 %v2132_v57, %v7661_v4  ;;  %v2161_v30 = vpop.f32.mrf.mxu1 }
 0x205   : > { %v7808_v22 = vadd.f32 %v2217_v29, %v2188_v20 }
 0x206   : > { %v2162_v23 = vadd.f32 %v2161_v30, %v2133_v27 }
 0x207   : > { %v2775_v56 = vpop.permute.xlu2 %2774 }
 0x208   : > { %3891 = vrot.lane.b32.xlu2 %v2162_v23, %s7151_s21 }
 0x209   : > { %5978 = vmatmul.msk.f32.gmra.mxu3 %vm2489_vm0, %v7602_v58  ;;  %3889 = vrot.lane.b32.xlu0 %v2160_v45, %s7151_s21 }
 0x20a   : > { %v2781_v26 = vpop.permute.xlu0 %2780 }
 0x20b   : > { %v7815_v60 = vpop.f32.mrf.mxu2  ;;  %v2135_v5 = vpop.f32.mrf.mxu0 }
 0x20c   : > { %v7817_v1 = vpop.f32.mrf.mxu3  ;;  %v2136_v4 = vadd.f32 %v2135_v5, %v7674_v19  ;;  %v2164_v62 = vpop.f32.mrf.mxu1 }
 0x20e   : > { %v2165_v43 = vadd.f32 %v2164_v62, %v2136_v4  ;;  %v2210_v4 = vadd.f32 %v7730_v50, %v7726_v21 }
 0x20f   : > { %2366 = vmatmul.bf16.gmra.mxu0 %v7362_v39  ;;  %v7844_v42 = vpop.permute.xlu2 %3309 }
 0x210   : > { %2424 = vmatmul.bf16.gmra.mxu2 %v7366_v41  ;;  %2395 = vmatmul.bf16.gmra.mxu1 %v7364_v40 }
 0x211   : > { %5979 = vmatmul.msk.f32.gmra.mxu3 %vm2489_vm0, %v7623_v14  ;;  %3893 = vrot.lane.b32.xlu0 %v2165_v43, %s7151_s21  ;;  %v7833_v14 = vpop.permute.xlu1 %3307 }
 0x213   : > { %v2783_v58 = vpop.permute.xlu0 %2782  ;;  %v2193_v63 = vpop.f32.mrf.mxu2 }
 0x214   : > { %v2222_v61 = vpop.f32.mrf.mxu3  ;;  %5985 = vmatpush.xpose.msk.msrb.mxu1 %vm2489_vm0, %v2783_v58  ;;  %v2137_v15 = vpop.f32.mrf.mxu0 }
 0x215   : > { %v7827_v19 = vadd.f32 %v2222_v61, %v2193_v63  ;;  %v2138_v39 = vadd.f32 %v2137_v15, %v7685_v37  ;;  %v2166_v13 = vpop.f32.mrf.mxu1 }
 0x217   : > { %v2167_v41 = vadd.f32 %v2166_v13, %v2138_v39  ;;  %v7856_v30 = vpop.permute.xlu2 %3321 }
 0x218   : > { %5986 = vmatpush.xpose.msk.msrb.mxu1 %vm2489_vm0, %v2781_v26 }
 0x219   : > { %5980 = vmatmul.msk.f32.gmra.mxu3 %vm2489_vm0, %v7638_v11  ;;  %3895 = vrot.lane.b32.xlu2 %v2167_v41, %s7151_s21  ;;  %v7854_v57 = vpop.permute.xlu1 %3313 }
 0x21a   : > { %6045 = vmatpush.xpose.msk.msra.mxu3 %vm2489_vm0, %v2167_v41 }
 0x21b   : > { %v7837_v40 = vpop.permute.xlu0 %2760  ;;  %v7839_v12 = vpop.f32.mrf.mxu2 }
 0x21c   : > { %v7841_v59 = vpop.f32.mrf.mxu3  ;;  %5987 = vmatpush.xpose.msk.msrb.mxu1 %vm2489_vm0, %v2779_v36  ;;  %v2236_v37 = vpop.f32.mrf.mxu0 }
 0x21d   : > { %v2265_v11 = vpop.f32.mrf.mxu1  ;;  %v2237_v62 = vadd.f32 %v2236_v37, %v7708_v52  ;;  %v9075_v52 = vld [vmem:[#allocation16_spill] sm:$0xff] }
 0x21e   : > { %6046 = vmatpush.xpose.msk.msra.mxu3 %vm2489_vm0, %v2165_v43 }
 0x21f   : > { %v7871_v36 = vpop.permute.xlu2 %3325 }
 0x220   : > { %5988 = vmatpush.xpose.msk.msrb.mxu1 %vm2489_vm0, %v2777_v24 }
 0x221   : > { %6013 = vmatmul.msk.f32.vlgmr.msrb.gmra.mxu3 %vm2489_vm0, %v7653_v17 }
 0x222   : > { %6047 = vmatpush.xpose.msk.msra.mxu3 %vm2489_vm0, %v2162_v23 }
 0x223   : > { %v7851_v48 = vpop.permute.xlu0 %2762  ;;  %v2294_v20 = vpop.f32.mrf.mxu2 }
 0x224   : > { %v2323_v29 = vpop.f32.mrf.mxu3  ;;  %5989 = vmatpush.xpose.msk.msrb.mxu1 %vm2489_vm0, %v2775_v56  ;;  %v2238_v27 = vpop.f32.mrf.mxu0  ;;  %v2295_v26 = vadd.f32 %v2294_v20, %v2265_v11 }
 0x225   : > { %v2267_v24 = vpop.f32.mrf.mxu1  ;;  %v2239_v58 = vadd.f32 %v2238_v27, %v2210_v4 }
 0x226   : > { %6048 = vmatpush.xpose.msk.msra.mxu3 %vm2489_vm0, %v2160_v45  ;;  %v2324_v17 = vadd.f32 %v2323_v29, %v2295_v26 }
 0x227   : > { %v7891_v11 = vpop.permute.xlu2 %3329 }
 0x228   : > { %5990 = vmatpush.xpose.msk.msrb.mxu1 %vm2489_vm0, %v2773_v0 }
 0x229   : > { %6014 = vmatmul.msk.f32.gmra.mxu3 %vm2489_vm0, %v7564_v7  ;;  %v2454_v7 = vpack.c.bf16 %v2324_v17, %v2237_v62 }
 0x22a   : > { %6049 = vmatpush.xpose.msk.msra.mxu3 %vm2489_vm0, %v7768_v32  ;;  %v7875_v32 = vpop.permute.xlu1 %3315 }
 0x22b   : > { %v7864_v23 = vpop.permute.xlu0 %2764  ;;  %v2296_v5 = vpop.f32.mrf.mxu2  ;;  %v2687_v50 = vunpack.c.l.b16 %v2454_v7 }
 0x22c   : > { %v2297_v43 = vadd.f32 %v2296_v5, %v2267_v24  ;;  %v2325_v45 = vpop.f32.mrf.mxu3  ;;  %5991 = vmatpush.xpose.msk.msrb.mxu1 %vm2489_vm0, %v7804_v34  ;;  %v2241_v0 = vpop.f32.mrf.mxu0  ;;  %v3240_v34 = vunpack.c.h.b16 %v2454_v7 }
 0x22d   : > { %v2270_v56 = vpop.f32.mrf.mxu1  ;;  %v2242_v24 = vadd.f32 %v2241_v0, %v7757_v33 }
 0x22e   : > { %v2326_v63 = vadd.f32 %v2325_v45, %v2297_v43  ;;  %6050 = vmatpush.xpose.msk.msra.mxu3 %vm2489_vm0, %v7792_v10 }
 0x230   : > { %v2456_v21 = vpack.c.bf16 %v2326_v63, %v2239_v58  ;;  %5992 = vmatpush.xpose.msk.msrb.mxu1 %vm2489_vm0, %v7790_v2  ;;  %v3334_v62 = vpop.permute.xlu2 %3333 }
 0x231   : > { %6015 = vmatmul.msk.f32.gmra.mxu3 %vm2489_vm0, %v9075_v52 }
 0x232   : > { %v2688_v61 = vunpack.c.l.b16 %v2456_v21  ;;  %v3241_v15 = vunpack.c.h.b16 %v2456_v21  ;;  %6051 = vmatpush.xpose.msk.msra.mxu3 %vm2489_vm0, %v7728_v25 }
 0x233   : > { %5993 = vmatmul.msk.f32.vlgmr.msrb.gmra.mxu1 %vm2489_vm0, %v7774_v44  ;;  %v7885_v10 = vpop.permute.xlu0 %2766  ;;  %v2299_v39 = vpop.f32.mrf.mxu2 }
 0x234   : > { %v2328_v13 = vpop.f32.mrf.mxu3  ;;  %v7887_v41 = vpack.c.b16 %v2688_v61, %v2687_v50  ;;  %v7889_v2 = vpack.c.b16 %v3241_v15, %v3240_v34  ;;  %v2243_v37 = vpop.f32.mrf.mxu0  ;;  %v2300_v20 = vadd.f32 %v2299_v39, %v2270_v56 }
 0x235   : > { %v2272_v25 = vpop.f32.mrf.mxu1  ;;  %v7899_v44 = vpop.permute.xlu1 %3323 }
 0x236   : > { %6052 = vmatpush.xpose.msk.msra.mxu3 %vm2489_vm0, %v7764_v8  ;;  %2957 = vrot.lane.b32.xlu2 %v7887_v41, %s7151_s21  ;;  %v2329_v29 = vadd.f32 %v2328_v13, %v2300_v20  ;;  %v2215_v8 = vadd.f32 %v7785_v38, %v7783_v55 }
 0x237   : > { %3510 = vrot.lane.b32.xlu1 %v7889_v2, %s7151_s21 }
 0x238   : > { %v2458_v43 = vpack.c.bf16 %v2329_v29, %v2242_v24  ;;  %v2244_v45 = vadd.f32 %v2243_v37, %v2215_v8  ;;  %v7926_v13 = vpop.permute.xlu2 %3867  ;;  %v9077_v37 = vld [vmem:[#allocation18_spill] sm:$0xff] }
 0x239   : > { %6016 = vmatmul.msk.f32.gmra.mxu3 %vm2489_vm0, %v7664_v6 }
 0x23a   : > { %v2689_v56 = vunpack.c.l.b16 %v2458_v43  ;;  %v3242_v21 = vunpack.c.h.b16 %v2458_v43 }
 0x23b   : > { %5994 = vmatmul.msk.f32.gmra.mxu1 %vm2489_vm0, %v7776_v16  ;;  %v7905_v27 = vpop.permute.xlu0 %3305  ;;  %v2301_v26 = vpop.f32.mrf.mxu2  ;;  %v9076_v16 = vld [vmem:[#allocation17_spill] sm:$0xff] }
 0x23c   : > { %v2302_v17 = vadd.f32 %v2301_v26, %v2272_v25  ;;  %v2330_v5 = vpop.f32.mrf.mxu3  ;;  %v2246_v4 = vpop.f32.mrf.mxu0  ;;  %v2220_v26 = vadd.f32 %v7817_v1, %v7815_v60 }
 0x23d   : > { %v2275_v6 = vpop.f32.mrf.mxu1  ;;  %v7910_v63 = vpop.permute.xlu1 %3327  ;;  %v2247_v8 = vadd.f32 %v2246_v4, %v7808_v22 }
 0x23e   : > { %v2331_v7 = vadd.f32 %v2330_v5, %v2302_v17 }
 0x240   : > { %v2460_v58 = vpack.c.bf16 %v2331_v7, %v2244_v45 }
 0x241   : > { %6017 = vmatmul.msk.f32.gmra.mxu3 %vm2489_vm0, %v9076_v16 }
 0x242   : > { %v2690_v52 = vunpack.c.l.b16 %v2460_v58  ;;  %v3243_v55 = vunpack.c.h.b16 %v2460_v58 }
 0x243   : > { %5995 = vmatmul.msk.f32.gmra.mxu1 %vm2489_vm0, %v7760_v18  ;;  %v7916_v33 = vpop.permute.xlu0 %3311  ;;  %v2304_v38 = vpop.f32.mrf.mxu2 }
 0x244   : > { %v2333_v0 = vpop.f32.mrf.mxu3  ;;  %v7918_v50 = vpack.c.b16 %v2690_v52, %v2689_v56  ;;  %v7920_v34 = vpack.c.b16 %v3243_v55, %v3242_v21  ;;  %v2248_v61 = vpop.f32.mrf.mxu0  ;;  %v2305_v15 = vadd.f32 %v2304_v38, %v2275_v6 }
 0x245   : > { %v2277_v39 = vpop.f32.mrf.mxu1  ;;  %v3332_v18 = vpop.permute.xlu1 %3331  ;;  %v2249_v45 = vadd.f32 %v2248_v61, %v2220_v26 }
 0x246   : > { %2959 = vrot.lane.b32.xlu2 %v7918_v50, %s7151_s21  ;;  %3512 = vrot.lane.b32.xlu1 %v7920_v34, %s7151_s21  ;;  %v2334_v20 = vadd.f32 %v2333_v0, %v2305_v15 }
 0x248   : > { %v2462_v43 = vpack.c.bf16 %v2334_v20, %v2247_v8 }
 0x249   : > { %6018 = vmatmul.msk.f32.gmra.mxu3 %vm2489_vm0, %v9077_v37 }
 0x24a   : > { %v2691_v56 = vunpack.c.l.b16 %v2462_v43  ;;  %v3244_v21 = vunpack.c.h.b16 %v2462_v43 }
 0x24b   : > { %5996 = vmatmul.msk.f32.gmra.mxu1 %vm2489_vm0, %v7802_v53  ;;  %v7932_v25 = vpop.permute.xlu0 %3869  ;;  %v2306_v29 = vpop.f32.mrf.mxu2 }
 0x24c   : > { %v2307_v24 = vadd.f32 %v2306_v29, %v2277_v39  ;;  %v2335_v17 = vpop.f32.mrf.mxu3  ;;  %v2251_v5 = vpop.f32.mrf.mxu0 }
 0x24d   : > { %v2280_v6 = vpop.f32.mrf.mxu1  ;;  %v7939_v53 = vpop.permute.xlu2 %3873  ;;  %v2252_v20 = vadd.f32 %v2251_v5, %v7827_v19 }
 0x24e   : > { %v2336_v7 = vadd.f32 %v2335_v17, %v2307_v24 }
 0x250   : > { %v2464_v58 = vpack.c.bf16 %v2336_v7, %v2249_v45 }
 0x251   : > { %v3336_v16 = vpop.permute.xlu1 %3335  ;;  %6019 = vmatmul.msk.f32.gmra.mxu3 %vm2489_vm0, %v7706_v46 }
 0x252   : > { %v2692_v52 = vunpack.c.l.b16 %v2464_v58  ;;  %v3245_v60 = vunpack.c.h.b16 %v2464_v58  ;;  %6025 = vmatpush.xpose.msk.msra.mxu1 %vm2489_vm0, %v3336_v16 }
 0x253   : > { %5997 = vmatmul.msk.f32.gmra.mxu1 %vm2489_vm0, %v7837_v40  ;;  %v7944_v22 = vpop.permute.xlu0 %3875  ;;  %v2309_v1 = vpop.f32.mrf.mxu2 }
 0x254   : > { %v2338_v4 = vpop.f32.mrf.mxu3  ;;  %v7946_v55 = vpack.c.b16 %v3245_v60, %v3244_v21  ;;  %v2697_v38 = vpack.c.b16 %v2692_v52, %v2691_v56  ;;  %v2310_v0 = vadd.f32 %v2309_v1, %v2280_v6  ;;  %v2253_v46 = vpop.f32.mrf.mxu0  ;;  %v2470_v21 = vlaneseq }
 0x255   : > { %v2282_v61 = vpop.f32.mrf.mxu1  ;;  %v7961_v37 = vpop.permute.xlu2 %3883 }
 0x256   : > { %6026 = vmatpush.xpose.msk.msra.mxu1 %vm2489_vm0, %v3334_v62  ;;  %3514 = vrot.lane.b32.xlu2 %v7946_v55, %s7151_s21  ;;  %v2339_v40 = vadd.f32 %v2338_v4, %v2310_v0  ;;  %v2225_v62 = vadd.f32 %v7841_v59, %v7839_v12 }
 0x257   : > { %2961 = vrot.lane.b32.xlu1 %v2697_v38, %s7151_s21 }
 0x258   : > { %v2466_v8 = vpack.c.bf16 %v2339_v40, %v2252_v20 }
 0x259   : > { %6020 = vmatmul.msk.f32.gmra.mxu3 %vm2489_vm0, %v7733_v9  ;;  %v2254_v9 = vadd.f32 %v2253_v46, %v2225_v62 }
 0x25a   : > { %6027 = vmatpush.xpose.msk.msra.mxu1 %vm2489_vm0, %v3332_v18  ;;  %v2693_v12 = vunpack.c.l.b16 %v2466_v8 }
 0x25b   : > { %5998 = vmatmul.msk.f32.gmra.mxu1 %vm2489_vm0, %v7851_v48  ;;  %v7957_v15 = vpop.permute.xlu0 %3877  ;;  %v2311_v39 = vpop.f32.mrf.mxu2 }
 0x25c   : > { %v2312_v29 = vadd.f32 %v2311_v39, %v2282_v61  ;;  %v2340_v26 = vpop.f32.mrf.mxu3  ;;  %v2352_v48 = vpop.f32.mrf.mxu0 }
 0x25d   : > { %v2381_v18 = vpop.f32.mrf.mxu1  ;;  %v7974_v45 = vpop.permute.xlu2 %3887 }
 0x25e   : > { %v2341_v24 = vadd.f32 %v2340_v26, %v2312_v29  ;;  %6028 = vmatpush.xpose.msk.msra.mxu1 %vm2489_vm0, %v7891_v11  ;;  %v2382_v43 = vadd.f32 %v2381_v18, %v2352_v48 }
 0x260   : > { %v2468_v17 = vpack.c.bf16 %v2341_v24, %v2254_v9 }
 0x261   : > { %6053 = vmatmul.msk.f32.vlgmr.msra.gmra.mxu3 %vm2489_vm0, %v7755_v31 }
 0x262   : > { %v2694_v59 = vunpack.c.l.b16 %v2468_v17  ;;  %6029 = vmatpush.xpose.msk.msra.mxu1 %vm2489_vm0, %v7910_v63  ;;  %v3247_v31 = vunpack.c.h.b16 %v2468_v17  ;;  %v3246_v63 = vunpack.c.h.b16 %v2466_v8 }
 0x263   : > { %5999 = vmatmul.msk.f32.gmra.mxu1 %vm2489_vm0, %v7864_v23  ;;  %v7972_v19 = vpop.permute.xlu0 %3879  ;;  %v2410_v5 = vpop.f32.mrf.mxu2 }
 0x264   : > { %v2555_v11 = vpop.f32.mrf.mxu3  ;;  %v2698_v7 = vpack.c.b16 %v2694_v59, %v2693_v12  ;;  %v7976_v6 = vadd.f32 %v2410_v5, %v2382_v43  ;;  %v3251_v56 = vpack.c.b16 %v3247_v31, %v3246_v63  ;;  %v9094_v12 = vmov 0 }
 0x265   : > { %v7983_v23 = vpop.f32.mrf.mxu1  ;;  %v9097_v59 = vmov 0 }
 0x266   : > { %6030 = vmatpush.xpose.msk.msra.mxu1 %vm2489_vm0, %v7871_v36  ;;  %2719 = vmatpush.bf16.msrb.mxu0 %v2698_v7  ;;  %v3892_v36 = vpop.permute.xlu2 %3891 }
 0x267   : > { %2963 = vrot.lane.b32.xlu0 %v2698_v7, %s7151_s21 }
 0x269   : > { %6054 = vmatmul.msk.f32.gmra.mxu3 %vm2489_vm0, %v7683_v54  ;;  %v2471_v54 = vshrl.u32 %v2470_v21, 7 }
 0x26a   : > { %6031 = vmatpush.xpose.msk.msra.mxu1 %vm2489_vm0, %v7899_v44  ;;  %2720 = vmatpush.bf16.msrb.mxu0 %v2697_v38 }
 0x26b   : > { %6000 = vmatmul.msk.f32.gmra.mxu1 %vm2489_vm0, %v7885_v10  ;;  %v7989_v58 = vpop.permute.xlu0 %3881  ;;  %v2474_v0 = vadd.s32 24, %v2471_v54  ;;  %v2476_v40 = vadd.s32 40, %v2471_v54  ;;  %v2473_v29 = vadd.s32 16, %v2471_v54  ;;  %v2477_v26 = vadd.s32 48, %v2471_v54 }
 0x26c   : > { %v2558_v16 = vpop.f32.mrf.mxu3  ;;  %v2475_v48 = vadd.s32 32, %v2471_v54  ;;  %v2478_v43 = vadd.s32 56, %v2471_v54 }
 0x26d   : > { %v8000_v44 = vpop.f32.mrf.mxu1 }
 0x26e   : > { %6032 = vmatpush.xpose.msk.msra.mxu1 %vm2489_vm0, %v7856_v30  ;;  %2721 = vmatpush.bf16.msrb.mxu0 %v7918_v50  ;;  %v2472_v30 = vadd.s32 8, %v2471_v54  ;;  %v2480_v50 = vand.u32 127, %v2470_v21 }
 0x26f   : > { %3516 = vrot.lane.b32.xlu0 %v3251_v56, %s7151_s21 }
 0x270   : > { %vm8004_vm1 = vcmp.le.s32.totalorder %v2480_v50, %v2472_v30  ;;  %vm8010_vm2 = vcmp.le.s32.totalorder %v2480_v50, %v2471_v54  ;;  %vm8034_vm3 = vcmp.le.s32.totalorder %v2480_v50, %v2474_v0  ;;  %vm8052_vm4 = vcmp.le.s32.totalorder %v2480_v50, %v2476_v40 }
 0x271   : > { %6055 = vmatmul.msk.f32.gmra.mxu3 %vm2489_vm0, %v7678_v49  ;;  %v8019_v1 = vsel %vm8004_vm1, %v2558_v16, -1e+30  ;;  %vm8069_vm5 = vcmp.le.s32.totalorder %v2480_v50, %v2473_v29  ;;  %vm8073_vm6 = vcmp.le.s32.totalorder %v2480_v50, %v2477_v26  ;;  %vm8098_vm7 = vcmp.le.s32.totalorder %v2480_v50, %v2475_v48 }
 0x272   : > { %2722 = vmatpush.bf16.msrb.mxu0 %v7887_v41  ;;  %v9095_v12 = vsel %vm8098_vm7, 4294967295, %v9094_v12  ;;  %vm8102_vm8 = vcmp.le.s32.totalorder %v2480_v50, %v2478_v43 }
 0x273   : > { %6033 = vmatmul.msk.f32.vlgmr.msra.gmra.mxu1 %vm2489_vm0, %v7905_v27  ;;  %v3886_v10 = vpop.permute.xlu0 %3885  ;;  %v3896_v60 = vpop.permute.xlu2 %3895  ;;  %9096 = vst [vmem:[#allocation20_spill] sm:$0xff] %v9095_v12  ;;  %v9098_v59 = vsel %vm8102_vm8, 4294967295, %v9097_v59 }
 0x274   : > { %v2561_v52 = vpop.f32.mrf.mxu3  ;;  %6065 = vmatpush.xpose.msk.msrb.mxu1 %vm2489_vm0, %v3896_v60  ;;  %9099 = vst [vmem:[#allocation21_spill] sm:$0xff] %v9098_v59 }
 0x275   : > { %v8027_v38 = vpop.f32.mrf.mxu1  ;;  %v8084_v18 = vsel %vm8069_vm5, %v2561_v52, -1e+30 }
 0x276   : > { %3272 = vmatpush.bf16.msra.mxu0 %v3251_v56 }
 0x279   : > { %6056 = vmatmul.msk.f32.gmra.mxu3 %vm2489_vm0, %v7788_v3  ;;  %v2590_v3 = vsel %vm2489_vm0, %v8019_v1, -inf }
 0x27a   : > { %3273 = vmatpush.bf16.msra.mxu0 %v7946_v55  ;;  %v8023_v55 = vsel %vm8010_vm2, %v2555_v11, -1e+30  ;;  %v3318_v11 = vpop.permute.xlu1 %3317 }
 0x27b   : > { %6034 = vmatmul.msk.f32.gmra.mxu1 %vm2489_vm0, %v7833_v14  ;;  %v3890_v27 = vpop.permute.xlu0 %3889  ;;  %v2587_v14 = vsel %vm2489_vm0, %v8023_v55, -inf }
 0x27c   : > { %v2564_v4 = vpop.f32.mrf.mxu3 }
 0x27e   : > { %3274 = vmatpush.bf16.msra.mxu0 %v7920_v34  ;;  %v9082_v34 = vmov 0 }
 0x27f   : > { %2591 = vmax.xlane.f32.xlu2 %v2590_v3  ;;  %v9083_v34 = vsel %vm8034_vm3, 4294967295, %v9082_v34 }
 0x280   : > { %9084 = vst [vmem:[#allocation16_spill] sm:$0xff] %v9083_v34 }
 0x281   : > { %2588 = vmax.xlane.f32.xlu1 %v2587_v14  ;;  %6057 = vmatmul.msk.f32.gmra.mxu3 %vm2489_vm0, %v7703_v28  ;;  %v8048_v28 = vpop.f32.mrf.mxu1 }
 0x282   : > { %3275 = vmatpush.bf16.msra.mxu0 %v7889_v2  ;;  %v8043_v2 = vsel %vm8034_vm3, %v2564_v4, -1e+30 }
 0x283   : > { %6035 = vmatmul.msk.f32.gmra.mxu1 %vm2489_vm0, %v7844_v42  ;;  %v3894_v46 = vpop.permute.xlu0 %3893  ;;  %v2596_v39 = vsel %vm2489_vm0, %v8043_v2, -inf  ;;  %v9085_v42 = vmov 0 }
 0x284   : > { %v2567_v61 = vpop.f32.mrf.mxu3  ;;  %6066 = vmatpush.xpose.msk.msrb.mxu1 %vm2489_vm0, %v3894_v46  ;;  %v9086_v42 = vsel %vm8052_vm4, 4294967295, %v9085_v42 }
 0x285   : > { %9087 = vst [vmem:[#allocation17_spill] sm:$0xff] %v9086_v42 }
 0x288   : > { %6067 = vmatpush.xpose.msk.msrb.mxu1 %vm2489_vm0, %v3892_v36  ;;  %v3320_v36 = vpop.permute.xlu1 %3319 }
 0x289   : > { %2597 = vmax.xlane.f32.xlu1 %v2596_v39  ;;  %6058 = vmatmul.msk.f32.gmra.mxu3 %vm2489_vm0, %v7691_v35  ;;  %v9088_v35 = vmov 0  ;;  %v8077_v9 = vpop.f32.mrf.mxu1 }
 0x28a   : > { %v9089_v35 = vsel %vm8069_vm5, 4294967295, %v9088_v35 }
 0x28b   : > { %6036 = vmatmul.msk.f32.gmra.mxu1 %vm2489_vm0, %v7916_v33  ;;  %9090 = vst [vmem:[#allocation18_spill] sm:$0xff] %v9089_v35  ;;  %v9091_v33 = vmov 0 }
 0x28c   : > { %v2570_v62 = vpop.f32.mrf.mxu3  ;;  %6068 = vmatpush.xpose.msk.msrb.mxu1 %vm2489_vm0, %v3890_v27  ;;  %v9092_v33 = vsel %vm8073_vm6, 4294967295, %v9091_v33 }
 0x28d   : > { %v8061_v20 = vsel %vm8052_vm4, %v2570_v62, -1e+30  ;;  %9093 = vst [vmem:[#allocation19_spill] sm:$0xff] %v9092_v33 }
 0x28e   : > { %v2602_v8 = vsel %vm2489_vm0, %v8061_v20, -inf }
 0x290   : > { %6069 = vmatpush.xpose.msk.msrb.mxu1 %vm2489_vm0, %v7974_v45  ;;  %v3866_v60 = vpop.permute.xlu1 %3865 }
 0x291   : > { %2603 = vmax.xlane.f32.xlu1 %v2602_v8  ;;  %6059 = vmatmul.msk.f32.gmra.mxu3 %vm2489_vm0, %v7715_v51 }
 0x293   : > { %6037 = vmatmul.msk.f32.gmra.mxu1 %vm2489_vm0, %v7854_v57  ;;  %v2593_v57 = vsel %vm2489_vm0, %v8084_v18, -inf }
 0x294   : > { %v2573_v24 = vpop.f32.mrf.mxu3  ;;  %6070 = vmatpush.xpose.msk.msrb.mxu1 %vm2489_vm0, %v3886_v10 }
 0x295   : > { %v8088_v51 = vsel %vm8073_vm6, %v2573_v24, -1e+30 }
 0x296   : > { %v2605_v17 = vsel %vm2489_vm0, %v8088_v51, -inf }
 0x297   : > { %2606 = vmax.xlane.f32.xlu2 %v2605_v17 }
 0x298   : > { %6071 = vmatpush.xpose.msk.msrb.mxu1 %vm2489_vm0, %v7961_v37  ;;  %v8110_v37 = vpop.f32.mrf.mxu1  ;;  %v3872_v26 = vpop.permute.xlu1 %3871 }
 0x299   : > { %2594 = vmax.xlane.f32.xlu0 %v2593_v57  ;;  %6060 = vmatmul.msk.f32.gmra.mxu3 %vm2489_vm0, %v7740_v47  ;;  %v8114_v47 = vsel %vm8098_vm7, %v2567_v61, -1e+30 }
 0x29b   : > { %6038 = vmatmul.msk.f32.gmra.mxu1 %vm2489_vm0, %v7875_v32  ;;  %v2599_v32 = vsel %vm2489_vm0, %v8114_v47, -inf }
 0x29c   : > { %v2576_v5 = vpop.f32.mrf.mxu3  ;;  %6072 = vmatpush.xpose.msk.msrb.mxu1 %vm2489_vm0, %v7989_v58 }
 0x29d   : > { %v8118_v45 = vsel %vm8102_vm8, %v2576_v5, -1e+30 }
 0x29e   : > { %v2608_v7 = vsel %vm2489_vm0, %v8118_v45, -inf }
 0x29f   : > { %2609 = vmax.xlane.f32.xlu1 %v2608_v7 }
 0x2a0   : > { %v8129_v58 = vpop.f32.mrf.mxu1 }
 0x2a1   : > { %2600 = vmax.xlane.f32.xlu0 %v2599_v32 }
 0x2a3   : > { %6039 = vmatmul.msk.f32.gmra.mxu1 %vm2489_vm0, %v3318_v11 }
 0x2a4   : > { %v3116_v31 = vpop.f32.mrf.mxu3 }
 0x2a5   : > { %v8127_v63 = vsel %vm8010_vm2, %v3116_v31, -1e+30 }
 0x2a6   : > { %v3148_v16 = vsel %vm2489_vm0, %v8127_v63, -inf }
 0x2a9   : > { %3149 = vmax.xlane.f32.xlu0 %v3148_v16  ;;  %v3511_v57 = vpop.permute.xlu1 %3510 }
 0x2ab   : > { %6040 = vmatmul.msk.f32.gmra.mxu1 %vm2489_vm0, %v3320_v36 }
 0x2ac   : > { %v3119_v56 = vpop.f32.mrf.mxu3 }
 0x2ad   : > { %v8136_v21 = vsel %vm8004_vm1, %v3119_v56, -1e+30 }
 0x2ae   : > { %v3151_v54 = vsel %vm2489_vm0, %v8136_v21, -inf }
 0x2af   : > { %3152 = vmax.xlane.f32.xlu2 %v3151_v54 }
 0x2b0   : > { %v2833_v10 = vpop.f32.mrf.mxu1 }
 0x2b1   : > { %v8142_v52 = vsel %vm8010_vm2, %v2833_v10, -1e+30 }
 0x2b2   : > { %v2865_v30 = vsel %vm2489_vm0, %v8142_v52, -inf }
 0x2b3   : > { %6073 = vmatmul.msk.f32.vlgmr.msrb.gmra.mxu1 %vm2489_vm0, %v3866_v60  ;;  %2866 = vmax.xlane.f32.xlu1 %v2865_v30  ;;  %v2958_v60 = vpop.permute.xlu2 %2957 }
 0x2b4   : > { %v3122_v50 = vpop.f32.mrf.mxu3 }
 0x2b5   : > { %v8149_v27 = vsel %vm8069_vm5, %v3122_v50, -1e+30 }
 0x2b6   : > { %v3154_v4 = vsel %vm2489_vm0, %v8149_v27, -inf }
 0x2b7   : > { %3155 = vmax.xlane.f32.xlu0 %v3154_v4 }
 0x2b8   : > { %v2836_v3 = vpop.f32.mrf.mxu1  ;;  %v3513_v36 = vpop.permute.xlu1 %3512 }
 0x2b9   : > { %v8155_v0 = vsel %vm8004_vm1, %v2836_v3, -1e+30 }
 0x2ba   : > { %v2868_v14 = vsel %vm2489_vm0, %v8155_v0, -inf }
 0x2bb   : > { %6074 = vmatmul.msk.f32.gmra.mxu1 %vm2489_vm0, %v7926_v13  ;;  %2869 = vmax.xlane.f32.xlu2 %v2868_v14 }
 0x2bc   : > { %v3125_v46 = vpop.f32.mrf.mxu3 }
 0x2bd   : > { %v8163_v40 = vsel %vm8034_vm3, %v3125_v46, -1e+30 }
 0x2be   : > { %v3157_v13 = vsel %vm2489_vm0, %v8163_v40, -inf }
 0x2c0   : > { %v2839_v61 = vpop.f32.mrf.mxu1 }
 0x2c1   : > { %v8167_v39 = vsel %vm8069_vm5, %v2839_v61, -1e+30  ;;  %v2960_v61 = vpop.permute.xlu2 %2959 }
 0x2c2   : > { %v2871_v62 = vsel %vm2489_vm0, %v8167_v39, -inf }
 0x2c3   : > { %6075 = vmatmul.msk.f32.gmra.mxu1 %vm2489_vm0, %v7932_v25  ;;  %2872 = vmax.xlane.f32.xlu0 %v2871_v62 }
 0x2c4   : > { %3158 = vmax.xlane.f32.xlu2 %v3157_v13  ;;  %v3128_v29 = vpop.f32.mrf.mxu3 }
 0x2c5   : > { %v8177_v8 = vsel %vm8098_vm7, %v3128_v29, -1e+30 }
 0x2c6   : > { %9100 = vst [vmem:[#allocation22_spill] sm:$0xff] %v8177_v8  ;;  %v3160_v25 = vsel %vm2489_vm0, %v8177_v8, -inf }
 0x2c8   : > { %v2842_v24 = vpop.f32.mrf.mxu1 }
 0x2c9   : > { %v8181_v48 = vsel %vm8034_vm3, %v2842_v24, -1e+30  ;;  %v2962_v4 = vpop.permute.xlu1 %2961 }
 0x2ca   : > { %v2874_v17 = vsel %vm2489_vm0, %v8181_v48, -inf }
 0x2cb   : > { %6076 = vmatmul.msk.f32.gmra.mxu1 %vm2489_vm0, %v3872_v26  ;;  %3161 = vmax.xlane.f32.xlu0 %v3160_v25 }
 0x2cc   : > { %2875 = vmax.xlane.f32.xlu2 %v2874_v17  ;;  %v3131_v43 = vpop.f32.mrf.mxu3 }
 0x2cd   : > { %v8190_v5 = vsel %vm8052_vm4, %v3131_v43, -1e+30  ;;  %v3515_v43 = vpop.permute.xlu2 %3514 }
 0x2ce   : > { %v3163_v11 = vsel %vm2489_vm0, %v8190_v5, -inf }
 0x2cf   : > { %3164 = vmax.xlane.f32.xlu1 %v3163_v11 }
 0x2d0   : > { %v2845_v7 = vpop.f32.mrf.mxu1 }
 0x2d1   : > { %v8196_v32 = vsel %vm8098_vm7, %v2845_v7, -1e+30 }
 0x2d2   : > { %v2877_v54 = vsel %vm2489_vm0, %v8196_v32, -inf }
 0x2d3   : > { %6077 = vmatmul.msk.f32.gmra.mxu1 %vm2489_vm0, %v7939_v53 }
 0x2d4   : > { %v3134_v31 = vpop.f32.mrf.mxu3 }
 0x2d5   : > { %v8202_v16 = vsel %vm8073_vm6, %v3134_v31, -1e+30 }
 0x2d6   : > { %9101 = vst [vmem:[#allocation23_spill] sm:$0xff] %v8202_v16  ;;  %v3166_v56 = vsel %vm2489_vm0, %v8202_v16, -inf }
 0x2d7   : > { %3167 = vmax.xlane.f32.xlu2 %v3166_v56  ;;  %2878 = vmax.xlane.f32.xlu1 %v2877_v54 }
 0x2d8   : > { %v2848_v10 = vpop.f32.mrf.mxu1 }
 0x2d9   : > { %v2964_v30 = vpop.permute.xlu0 %2963  ;;  %v8212_v53 = vsel %vm8052_vm4, %v2848_v10, -1e+30 }
 0x2da   : > { %2985 = vmatpush.bf16.msrb.mxu2 %v2964_v30  ;;  %v2880_v14 = vsel %vm2489_vm0, %v8212_v53, -inf }
 0x2db   : > { %6078 = vmatmul.msk.f32.gmra.mxu1 %vm2489_vm0, %v7944_v22 }
 0x2dc   : > { %v3137_v50 = vpop.f32.mrf.mxu3 }
 0x2dd   : > { %v8216_v3 = vsel %vm8102_vm8, %v3137_v50, -1e+30 }
 0x2de   : > { %9102 = vst [vmem:[#allocation24_spill] sm:$0xff] %v8216_v3  ;;  %2986 = vmatpush.bf16.msrb.mxu2 %v2962_v4  ;;  %v3169_v46 = vsel %vm2489_vm0, %v8216_v3, -inf }
 0x2df   : > { %2881 = vmax.xlane.f32.xlu2 %v2880_v14  ;;  %3170 = vmax.xlane.f32.xlu0 %v3169_v46 }
 0x2e0   : > { %v2851_v22 = vpop.f32.mrf.mxu1 }
 0x2e1   : > { %v8224_v62 = vsel %vm8073_vm6, %v2851_v22, -1e+30  ;;  %v3517_v26 = vpop.permute.xlu0 %3516 }
 0x2e2   : > { %2987 = vmatpush.bf16.msrb.mxu2 %v2960_v61  ;;  %v2883_v13 = vsel %vm2489_vm0, %v8224_v62, -inf }
 0x2e3   : > { %6079 = vmatmul.msk.f32.gmra.mxu1 %vm2489_vm0, %v7957_v15  ;;  %2884 = vmax.xlane.f32.xlu1 %v2883_v13 }
 0x2e4   : > { %v3668_v29 = vpop.f32.mrf.mxu3 }
 0x2e5   : > { %v8232_v24 = vsel %vm8010_vm2, %v3668_v29, -1e+30 }
 0x2e6   : > { %2988 = vmatpush.bf16.msrb.mxu2 %v2958_v60  ;;  %9103 = vst [vmem:[#allocation25_spill] sm:$0xff] %v8232_v24  ;;  %v3700_v15 = vsel %vm2489_vm0, %v8232_v24, -inf }
 0x2e8   : > { %v2854_v17 = vpop.f32.mrf.mxu1 }
 0x2e9   : > { %v8236_v25 = vsel %vm8102_vm8, %v2854_v17, -1e+30 }
 0x2ea   : > { %3538 = vmatpush.bf16.msra.mxu2 %v3517_v26  ;;  %v2886_v11 = vsel %vm2489_vm0, %v8236_v25, -inf }
 0x2eb   : > { %6080 = vmatmul.msk.f32.gmra.mxu1 %vm2489_vm0, %v7972_v19  ;;  %2887 = vmax.xlane.f32.xlu2 %v2886_v11 }
 0x2ec   : > { %3701 = vmax.xlane.f32.xlu1 %v3700_v15 }
 0x2ee   : > { %3539 = vmatpush.bf16.msra.mxu2 %v3515_v43 }
 0x2f0   : > { %v3386_v7 = vpop.f32.mrf.mxu1 }
 0x2f1   : > { %v8269_v43 = vsel %vm8010_vm2, %v3386_v7, -1e+30 }
 0x2f2   : > { %3540 = vmatpush.bf16.msra.mxu2 %v3513_v36  ;;  %v2592_v31 = vpop.xlane.xlu2 %2591 }
 0x2f3   : > { %v2612_v56 = vsub.f32 %v8019_v1, %v2592_v31  ;;  %v3671_v1 = vpop.f32.mrf.mxu3 }
 0x2f4   : > { %v2589_v54 = vpop.xlane.xlu1 %2588  ;;  %v8257_v61 = vsel %vm8004_vm1, %v3671_v1, -1e+30 }
 0x2f5   : > { %v2621_v10 = vmul.f32 1.442695, %v2612_v56  ;;  %v2611_v60 = vsub.f32 %v8023_v55, %v2589_v54  ;;  %9104 = vst [vmem:[#allocation26_spill] sm:$0xff] %v8257_v61  ;;  %v3703_v29 = vsel %vm2489_vm0, %v8257_v61, -inf }
 0x2f6   : > { %3541 = vmatpush.bf16.msra.mxu2 %v3511_v57 }
 0x2f7   : > { %6754 = vpow2.f32 %v2621_v10  ;;  %v2619_v30 = vmul.f32 1.442695, %v2611_v60  ;;  %v3418_v10 = vsel %vm2489_vm0, %v8269_v43, -inf }
 0x2f8   : > { %v3389_v50 = vpop.f32.mrf.mxu1 }
 0x2f9   : > { %6756 = vpow2.f32 %v2619_v30  ;;  %v8261_v13 = vsel %vm8004_vm1, %v3389_v50, -1e+30 }
 0x2fa   : > { %v3421_v26 = vsel %vm2489_vm0, %v8261_v13, -inf }
 0x2fc   : > { %v2598_v19 = vpop.xlane.xlu1 %2597 }
 0x2fd   : > { %v8246_v4 = vpop.eup %6754  ;;  %v2614_v46 = vsub.f32 %v8043_v2, %v2598_v19 }
 0x2fe   : > { %v2638_v14 = vsel %vm2489_vm0, %v8246_v4, 0.0 }
 0x2ff   : > { %v8250_v36 = vpop.eup %6756  ;;  %2639 = vadd.xlane.f32.xlu2 %v2638_v14  ;;  %v2625_v22 = vmul.f32 1.442695, %v2614_v46 }
 0x300   : > { %v3392_v57 = vpop.f32.mrf.mxu1  ;;  %v2635_v55 = vsel %vm2489_vm0, %v8250_v36, 0.0 }
 0x301   : > { %2636 = vadd.xlane.f32.xlu0 %v2635_v55  ;;  %6758 = vpow2.f32 %v2625_v22  ;;  %v8286_v46 = vsel %vm8069_vm5, %v3392_v57, -1e+30 }
 0x304   : > { %v2604_v11 = vpop.xlane.xlu1 %2603 }
 0x305   : > { %v2616_v60 = vsub.f32 %v8061_v20, %v2604_v11 }
 0x307   : > { %3704 = vmax.xlane.f32.xlu2 %v3703_v29  ;;  %v8271_v31 = vpop.eup %6758  ;;  %v2629_v14 = vmul.f32 1.442695, %v2616_v60 }
 0x308   : > { %v3395_v2 = vpop.f32.mrf.mxu1  ;;  %v2644_v7 = vsel %vm2489_vm0, %v8271_v31, 0.0 }
 0x309   : > { %3422 = vmax.xlane.f32.xlu0 %v3421_v26 }
 0x30a   : > { %v2607_v17 = vpop.xlane.xlu2 %2606 }
 0x30b   : > { %v2617_v56 = vsub.f32 %v8088_v51, %v2607_v17  ;;  %v8282_v51 = vsel %vm8034_vm3, %v3395_v2, -1e+30  ;;  %v3424_v2 = vsel %vm2489_vm0, %v8286_v46, -inf }
 0x30c   : > { %v2595_v15 = vpop.xlane.xlu0 %2594  ;;  %v3427_v1 = vsel %vm2489_vm0, %v8282_v51, -inf }
 0x30d   : > { %v2613_v54 = vsub.f32 %v8084_v18, %v2595_v15  ;;  %v2631_v19 = vmul.f32 1.442695, %v2617_v56 }
 0x30f   : > { %v2623_v30 = vmul.f32 1.442695, %v2613_v54  ;;  %3419 = vmax.xlane.f32.xlu2 %v3418_v10 }
 0x310   : > { %v3398_v50 = vpop.f32.mrf.mxu1 }
 0x311   : > { %6760 = vpow2.f32 %v2623_v30  ;;  %2645 = vadd.xlane.f32.xlu0 %v2644_v7 }
 0x312   : > { %6762 = vpow2.f32 %v2631_v19  ;;  %v2610_v57 = vpop.xlane.xlu1 %2609 }
 0x313   : > { %6764 = vpow2.f32 %v2629_v14  ;;  %v2618_v15 = vsub.f32 %v8118_v45, %v2610_v57 }
 0x314   : > { %v2601_v18 = vpop.xlane.xlu0 %2600 }
 0x315   : > { %v2615_v20 = vsub.f32 %v8114_v47, %v2601_v18  ;;  %v2633_v19 = vmul.f32 1.442695, %v2618_v15 }
 0x317   : > { %v8291_v55 = vpop.eup %6760  ;;  %v2627_v22 = vmul.f32 1.442695, %v2615_v20  ;;  %3428 = vmax.xlane.f32.xlu2 %v3427_v1  ;;  %v8318_v20 = vsel %vm8098_vm7, %v3398_v50, -1e+30 }
 0x318   : > { %v3401_v29 = vpop.f32.mrf.mxu1  ;;  %v2641_v26 = vsel %vm2489_vm0, %v8291_v55, 0.0  ;;  %v8297_v47 = vpop.eup %6762  ;;  %v3430_v50 = vsel %vm2489_vm0, %v8318_v20, -inf }
 0x319   : > { %6766 = vpow2.f32 %v2627_v22  ;;  %3425 = vmax.xlane.f32.xlu0 %v3424_v2  ;;  %2642 = vadd.xlane.f32.xlu1 %v2641_v26  ;;  %v8299_v11 = vpop.eup %6764  ;;  %v2653_v54 = vsel %vm2489_vm0, %v8297_v47, 0.0  ;;  %v8322_v22 = vsel %vm8052_vm4, %v3401_v29, -1e+30 }
 0x31a   : > { %v2650_v30 = vsel %vm2489_vm0, %v8299_v11, 0.0  ;;  %6768 = vpow2.f32 %v2633_v19  ;;  %v8342_v19 = vpop.f32.mrf.mxu0 }
 0x31c   : > { %v3150_v17 = vpop.xlane.xlu0 %3149 }
 0x31d   : > { %v3172_v56 = vsub.f32 %v8127_v63, %v3150_v17 }
 0x31f   : > { %v8305_v10 = vpop.eup %6766  ;;  %2654 = vadd.xlane.f32.xlu2 %v2653_v54  ;;  %v3180_v14 = vmul.f32 1.442695, %v3172_v56 }
 0x320   : > { %v3404_v60 = vpop.f32.mrf.mxu1  ;;  %v2647_v7 = vsel %vm2489_vm0, %v8305_v10, 0.0  ;;  %v8330_v57 = vpop.eup %6768 }
 0x321   : > { %2651 = vadd.xlane.f32.xlu0 %v2650_v30  ;;  %2648 = vadd.xlane.f32.xlu1 %v2647_v7  ;;  %v8313_v63 = vsel %vm8073_vm6, %v3404_v60, -1e+30  ;;  %6770 = vpow2.f32 %v3180_v14 }
 0x322   : > { %v3153_v45 = vpop.xlane.xlu2 %3152  ;;  %v3436_v2 = vsel %vm2489_vm0, %v8313_v63, -inf }
 0x323   : > { %v3173_v18 = vsub.f32 %v8136_v21, %v3153_v45  ;;  %v3433_v21 = vsel %vm2489_vm0, %v8322_v22, -inf }
 0x325   : > { %v3182_v1 = vmul.f32 1.442695, %v3173_v18  ;;  %v2656_v18 = vsel %vm2489_vm0, %v8330_v57, 0.0 }
 0x326   : > { %v2867_v29 = vpop.xlane.xlu1 %2866 }
 0x327   : > { %6772 = vpow2.f32 %v3182_v1  ;;  %3437 = vmax.xlane.f32.xlu2 %v3436_v2  ;;  %v8332_v17 = vpop.eup %6770  ;;  %v2889_v30 = vsub.f32 %v8142_v52, %v2867_v29 }
 0x328   : > { %v3407_v26 = vpop.f32.mrf.mxu1  ;;  %v3196_v45 = vsel %vm2489_vm0, %v8332_v17, 0.0 }
 0x329   : > { %3434 = vmax.xlane.f32.xlu0 %v3433_v21  ;;  %3431 = vmax.xlane.f32.xlu1 %v3430_v50  ;;  %v2897_v2 = vmul.f32 1.442695, %v2889_v30  ;;  %v8348_v21 = vpop.f32.mrf.mxu2 }
 0x32a   : > { %v8336_v56 = vpop.xlane.xlu0 %3155 }
 0x32d   : > { %v8334_v15 = vpop.eup %6772 }
 0x32e   : > { %v2870_v54 = vpop.xlane.xlu2 %2869  ;;  %v3199_v60 = vsel %vm2489_vm0, %v8334_v15, 0.0 }
 0x32f   : > { %v2890_v7 = vsub.f32 %v8155_v0, %v2870_v54  ;;  %3200 = vadd.xlane.f32.xlu2 %v3199_v60  ;;  %v8356_v0 = vsel %vm8102_vm8, %v3407_v26, -1e+30 }
 0x330   : > { %v3946_v14 = vpop.f32.mrf.mxu1  ;;  %v3439_v30 = vsel %vm2489_vm0, %v8356_v0, -inf }
 0x331   : > { %v2899_v1 = vmul.f32 1.442695, %v2890_v7  ;;  %3197 = vadd.xlane.f32.xlu1 %v3196_v45  ;;  %2657 = vadd.xlane.f32.xlu0 %v2656_v18  ;;  %v8352_v52 = vsel %vm8010_vm2, %v3946_v14, -1e+30  ;;  %v8365_v14 = vpop.f32.mrf.mxu0  ;;  %v8371_v18 = vpop.f32.mrf.mxu2 }
 0x332   : > { %v3978_v7 = vsel %vm2489_vm0, %v8352_v52, -inf }
 0x333   : > { %6774 = vpow2.f32 %v2899_v1 }
 0x334   : > { %6776 = vpow2.f32 %v2897_v2 }
 0x336   : > { %v2873_v50 = vpop.xlane.xlu0 %2872 }
 0x337   : > { %v2891_v29 = vsub.f32 %v8167_v39, %v2873_v50  ;;  %v3159_v54 = vpop.xlane.xlu2 %3158 }
 0x338   : > { %v3949_v60 = vpop.f32.mrf.mxu1 }
 0x339   : > { %v8363_v45 = vpop.eup %6774  ;;  %v2901_v41 = vmul.f32 1.442695, %v2891_v29  ;;  %3440 = vmax.xlane.f32.xlu1 %v3439_v30  ;;  %3979 = vmax.xlane.f32.xlu0 %v3978_v7  ;;  %v8375_v1 = vsel %vm8004_vm1, %v3949_v60, -1e+30  ;;  %v8388_v24 = vpop.f32.mrf.mxu0 }
 0x33a   : > { %v2916_v26 = vsel %vm2489_vm0, %v8363_v45, 0.0  ;;  %v8369_v39 = vpop.eup %6776 }
 0x33b   : > { %6778 = vpow2.f32 %v2901_v41  ;;  %2917 = vadd.xlane.f32.xlu2 %v2916_v26  ;;  %v2913_v30 = vsel %vm2489_vm0, %v8369_v39, 0.0  ;;  %v3981_v26 = vsel %vm2489_vm0, %v8375_v1, -inf }
 0x33f   : > { %v2876_v2 = vpop.xlane.xlu2 %2875 }
 0x340   : > { %v2892_v50 = vsub.f32 %v8181_v48, %v2876_v2  ;;  %v3952_v29 = vpop.f32.mrf.mxu1  ;;  %v8394_v2 = vpop.f32.mrf.mxu2 }
 0x341   : > { %v8380_v7 = vpop.eup %6778  ;;  %2914 = vadd.xlane.f32.xlu1 %v2913_v30  ;;  %v8392_v48 = vsel %vm8069_vm5, %v3952_v29, -1e+30  ;;  %v8409_v3 = vpop.f32.mrf.mxu0 }
 0x342   : > { %v8382_v41 = vpop.xlane.xlu1 %3164  ;;  %v2919_v49 = vsel %vm2489_vm0, %v8380_v7, 0.0  ;;  %v2903_v60 = vmul.f32 1.442695, %v2892_v50  ;;  %9105 = vst [vmem:[#allocation27_spill] sm:$0xff] %v8392_v48  ;;  %v3984_v16 = vsel %vm2489_vm0, %v8392_v48, -inf  ;;  %v3175_v48 = vsub.f32 %v8163_v40, %v3159_v54 }
 0x343   : > { %3982 = vmax.xlane.f32.xlu2 %v3981_v26  ;;  %2920 = vadd.xlane.f32.xlu0 %v2919_v49  ;;  %v3174_v40 = vsub.f32 %v8149_v27, %v8336_v56 }
 0x344   : > { %6780 = vpow2.f32 %v2903_v60 }
 0x348   : > { %v3955_v30 = vpop.f32.mrf.mxu1  ;;  %v8418_v34 = vpop.f32.mrf.mxu2 }
 0x349   : > { %v8400_v8 = vsel %vm8034_vm3, %v3955_v30, -1e+30  ;;  %3985 = vmax.xlane.f32.xlu1 %v3984_v16  ;;  %v2364_v12 = vpop.f32.mrf.mxu0 }
 0x34a   : > { %9106 = vst [vmem:[#allocation28_spill] sm:$0xff] %v8400_v8  ;;  %v8402_v50 = vpop.xlane.xlu2 %3167  ;;  %v2879_v26 = vpop.xlane.xlu1 %2878  ;;  %v3987_v49 = vsel %vm2489_vm0, %v8400_v8, -inf }
 0x34b   : > { %9107 = vst [vmem:[#allocation29_spill] sm:$0xff] %v8402_v50  ;;  %v2893_v29 = vsub.f32 %v8196_v32, %v2879_v26  ;;  %3988 = vmax.xlane.f32.xlu2 %v3987_v49  ;;  %v8407_v60 = vpop.eup %6780  ;;  %v3186_v32 = vmul.f32 1.442695, %v3175_v48 }
 0x34c   : > { %v2922_v16 = vsel %vm2489_vm0, %v8407_v60, 0.0 }
 0x34d   : > { %v2905_v61 = vmul.f32 1.442695, %v2893_v29 }
 0x34f   : > { %6782 = vpow2.f32 %v2905_v61 }
 0x350   : > { %v3958_v30 = vpop.f32.mrf.mxu1  ;;  %6784 = vpow2.f32 %v3186_v32  ;;  %v2422_v27 = vpop.f32.mrf.mxu2 }
 0x351   : > { %v8416_v50 = vsel %vm8098_vm7, %v3958_v30, -1e+30  ;;  %2923 = vadd.xlane.f32.xlu1 %v2922_v16 }
 0x352   : > { %9108 = vst [vmem:[#allocation30_spill] sm:$0xff] %v8416_v50  ;;  %v2882_v26 = vpop.xlane.xlu2 %2881  ;;  %v3990_v49 = vsel %vm2489_vm0, %v8416_v50, -inf  ;;  %v3184_v50 = vmul.f32 1.442695, %v3174_v40 }
 0x353   : > { %v2894_v29 = vsub.f32 %v8212_v53, %v2882_v26  ;;  %3991 = vmax.xlane.f32.xlu0 %v3990_v49 }
 0x355   : > { %v2907_v61 = vmul.f32 1.442695, %v2894_v29  ;;  %v8425_v54 = vpop.eup %6782 }
 0x356   : > { %v2885_v30 = vpop.xlane.xlu1 %2884  ;;  %v2925_v8 = vsel %vm2489_vm0, %v8425_v54, 0.0  ;;  %v8430_v53 = vpop.eup %6784 }
 0x357   : > { %6786 = vpow2.f32 %v2907_v61  ;;  %v2895_v16 = vsub.f32 %v8224_v62, %v2885_v30  ;;  %v3205_v29 = vsel %vm2489_vm0, %v8430_v53, 0.0  ;;  %v8445_v30 = vpop.xlane.xlu0 %3161 }
 0x358   : > { %v3961_v48 = vpop.f32.mrf.mxu1  ;;  %9109 = vst [vmem:[#allocation31_spill] sm:$0xff] %v8445_v30 }
 0x359   : > { %v2909_v35 = vmul.f32 1.442695, %v2895_v16  ;;  %2926 = vadd.xlane.f32.xlu1 %v2925_v8  ;;  %v2425_v16 = vpop.f32.mrf.mxu2 }
 0x35b   : > { %6788 = vpow2.f32 %v2909_v35  ;;  %v2367_v35 = vpop.f32.mrf.mxu0 }
 0x35c   : > { %6790 = vpow2.f32 %v3184_v50 }
 0x35d   : > { %v8432_v56 = vpop.eup %6786 }
 0x35e   : > { %v2928_v32 = vsel %vm2489_vm0, %v8432_v56, 0.0  ;;  %v2888_v26 = vpop.xlane.xlu2 %2887 }
 0x35f   : > { %2929 = vadd.xlane.f32.xlu0 %v2928_v32  ;;  %v2896_v62 = vsub.f32 %v8236_v25, %v2888_v26  ;;  %v8449_v25 = vsel %vm8052_vm4, %v3961_v48, -1e+30 }
 0x360   : > { %v3964_v49 = vpop.f32.mrf.mxu1  ;;  %9110 = vst [vmem:[#allocation32_spill] sm:$0xff] %v8449_v25 }
 0x361   : > { %v8439_v40 = vpop.eup %6788  ;;  %3206 = vadd.xlane.f32.xlu1 %v3205_v29  ;;  %v2911_v50 = vmul.f32 1.442695, %v2896_v62  ;;  %v8455_v26 = vsel %vm8073_vm6, %v3964_v49, -1e+30  ;;  %v3993_v62 = vsel %vm2489_vm0, %v8449_v25, -inf  ;;  %v2427_v25 = vpop.f32.mrf.mxu2 }
 0x362   : > { %v2931_v8 = vsel %vm2489_vm0, %v8439_v40, 0.0  ;;  %v8443_v61 = vpop.eup %6790  ;;  %9111 = vst [vmem:[#allocation33_spill] sm:$0xff] %v8455_v26 }
 0x363   : > { %2932 = vadd.xlane.f32.xlu2 %v2931_v8  ;;  %v3202_v32 = vsel %vm2489_vm0, %v8443_v61, 0.0  ;;  %6792 = vpow2.f32 %v2911_v50  ;;  %v3996_v8 = vsel %vm2489_vm0, %v8455_v26, -inf  ;;  %v2369_v30 = vpop.f32.mrf.mxu0  ;;  %v8465_v50 = vpop.xlane.xlu0 %3170  ;;  %v2394_v26 = vadd.f32 %v8077_v9, %v2364_v12 }
 0x364   : > { %9113 = vst [vmem:[#allocation35_spill] sm:$0xff] %v8465_v50  ;;  %v2384_v9 = vadd.f32 %v7983_v23, %v8342_v19 }
 0x366   : > { %v2413_v23 = vadd.f32 %v8348_v21, %v2384_v9 }
 0x367   : > { %3203 = vadd.xlane.f32.xlu0 %v3202_v32  ;;  %v2397_v32 = vadd.f32 %v8110_v37, %v2367_v35  ;;  %v2387_v37 = vadd.f32 %v8000_v44, %v8365_v14 }
 0x368   : > { %v3967_v29 = vpop.f32.mrf.mxu1 }
 0x369   : > { %3994 = vmax.xlane.f32.xlu1 %v3993_v62  ;;  %v8463_v48 = vsel %vm8102_vm8, %v3967_v29, -1e+30  ;;  %v8467_v33 = vpop.eup %6792  ;;  %v2399_v62 = vadd.f32 %v8129_v58, %v2369_v30  ;;  %v2392_v29 = vadd.f32 %v8048_v28, %v8409_v3  ;;  %v2426_v42 = vadd.f32 %v2425_v16, %v2397_v32 }
 0x36a   : > { %9112 = vst [vmem:[#allocation34_spill] sm:$0xff] %v8463_v48  ;;  %v3999_v49 = vsel %vm2489_vm0, %v8463_v48, -inf  ;;  %v2934_v59 = vsel %vm2489_vm0, %v8467_v33, 0.0  ;;  %v2389_v58 = vadd.f32 %v8027_v38, %v8388_v24  ;;  %v2416_v12 = vadd.f32 %v8371_v18, %v2387_v37 }
 0x36b   : > { %3997 = vmax.xlane.f32.xlu2 %v3996_v8  ;;  %v2428_v50 = vadd.f32 %v2427_v25, %v2399_v62  ;;  %v2421_v35 = vadd.f32 %v8418_v34, %v2392_v29  ;;  %v2467_v30 = vpack.c.bf16 %v2426_v42, %v2426_v42  ;;  %v2457_v62 = vpack.c.bf16 %v2413_v23, %v2413_v23 }
 0x36c   : > { %v2418_v3 = vadd.f32 %v8394_v2, %v2389_v58  ;;  %v2459_v19 = vpack.c.bf16 %v2416_v12, %v2416_v12  ;;  %v8502_v58 = vpop.xlane.xlu1 %3701 }
 0x36d   : > { %v2463_v14 = vpack.c.bf16 %v2421_v35, %v2421_v35  ;;  %v3806_v24 = vunpack.c.l.b16 %v2467_v30 }
 0x36e   : > { %v2461_v18 = vpack.c.bf16 %v2418_v3, %v2418_v3  ;;  %v3802_v29 = vunpack.c.l.b16 %v2459_v19 }
 0x36f   : > { %4000 = vmax.xlane.f32.xlu0 %v3999_v49  ;;  %v2469_v49 = vpack.c.bf16 %v2428_v50, %v2428_v50  ;;  %v3804_v2 = vunpack.c.l.b16 %v2463_v14 }
 0x370   : > { %v3803_v21 = vunpack.c.l.b16 %v2461_v18 }
 0x371   : > { %2935 = vadd.xlane.f32.xlu1 %v2934_v59  ;;  %v2423_v59 = vadd.f32 %v2422_v27, %v2394_v26  ;;  %v3807_v34 = vunpack.c.l.b16 %v2469_v49 }
 0x372   : > { %v2640_v8 = vpop.xlane.xlu2 %2639 }
 0x373   : > { %6794 = vrcp.f32 %v2640_v8  ;;  %v2465_v38 = vpack.c.bf16 %v2423_v59, %v2423_v59 }
 0x374   : > { %v2637_v48 = vpop.xlane.xlu0 %2636 }
 0x375   : > { %6796 = vrcp.f32 %v2637_v48  ;;  %v3805_v50 = vunpack.c.l.b16 %v2465_v38 }
 0x377   : > { %v8500_v37 = vpack.c.b16 %v3805_v50, %v3804_v2 }
 0x379   : > { %v6795_v28 = vpop.eup %6794 }
 0x37a   : > { %v2668_v25 = vmul.f32 %v6795_v28, %v8246_v4  ;;  %v8488_v16 = vpop.xlane.xlu2 %3704  ;;  %v8493_v4 = vpack.c.b16 %v3807_v34, %v3806_v24  ;;  %v3801_v28 = vunpack.c.l.b16 %v2457_v62 }
 0x37b   : > { %v6797_v44 = vpop.eup %6796 }
 0x37c   : > { %v2667_v42 = vmul.f32 %v6797_v44, %v8250_v36  ;;  %v3423_v27 = vpop.xlane.xlu0 %3422  ;;  %v2455_v36 = vpack.c.bf16 %v7976_v6, %v7976_v6  ;;  %v8507_v6 = vpack.c.b16 %v3803_v21, %v3802_v29 }
 0x37d   : > { %v3443_v26 = vsub.f32 %v8261_v13, %v3423_v27 }
 0x37e   : > { %v2675_v48 = vpack.c.bf16 %v2668_v25, %v2667_v42  ;;  %v3800_v49 = vunpack.c.l.b16 %v2455_v36 }
 0x37f   : > { %v3452_v32 = vmul.f32 1.442695, %v3443_v26 }
 0x380   : > { %5981 = vmatmul.msk.bf16.vlgmr.msrb.gmra.mxu0 %vm2489_vm0, %v2675_v48  ;;  %v8513_v3 = vpack.c.b16 %v3801_v28, %v3800_v49 }
 0x381   : > { %6798 = vpow2.f32 %v3452_v32  ;;  %3832 = vmatpush.bf16.msrb.mxu0 %v8493_v4 }
 0x382   : > { %v3420_v13 = vpop.xlane.xlu2 %3419 }
 0x383   : > { %v3442_v8 = vsub.f32 %v8269_v43, %v3420_v13 }
 0x384   : > { %v2646_v35 = vpop.xlane.xlu0 %2645 }
 0x385   : > { %v3450_v59 = vmul.f32 1.442695, %v3442_v8  ;;  %3833 = vmatpush.bf16.msrb.mxu0 %v8500_v37 }
 0x387   : > { %v8505_v30 = vpop.eup %6798  ;;  %6800 = vpow2.f32 %v3450_v59 }
 0x388   : > { %v3469_v9 = vsel %vm2489_vm0, %v8505_v30, 0.0  ;;  %6802 = vrcp.f32 %v2646_v35 }
 0x389   : > { %3834 = vmatpush.bf16.msrb.mxu0 %v8507_v6  ;;  %3470 = vadd.xlane.f32.xlu1 %v3469_v9 }
 0x38a   : > { %v3429_v43 = vpop.xlane.xlu2 %3428 }
 0x38b   : > { %v3445_v12 = vsub.f32 %v8282_v51, %v3429_v43 }
 0x38c   : > { %v3426_v25 = vpop.xlane.xlu0 %3425  ;;  %v2643_v44 = vpop.xlane.xlu1 %2642 }
 0x38d   : > { %v8515_v14 = vpop.eup %6800  ;;  %v3456_v38 = vmul.f32 1.442695, %v3445_v12  ;;  %3835 = vmatpush.bf16.msrb.mxu0 %v8513_v3  ;;  %v3444_v24 = vsub.f32 %v8286_v46, %v3426_v25  ;;  %6804 = vrcp.f32 %v2643_v44 }
 0x38e   : > { %v3466_v34 = vsel %vm2489_vm0, %v8515_v14, 0.0  ;;  %v6803_v27 = vpop.eup %6802 }
 0x38f   : > { %6806 = vpow2.f32 %v3456_v38  ;;  %v3454_v42 = vmul.f32 1.442695, %v3444_v24  ;;  %3467 = vadd.xlane.f32.xlu2 %v3466_v34  ;;  %v2670_v23 = vmul.f32 %v6803_v27, %v8271_v31 }
 0x391   : > { %6808 = vpow2.f32 %v3454_v42 }
 0x392   : > { %v2655_v26 = vpop.xlane.xlu2 %2654 }
 0x393   : > { %v6805_v51 = vpop.eup %6804 }
 0x394   : > { %v2669_v19 = vmul.f32 %v6805_v51, %v8291_v55  ;;  %v2652_v18 = vpop.xlane.xlu0 %2651  ;;  %v2649_v48 = vpop.xlane.xlu1 %2648 }
 0x395   : > { %v8523_v2 = vpop.eup %6806  ;;  %6810 = vrcp.f32 %v2652_v18 }
 0x396   : > { %v3475_v46 = vsel %vm2489_vm0, %v8523_v2, 0.0  ;;  %v2676_v50 = vpack.c.bf16 %v2670_v23, %v2669_v19  ;;  %6812 = vrcp.f32 %v2649_v48 }
 0x397   : > { %v8527_v32 = vpop.eup %6808  ;;  %3476 = vadd.xlane.f32.xlu2 %v3475_v46 }
 0x398   : > { %5982 = vmatmul.msk.bf16.gmra.mxu0 %vm2489_vm0, %v2676_v50  ;;  %v3472_v36 = vsel %vm2489_vm0, %v8527_v32, 0.0 }
 0x399   : > { %3473 = vadd.xlane.f32.xlu0 %v3472_v36 }
 0x39a   : > { %v3438_v21 = vpop.xlane.xlu2 %3437 }
 0x39b   : > { %v6811_v29 = vpop.eup %6810 }
 0x39c   : > { %v3435_v31 = vpop.xlane.xlu0 %3434  ;;  %v3432_v55 = vpop.xlane.xlu1 %3431  ;;  %v2672_v49 = vmul.f32 %v6811_v29, %v8299_v11 }
 0x39d   : > { %v3447_v62 = vsub.f32 %v8322_v22, %v3435_v31  ;;  %v3446_v13 = vsub.f32 %v8318_v20, %v3432_v55  ;;  %v6813_v8 = vpop.eup %6812 }
 0x39e   : > { %v2671_v28 = vmul.f32 %v6813_v8, %v8305_v10 }
 0x39f   : > { %v3460_v35 = vmul.f32 1.442695, %v3447_v62  ;;  %v3458_v59 = vmul.f32 1.442695, %v3446_v13 }
 0x3a0   : > { %v2677_v12 = vpack.c.bf16 %v2672_v49, %v2671_v28 }
 0x3a1   : > { %6814 = vpow2.f32 %v3460_v35 }
 0x3a2   : > { %6816 = vpow2.f32 %v3458_v59  ;;  %v3201_v22 = vpop.xlane.xlu2 %3200 }
 0x3a4   : > { %v3198_v9 = vpop.xlane.xlu1 %3197  ;;  %v2658_v43 = vpop.xlane.xlu0 %2657 }
 0x3a5   : > { %6818 = vrcp.f32 %v2658_v43 }
 0x3a6   : > { %6820 = vrcp.f32 %v2655_v26 }
 0x3a7   : > { %v8536_v25 = vpop.eup %6814 }
 0x3a8   : > { %v8538_v44 = vpop.eup %6816  ;;  %5983 = vmatmul.msk.bf16.gmra.mxu0 %vm2489_vm0, %v2677_v12  ;;  %v3481_v20 = vsel %vm2489_vm0, %v8536_v25, 0.0 }
 0x3a9   : > { %3482 = vadd.xlane.f32.xlu1 %v3481_v20  ;;  %v3478_v11 = vsel %vm2489_vm0, %v8538_v44, 0.0 }
 0x3aa   : > { %3479 = vadd.xlane.f32.xlu0 %v3478_v11 }
 0x3ab   : > { %v6819_v24 = vpop.eup %6818 }
 0x3ac   : > { %v3441_v10 = vpop.xlane.xlu1 %3440  ;;  %v6821_v27 = vpop.eup %6820  ;;  %v2674_v51 = vmul.f32 %v6819_v24, %v8330_v57 }
 0x3ad   : > { %v3449_v38 = vsub.f32 %v8356_v0, %v3441_v10  ;;  %v2673_v23 = vmul.f32 %v6821_v27, %v8297_v47  ;;  %v3980_v0 = vpop.xlane.xlu0 %3979 }
 0x3ae   : > { %v2918_v42 = vpop.xlane.xlu2 %2917 }
 0x3af   : > { %v3464_v34 = vmul.f32 1.442695, %v3449_v38  ;;  %4074 = vrot.lane.b32.xlu2 %v8500_v37, %s7151_s21  ;;  %v2678_v18 = vpack.c.bf16 %v2674_v51, %v2673_v23 }
 0x3b1   : > { %6822 = vpow2.f32 %v3464_v34 }
 0x3b2   : > { %6824 = vrcp.f32 %v2918_v42 }
 0x3b4   : > { %v2915_v19 = vpop.xlane.xlu1 %2914 }
 0x3b5   : > { %6826 = vrcp.f32 %v2915_v19 }
 0x3b6   : > { %6828 = vrcp.f32 %v3201_v22  ;;  %v2921_v62 = vpop.xlane.xlu0 %2920  ;;  %v3983_v43 = vpop.xlane.xlu2 %3982 }
 0x3b7   : > { %v8550_v26 = vpop.eup %6822  ;;  %6830 = vrcp.f32 %v3198_v9 }
 0x3b8   : > { %5984 = vmatmul.msk.bf16.gmra.mxu0 %vm2489_vm0, %v2678_v18  ;;  %v6825_v48 = vpop.eup %6824  ;;  %v3487_v37 = vsel %vm2489_vm0, %v8550_v26, 0.0  ;;  %6832 = vrcp.f32 %v2921_v62 }
 0x3b9   : > { %3488 = vadd.xlane.f32.xlu0 %v3487_v37  ;;  %v2946_v46 = vmul.f32 %v6825_v48, %v8363_v45  ;;  %v3448_v45 = vsub.f32 %v8313_v63, %v3438_v21  ;;  %v3674_v37 = vpop.f32.mrf.mxu3 }
 0x3bb   : > { %v6827_v57 = vpop.eup %6826  ;;  %v3462_v59 = vmul.f32 1.442695, %v3448_v45 }
 0x3bc   : > { %v2945_v47 = vmul.f32 %v6827_v57, %v8369_v39  ;;  %v8557_v50 = vpop.xlane.xlu1 %3985  ;;  %v6829_v36 = vpop.eup %6828 }
 0x3bd   : > { %v6831_v55 = vpop.eup %6830  ;;  %v3229_v13 = vmul.f32 %v6829_v36, %v8334_v15  ;;  %v8595_v36 = vsel %vm8069_vm5, %v3674_v37, -1e+30  ;;  %v9122_v37 = vld [vmem:[#allocation26_spill] sm:$0xff] }
 0x3be   : > { %v2953_v31 = vpack.c.bf16 %v2946_v46, %v2945_v47  ;;  %v3228_v29 = vmul.f32 %v6831_v55, %v8332_v17  ;;  %v6833_v35 = vpop.eup %6832  ;;  %v4003_v46 = vsub.f32 %v8375_v1, %v3983_v43  ;;  %v3706_v55 = vsel %vm2489_vm0, %v8595_v36, -inf }
 0x3bf   : > { %v2947_v15 = vmul.f32 %v6833_v35, %v8380_v7  ;;  %v9116_v35 = vld [vmem:[#allocation28_spill] sm:$0xff] }
 0x3c0   : > { %6001 = vmatmul.msk.bf16.vlgmr.msrb.gmra.mxu2 %vm2489_vm0, %v2953_v31  ;;  %v3236_v39 = vpack.c.bf16 %v3229_v13, %v3228_v29 }
 0x3c2   : > { %4076 = vrot.lane.b32.xlu1 %v8493_v4, %s7151_s21  ;;  %v4002_v4 = vsub.f32 %v8352_v52, %v3980_v0  ;;  %v3989_v52 = vpop.xlane.xlu2 %3988 }
 0x3c4   : > { %v2924_v8 = vpop.xlane.xlu1 %2923  ;;  %v4010_v21 = vmul.f32 1.442695, %v4002_v4 }
 0x3c5   : > { %6834 = vrcp.f32 %v2924_v8  ;;  %v3677_v8 = vpop.f32.mrf.mxu3 }
 0x3c6   : > { %v8566_v49 = vpop.xlane.xlu0 %3991  ;;  %6836 = vpow2.f32 %v3462_v59 }
 0x3c8   : > { %6021 = vmatmul.msk.bf16.vlgmr.msra.gmra.mxu0 %vm2489_vm0, %v3236_v39 }
 0x3cb   : > { %v6835_v28 = vpop.eup %6834 }
 0x3cc   : > { %v2948_v17 = vmul.f32 %v6835_v28, %v8407_v60  ;;  %v2927_v9 = vpop.xlane.xlu1 %2926  ;;  %v8574_v22 = vpop.eup %6836 }
 0x3cd   : > { %4072 = vrot.lane.b32.xlu0 %v8507_v6, %s7151_s21  ;;  %6838 = vrcp.f32 %v2927_v9  ;;  %v3484_v60 = vsel %vm2489_vm0, %v8574_v22, 0.0  ;;  %v3680_v28 = vpop.f32.mrf.mxu3 }
 0x3ce   : > { %v2954_v63 = vpack.c.bf16 %v2948_v17, %v2947_v15  ;;  %v9117_v15 = vld [vmem:[#allocation35_spill] sm:$0xff]  ;;  %v9118_v17 = vld [vmem:[#allocation24_spill] sm:$0xff] }
 0x3cf   : > { %v3179_v9 = vsub.f32 %v9118_v17, %v9117_v15 }
 0x3d0   : > { %6002 = vmatmul.msk.bf16.gmra.mxu2 %vm2489_vm0, %v2954_v63 }
 0x3d2   : > { %v2930_v12 = vpop.xlane.xlu0 %2929 }
 0x3d3   : > { %6840 = vrcp.f32 %v2930_v12  ;;  %v6839_v20 = vpop.eup %6838  ;;  %v8625_v12 = vsel %vm8034_vm3, %v3677_v8, -1e+30 }
 0x3d4   : > { %v3207_v7 = vpop.xlane.xlu1 %3206  ;;  %6842 = vpow2.f32 %v4010_v21  ;;  %v2949_v24 = vmul.f32 %v6839_v20, %v8425_v54 }
 0x3d5   : > { %6844 = vrcp.f32 %v3207_v7 }
 0x3d6   : > { %v2933_v23 = vpop.xlane.xlu2 %2932 }
 0x3d8   : > { %3485 = vadd.xlane.f32.xlu2 %v3484_v60  ;;  %v3194_v60 = vmul.f32 1.442695, %v3179_v9  ;;  %v9129_v9 = vld [vmem:[#allocation33_spill] sm:$0xff] }
 0x3d9   : > { %v6841_v11 = vpop.eup %6840 }
 0x3da   : > { %v2950_v6 = vmul.f32 %v6841_v11, %v8432_v56  ;;  %v3204_v10 = vpop.xlane.xlu0 %3203  ;;  %v8579_v38 = vpop.eup %6842  ;;  %v3177_v56 = vsub.f32 %v8190_v5, %v8382_v41  ;;  %v4012_v5 = vmul.f32 1.442695, %v4003_v46  ;;  %v9115_v41 = vld [vmem:[#allocation27_spill] sm:$0xff]  ;;  %v8632_v11 = vsel %vm8098_vm7, %v3680_v28, -1e+30 }
 0x3db   : > { %6846 = vrcp.f32 %v3204_v10  ;;  %v6845_v27 = vpop.eup %6844  ;;  %v4026_v51 = vsel %vm2489_vm0, %v8579_v38, 0.0  ;;  %v3683_v10 = vpop.f32.mrf.mxu3  ;;  %v9128_v28 = vld [vmem:[#allocation23_spill] sm:$0xff] }
 0x3dc   : > { %v8582_v34 = vpop.xlane.xlu1 %3994  ;;  %v2955_v42 = vpack.c.bf16 %v2950_v6, %v2949_v24  ;;  %v3231_v18 = vmul.f32 %v6845_v27, %v8430_v53  ;;  %6848 = vrcp.f32 %v2933_v23  ;;  %v3190_v57 = vmul.f32 1.442695, %v3177_v56 }
 0x3dd   : > { %v4004_v53 = vsub.f32 %v9115_v41, %v8557_v50  ;;  %v3712_v24 = vsel %vm2489_vm0, %v8632_v11, -inf }
 0x3de   : > { %v8619_v43 = vpop.xlane.xlu2 %3997 }
 0x3df   : > { %v4014_v13 = vmul.f32 1.442695, %v4004_v53 }
 0x3e0   : > { %6003 = vmatmul.msk.bf16.gmra.mxu2 %vm2489_vm0, %v2955_v42  ;;  %4027 = vadd.xlane.f32.xlu2 %v4026_v51  ;;  %v9121_v51 = vld [vmem:[#allocation30_spill] sm:$0xff] }
 0x3e1   : > { %v6847_v19 = vpop.eup %6846  ;;  %v4006_v23 = vsub.f32 %v9121_v51, %v8566_v49 }
 0x3e2   : > { %v3230_v0 = vmul.f32 %v6847_v19, %v8443_v61  ;;  %v6849_v31 = vpop.eup %6848  ;;  %v8638_v27 = vpop.xlane.xlu0 %4000 }
 0x3e3   : > { %v2951_v62 = vmul.f32 %v6849_v31, %v8439_v40  ;;  %v4005_v40 = vsub.f32 %v9116_v35, %v3989_v52 }
 0x3e4   : > { %v2936_v54 = vpop.xlane.xlu1 %2935  ;;  %v3237_v48 = vpack.c.bf16 %v3231_v18, %v3230_v0 }
 0x3e5   : > { %6850 = vrcp.f32 %v2936_v54  ;;  %v4016_v4 = vmul.f32 1.442695, %v4005_v40 }
 0x3e6   : > { %6022 = vmatmul.msk.bf16.gmra.mxu0 %vm2489_vm0, %v3237_v48  ;;  %6852 = vpow2.f32 %v3190_v57  ;;  %v4018_v48 = vmul.f32 1.442695, %v4006_v23  ;;  %v3725_v57 = vsub.f32 %v9122_v37, %v8488_v16  ;;  %v9124_v16 = vld [vmem:[#allocation31_spill] sm:$0xff] }
 0x3e7   : > { %6854 = vpow2.f32 %v4012_v5 }
 0x3e8   : > { %6856 = vpow2.f32 %v4014_v13 }
 0x3e9   : > { %6858 = vpow2.f32 %v4016_v4  ;;  %v4008_v4 = vsub.f32 %v9129_v9, %v8619_v43 }
 0x3eb   : > { %v6851_v61 = vpop.eup %6850 }
 0x3ec   : > { %v2952_v1 = vmul.f32 %v6851_v61, %v8467_v33  ;;  %3707 = vmax.xlane.f32.xlu1 %v3706_v55  ;;  %v8603_v45 = vpop.eup %6852  ;;  %v8655_v61 = vsel %vm8052_vm4, %v3683_v10, -1e+30  ;;  %v3686_v55 = vpop.f32.mrf.mxu3 }
 0x3ed   : > { %v3211_v50 = vsel %vm2489_vm0, %v8603_v45, 0.0  ;;  %v8608_v39 = vpop.eup %6854 }
 0x3ee   : > { %v2956_v29 = vpack.c.bf16 %v2952_v1, %v2951_v62  ;;  %v4029_v33 = vsel %vm2489_vm0, %v8608_v39, 0.0  ;;  %v8613_v59 = vpop.eup %6856  ;;  %v3734_v62 = vmul.f32 1.442695, %v3725_v57  ;;  %v3715_v1 = vsel %vm2489_vm0, %v8655_v61, -inf }
 0x3ef   : > { %v4032_v63 = vsel %vm2489_vm0, %v8613_v59, 0.0  ;;  %v8636_v42 = vpop.eup %6858 }
 0x3f0   : > { %6004 = vmatmul.msk.bf16.gmra.mxu2 %vm2489_vm0, %v2956_v29  ;;  %v4035_v18 = vsel %vm2489_vm0, %v8636_v42, 0.0  ;;  %v8664_v29 = vsel %vm8073_vm6, %v3686_v55, -1e+30 }
 0x3f1   : > { %v3718_v35 = vsel %vm2489_vm0, %v8664_v29, -inf }
 0x3f4   : > { %3212 = vadd.xlane.f32.xlu1 %v3211_v50  ;;  %v3689_v52 = vpop.f32.mrf.mxu3 }
 0x3f7   : > { %4030 = vadd.xlane.f32.xlu0 %v4029_v33  ;;  %v9127_v33 = vld [vmem:[#allocation29_spill] sm:$0xff] }
 0x3f8   : > { %4070 = vrot.lane.b32.xlu2 %v8513_v3, %s7151_s21  ;;  %v3709_v3 = vsel %vm2489_vm0, %v8625_v12, -inf  ;;  %v3178_v15 = vsub.f32 %v9128_v28, %v9127_v33 }
 0x3fc   : > { %4033 = vadd.xlane.f32.xlu1 %v4032_v63  ;;  %v3471_v20 = vpop.xlane.xlu1 %3470 }
 0x3fd   : > { %v2724_v7 = vpop.f32.mrf.mxu0  ;;  %6860 = vrcp.f32 %v3471_v20 }
 0x3fe   : > { %2744 = vst.msk [vmem:[#allocation2] sm:$0xff] %vm2489_vm0, %v2724_v7  ;;  %6862 = vpow2.f32 %v3194_v60  ;;  %v3192_v60 = vmul.f32 1.442695, %v3178_v15 }
 0x3ff   : > { %3710 = vmax.xlane.f32.xlu0 %v3709_v3 }
 0x402   : > { %v3468_v6 = vpop.xlane.xlu2 %3467 }
 0x403   : > { %6864 = vrcp.f32 %v3468_v6  ;;  %v6861_v56 = vpop.eup %6860  ;;  %v4022_v6 = vmul.f32 1.442695, %v4008_v4 }
 0x404   : > { %3713 = vmax.xlane.f32.xlu1 %v3712_v24  ;;  %v8645_v0 = vpop.eup %6862  ;;  %v3499_v46 = vmul.f32 %v6861_v56, %v8505_v30  ;;  %6866 = vpow2.f32 %v4018_v48  ;;  %v9125_v30 = vld [vmem:[#allocation22_spill] sm:$0xff]  ;;  %v8685_v24 = vsel %vm8102_vm8, %v3689_v52, -1e+30 }
 0x405   : > { %v2726_v19 = vpop.f32.mrf.mxu0  ;;  %v3217_v31 = vsel %vm2489_vm0, %v8645_v0, 0.0 }
 0x406   : > { %2745 = vst.msk [vmem:[#allocation2 + $0x18] sm:$0xff] %vm2489_vm0, %v2726_v19 }
 0x407   : > { %4036 = vadd.xlane.f32.xlu0 %v4035_v18 }
 0x409   : > { %v6865_v54 = vpop.eup %6864 }
 0x40a   : > { %v3498_v47 = vmul.f32 %v6865_v54, %v8515_v14  ;;  %v3477_v49 = vpop.xlane.xlu2 %3476  ;;  %v3176_v14 = vsub.f32 %v9125_v30, %v9124_v16  ;;  %v8666_v8 = vpop.eup %6866  ;;  %v3721_v54 = vsel %vm2489_vm0, %v8685_v24, -inf }
 0x40b   : > { %6868 = vrcp.f32 %v3477_v49  ;;  %v4038_v21 = vsel %vm2489_vm0, %v8666_v8, 0.0 }
 0x40c   : > { %v3506_v5 = vpack.c.bf16 %v3499_v46, %v3498_v47  ;;  %v3474_v41 = vpop.xlane.xlu0 %3473  ;;  %3218 = vadd.xlane.f32.xlu1 %v3217_v31  ;;  %v3188_v50 = vmul.f32 1.442695, %v3176_v14 }
 0x40d   : > { %6870 = vrcp.f32 %v3474_v41 }
 0x40e   : > { %6041 = vmatmul.msk.bf16.vlgmr.msra.gmra.mxu2 %vm2489_vm0, %v3506_v5  ;;  %6872 = vpow2.f32 %v3734_v62 }
 0x40f   : > { %3716 = vmax.xlane.f32.xlu0 %v3715_v1  ;;  %6874 = vpow2.f32 %v3188_v50 }
 0x410   : > { %6876 = vpow2.f32 %v3192_v60 }
 0x411   : > { %v6869_v40 = vpop.eup %6868  ;;  %6878 = vpow2.f32 %v4022_v6 }
 0x412   : > { %v3501_v20 = vmul.f32 %v6869_v40, %v8523_v2  ;;  %v4075_v33 = vpop.permute.xlu2 %4074 }
 0x413   : > { %v6871_v17 = vpop.eup %6870 }
 0x414   : > { %3719 = vmax.xlane.f32.xlu1 %v3718_v35  ;;  %v8677_v7 = vpop.eup %6872  ;;  %v3500_v3 = vmul.f32 %v6871_v17, %v8527_v32  ;;  %v9131_v32 = vld [vmem:[#allocation32_spill] sm:$0xff] }
 0x415   : > { %v2729_v63 = vpop.f32.mrf.mxu0  ;;  %v3751_v43 = vsel %vm2489_vm0, %v8677_v7, 0.0  ;;  %v8687_v19 = vpop.eup %6874  ;;  %v4007_v18 = vsub.f32 %v9131_v32, %v8582_v34  ;;  %v9132_v34 = vld [vmem:[#allocation25_spill] sm:$0xff] }
 0x416   : > { %2746 = vst.msk [vmem:[#allocation2 + $0x30] sm:$0xff] %vm2489_vm0, %v2729_v63  ;;  %v3507_v23 = vpack.c.bf16 %v3501_v20, %v3500_v3  ;;  %v3208_v48 = vsel %vm2489_vm0, %v8687_v19, 0.0  ;;  %v8697_v37 = vpop.eup %6876  ;;  %v3724_v5 = vsub.f32 %v9132_v34, %v8502_v58  ;;  %v9133_v58 = vld [vmem:[#allocation34_spill] sm:$0xff] }
 0x417   : > { %4039 = vadd.xlane.f32.xlu0 %v4038_v21  ;;  %v8699_v57 = vpop.eup %6878  ;;  %v4020_v46 = vmul.f32 1.442695, %v4007_v18  ;;  %v3214_v62 = vsel %vm2489_vm0, %v8697_v37, 0.0 }
 0x418   : > { %v4044_v41 = vsel %vm2489_vm0, %v8699_v57, 0.0  ;;  %v3732_v16 = vmul.f32 1.442695, %v3724_v5 }
 0x41c   : > { %3752 = vadd.xlane.f32.xlu1 %v3751_v43  ;;  %v3483_v51 = vpop.xlane.xlu1 %3482 }
 0x41d   : > { %v3480_v2 = vpop.xlane.xlu0 %3479  ;;  %v2731_v56 = vpop.f32.mrf.mxu0  ;;  %6880 = vrcp.f32 %v3483_v51 }
 0x41e   : > { %2747 = vst.msk [vmem:[#allocation2 + $0x48] sm:$0xff] %vm2489_vm0, %v2731_v56  ;;  %6042 = vmatmul.msk.bf16.gmra.mxu2 %vm2489_vm0, %v3507_v23  ;;  %6882 = vrcp.f32 %v3480_v2 }
 0x41f   : > { %3722 = vmax.xlane.f32.xlu0 %v3721_v54  ;;  %6884 = vpow2.f32 %v4020_v46 }
 0x420   : > { %6886 = vpow2.f32 %v3732_v16 }
 0x421   : > { %3209 = vadd.xlane.f32.xlu2 %v3208_v48 }
 0x423   : > { %v6881_v47 = vpop.eup %6880 }
 0x424   : > { %v6883_v49 = vpop.eup %6882  ;;  %v3503_v55 = vmul.f32 %v6881_v47, %v8536_v25 }
 0x425   : > { %v2734_v31 = vpop.f32.mrf.mxu0  ;;  %v3502_v53 = vmul.f32 %v6883_v49, %v8538_v44  ;;  %v8710_v14 = vpop.eup %6884  ;;  %v4009_v44 = vsub.f32 %v9133_v58, %v8638_v27 }
 0x426   : > { %2748 = vst.msk [vmem:[#allocation2 + $0x60] sm:$0xff] %vm2489_vm0, %v2734_v31  ;;  %v4041_v25 = vsel %vm2489_vm0, %v8710_v14, 0.0  ;;  %v8718_v35 = vpop.eup %6886 }
 0x427   : > { %4045 = vadd.xlane.f32.xlu0 %v4044_v41  ;;  %v3508_v30 = vpack.c.bf16 %v3503_v55, %v3502_v53  ;;  %v4024_v13 = vmul.f32 1.442695, %v4009_v44  ;;  %v3748_v15 = vsel %vm2489_vm0, %v8718_v35, 0.0 }
 0x429   : > { %3215 = vadd.xlane.f32.xlu2 %v3214_v62  ;;  %6888 = vpow2.f32 %v4024_v13 }
 0x42c   : > { %v3489_v28 = vpop.xlane.xlu0 %3488 }
 0x42d   : > { %v2736_v1 = vpop.f32.mrf.mxu0  ;;  %6890 = vrcp.f32 %v3489_v28 }
 0x42e   : > { %2749 = vst.msk [vmem:[#allocation2 + $0x78] sm:$0xff] %vm2489_vm0, %v2736_v1  ;;  %6043 = vmatmul.msk.bf16.gmra.mxu2 %vm2489_vm0, %v3508_v30 }
 0x42f   : > { %v8723_v27 = vpop.eup %6888 }
 0x430   : > { %v4047_v4 = vsel %vm2489_vm0, %v8723_v27, 0.0 }
 0x431   : > { %4042 = vadd.xlane.f32.xlu2 %v4041_v25 }
 0x433   : > { %v6891_v20 = vpop.eup %6890 }
 0x434   : > { %v4077_v50 = vpop.permute.xlu1 %4076  ;;  %v3505_v52 = vmul.f32 %v6891_v20, %v8550_v26 }
 0x435   : > { %v2739_v40 = vpop.f32.mrf.mxu0  ;;  %4098 = vmatpush.bf16.msrb.mxu2 %v4077_v50 }
 0x436   : > { %2750 = vst.msk [vmem:[#allocation2 + $0x90] sm:$0xff] %vm2489_vm0, %v2739_v40 }
 0x439   : > { %4099 = vmatpush.bf16.msrb.mxu2 %v4075_v33  ;;  %3749 = vadd.xlane.f32.xlu2 %v3748_v15 }
 0x43d   : > { %v2741_v17 = vpop.f32.mrf.mxu0 }
 0x43e   : > { %2751 = vst.msk [vmem:[#allocation2 + $0xa8] sm:$0xff] %vm2489_vm0, %v2741_v17 }
 0x43f   : > { %v4073_v9 = vpop.permute.xlu0 %4072 }
 0x440   : > { %4100 = vmatpush.bf16.msrb.mxu2 %v4073_v9 }
 0x441   : > { %4048 = vadd.xlane.f32.xlu2 %v4047_v4 }
 0x443   : > { %v8733_v2 = vpop.f32.mrf.mxu2 }
 0x445   : > { %v3277_v63 = vpop.f32.mrf.mxu0 }
 0x446   : > { %3297 = vst.msk [vmem:[#allocation2 + $0x8] sm:$0xff] %vm2489_vm0, %v3277_v63 }
 0x44b   : > { %v3486_v21 = vpop.xlane.xlu2 %3485 }
 0x44c   : > { %6892 = vrcp.f32 %v3486_v21 }
 0x44d   : > { %v3279_v60 = vpop.f32.mrf.mxu0 }
 0x44e   : > { %3298 = vst.msk [vmem:[#allocation2 + $0x20] sm:$0xff] %vm2489_vm0, %v3279_v60 }
 0x452   : > { %v6893_v3 = vpop.eup %6892 }
 0x453   : > { %v3504_v6 = vmul.f32 %v6893_v3, %v8574_v22  ;;  %v4028_v43 = vpop.xlane.xlu2 %4027  ;;  %v8739_v22 = vpop.f32.mrf.mxu2 }
 0x455   : > { %v3509_v10 = vpack.c.bf16 %v3505_v52, %v3504_v6 }
 0x457   : > { %6044 = vmatmul.msk.bf16.gmra.mxu2 %vm2489_vm0, %v3509_v10 }
 0x45b   : > { %v4071_v51 = vpop.permute.xlu2 %4070  ;;  %v8746_v53 = vpop.f32.mrf.mxu2 }
 0x45c   : > { %4101 = vmatpush.bf16.msrb.mxu2 %v4071_v51 }
 0x45f   : > { %v3708_v23 = vpop.xlane.xlu1 %3707 }
 0x460   : > { %v3726_v56 = vsub.f32 %v8595_v36, %v3708_v23 }
 0x462   : > { %v3736_v32 = vmul.f32 1.442695, %v3726_v56 }
 0x463   : > { %v3282_v18 = vpop.f32.mrf.mxu0 }
 0x464   : > { %6894 = vpow2.f32 %v3736_v32  ;;  %3299 = vst.msk [vmem:[#allocation2 + $0x38] sm:$0xff] %vm2489_vm0, %v3282_v18 }
 0x465   : > { %6896 = vrcp.f32 %v4028_v43 }
 0x467   : > { %v3213_v54 = vpop.xlane.xlu1 %3212 }
 0x46a   : > { %v8737_v26 = vpop.eup %6894  ;;  %v4031_v48 = vpop.xlane.xlu0 %4030 }
 0x46b   : > { %v3754_v46 = vsel %vm2489_vm0, %v8737_v26, 0.0  ;;  %6898 = vrcp.f32 %v4031_v48  ;;  %v3284_v47 = vpop.f32.mrf.mxu0  ;;  %v6897_v49 = vpop.eup %6896 }
 0x46c   : > { %3755 = vadd.xlane.f32.xlu1 %v3754_v46  ;;  %3300 = vst.msk [vmem:[#allocation2 + $0x50] sm:$0xff] %vm2489_vm0, %v3284_v47  ;;  %v4058_v34 = vmul.f32 %v6897_v49, %v8579_v38 }
 0x46f   : > { %v4034_v36 = vpop.xlane.xlu1 %4033 }
 0x471   : > { %v6899_v31 = vpop.eup %6898 }
 0x472   : > { %v4059_v5 = vmul.f32 %v6899_v31, %v8608_v39  ;;  %v3711_v41 = vpop.xlane.xlu0 %3710  ;;  %v8753_v39 = vpop.f32.mrf.mxu2 }
 0x473   : > { %v3727_v55 = vsub.f32 %v8625_v12, %v3711_v41 }
 0x474   : > { %v4066_v62 = vpack.c.bf16 %v4059_v5, %v4058_v34 }
 0x475   : > { %v3738_v16 = vmul.f32 1.442695, %v3727_v55 }
 0x476   : > { %6081 = vmatmul.msk.bf16.vlgmr.msrb.gmra.mxu2 %vm2489_vm0, %v4066_v62 }
 0x477   : > { %v3714_v30 = vpop.xlane.xlu1 %3713  ;;  %6900 = vpow2.f32 %v3738_v16 }
 0x478   : > { %v3728_v1 = vsub.f32 %v8632_v11, %v3714_v30  ;;  %6902 = vrcp.f32 %v4034_v36 }
 0x47a   : > { %v3740_v58 = vmul.f32 1.442695, %v3728_v1  ;;  %v4037_v44 = vpop.xlane.xlu0 %4036  ;;  %v3000_v21 = vpop.f32.mrf.mxu2 }
 0x47c   : > { %6904 = vpow2.f32 %v3740_v58 }
 0x47d   : > { %6906 = vrcp.f32 %v4037_v44  ;;  %v8751_v38 = vpop.eup %6900 }
 0x47e   : > { %v3757_v12 = vsel %vm2489_vm0, %v8751_v38, 0.0  ;;  %v6903_v13 = vpop.eup %6902 }
 0x47f   : > { %v3219_v25 = vpop.xlane.xlu1 %3218  ;;  %3758 = vadd.xlane.f32.xlu0 %v3757_v12  ;;  %v4060_v28 = vmul.f32 %v6903_v13, %v8613_v59 }
 0x482   : > { %v8757_v50 = vpop.eup %6904  ;;  %v3717_v33 = vpop.xlane.xlu0 %3716 }
 0x483   : > { %v6907_v40 = vpop.eup %6906  ;;  %v3760_v11 = vsel %vm2489_vm0, %v8757_v50, 0.0  ;;  %v3729_v17 = vsub.f32 %v8655_v61, %v3717_v33  ;;  %v8772_v61 = vpop.f32.mrf.mxu2 }
 0x484   : > { %v4061_v15 = vmul.f32 %v6907_v40, %v8636_v42  ;;  %3761 = vadd.xlane.f32.xlu2 %v3760_v11 }
 0x485   : > { %v3742_v9 = vmul.f32 1.442695, %v3729_v17 }
 0x486   : > { %v4067_v4 = vpack.c.bf16 %v4061_v15, %v4060_v28  ;;  %v6614_v28 = vld [vmem:[#allocation8 + $0xb0] sm:$0xf0]  ;;  %v6613_v15 = vld [vmem:[#allocation8 + $0xac] sm:$0xf] }
 0x487   : > { %v3720_v63 = vpop.xlane.xlu1 %3719  ;;  %6908 = vpow2.f32 %v3742_v9  ;;  %v6173_v9 = vld [vmem:[#allocation8 + $0xb4] sm:$0xf0] }
 0x488   : > { %6082 = vmatmul.msk.bf16.gmra.mxu2 %vm2489_vm0, %v4067_v4  ;;  %v3730_v60 = vsub.f32 %v8664_v29, %v3720_v63  ;;  %v6176_v4 = vor.u32 %v6613_v15, %v6173_v9  ;;  %v6592_v9 = vld [vmem:[#allocation8 + $0x4] sm:$0xf] }
 0x48a   : > { %v3744_v20 = vmul.f32 1.442695, %v3730_v60  ;;  %v4040_v3 = vpop.xlane.xlu0 %4039  ;;  %4774 = vmatpush.bf16.msra.mxu2 %v6176_v4  ;;  %v6611_v60 = vld [vmem:[#allocation8 + $0x98] sm:$0xf0]  ;;  %v6089_v4 = vld [vmem:[#allocation8 + $0xc] sm:$0xf0] }
 0x48b   : > { %v3005_v18 = vpop.f32.mrf.mxu2 }
 0x48c   : > { %6910 = vpow2.f32 %v3744_v20  ;;  %v6610_v20 = vld [vmem:[#allocation8 + $0x94] sm:$0xf] }
 0x48d   : > { %v8766_v52 = vpop.eup %6908  ;;  %6912 = vrcp.f32 %v3213_v54 }
 0x48e   : > { %v3763_v59 = vsel %vm2489_vm0, %v8766_v52, 0.0 }
 0x48f   : > { %3764 = vadd.xlane.f32.xlu1 %v3763_v59  ;;  %v6161_v59 = vld [vmem:[#allocation8 + $0x9c] sm:$0xf0] }
 0x492   : > { %v8770_v42 = vpop.eup %6910  ;;  %v3723_v6 = vpop.xlane.xlu0 %3722 }
 0x493   : > { %v3766_v43 = vsel %vm2489_vm0, %v8770_v42, 0.0  ;;  %v3731_v29 = vsub.f32 %v8685_v24, %v3723_v6  ;;  %v6913_v23 = vpop.eup %6912  ;;  %v3007_v49 = vpop.f32.mrf.mxu2  ;;  %v6147_v6 = vld [vmem:[#allocation8 + $0x78] sm:$0xf] }
 0x494   : > { %3767 = vadd.xlane.f32.xlu0 %v3766_v43  ;;  %v3210_v10 = vpop.xlane.xlu2 %3209  ;;  %v3233_v32 = vmul.f32 %v6913_v23, %v8603_v45  ;;  %v6608_v43 = vld [vmem:[#allocation8 + $0x80] sm:$0xf0] }
 0x495   : > { %6914 = vrcp.f32 %v3210_v10  ;;  %v3746_v51 = vmul.f32 1.442695, %v3731_v29  ;;  %v6607_v29 = vld [vmem:[#allocation8 + $0x7c] sm:$0xf]  ;;  %v6148_v10 = vor.u32 %v6608_v43, %v6147_v6  ;;  %v6231_v43 = vld [vmem:[#allocation8 + $0x120] sm:$0xf] }
 0x497   : > { %6916 = vpow2.f32 %v3746_v51  ;;  %v6149_v51 = vld [vmem:[#allocation8 + $0x84] sm:$0xf0] }
 0x49a   : > { %v4046_v44 = vpop.xlane.xlu0 %4045 }
 0x49b   : > { %v6915_v56 = vpop.eup %6914  ;;  %v3543_v30 = vpop.f32.mrf.mxu2 }
 0x49c   : > { %v3232_v48 = vmul.f32 %v6915_v56, %v8687_v19  ;;  %v3216_v46 = vpop.xlane.xlu2 %3215  ;;  %v6152_v56 = vor.u32 %v6607_v29, %v6149_v51  ;;  %v6629_v29 = vld [vmem:[#allocation8 + $0x128] sm:$0xf0] }
 0x49d   : > { %v8779_v54 = vpop.eup %6916  ;;  %6918 = vrcp.f32 %v3216_v46  ;;  %v6232_v51 = vor.u32 %v6629_v29, %v6231_v43  ;;  %v6233_v43 = vld [vmem:[#allocation8 + $0x12c] sm:$0xf0]  ;;  %v6239_v29 = vld [vmem:[#allocation8 + $0x128] sm:$0xf] }
 0x49e   : > { %v3238_v47 = vpack.c.bf16 %v3233_v32, %v3232_v48  ;;  %v3769_v36 = vsel %vm2489_vm0, %v8779_v54, 0.0  ;;  %6920 = vrcp.f32 %v3219_v25  ;;  %v6135_v32 = vld [vmem:[#allocation8 + $0x60] sm:$0xf]  ;;  %v6604_v48 = vld [vmem:[#allocation8 + $0x64] sm:$0xf] }
 0x49f   : > { %3770 = vadd.xlane.f32.xlu2 %v3769_v36  ;;  %6922 = vrcp.f32 %v4040_v3  ;;  %v6137_v36 = vld [vmem:[#allocation8 + $0x6c] sm:$0xf0] }
 0x4a0   : > { %6023 = vmatmul.msk.bf16.gmra.mxu0 %vm2489_vm0, %v3238_v47 }
 0x4a3   : > { %v6919_v45 = vpop.eup %6918 }
 0x4a4   : > { %v4043_v24 = vpop.xlane.xlu2 %4042  ;;  %v6921_v31 = vpop.eup %6920  ;;  %v3234_v34 = vmul.f32 %v6919_v45, %v8697_v37  ;;  %v6123_v45 = vld [vmem:[#allocation8 + $0x48] sm:$0xf] }
 0x4a5   : > { %6924 = vrcp.f32 %v4043_v24  ;;  %v6923_v19 = vpop.eup %6922  ;;  %v3235_v41 = vmul.f32 %v6921_v31, %v8645_v0  ;;  %v3545_v37 = vpop.f32.mrf.mxu2  ;;  %v6602_v31 = vld [vmem:[#allocation8 + $0x50] sm:$0xf0] }
 0x4a6   : > { %v4062_v55 = vmul.f32 %v6923_v19, %v8666_v8  ;;  %v6601_v19 = vld [vmem:[#allocation8 + $0x4c] sm:$0xf] }
 0x4a7   : > { %v3239_v1 = vpack.c.bf16 %v3235_v41, %v3234_v34  ;;  %v6124_v34 = vor.u32 %v6602_v31, %v6123_v45 }
 0x4a8   : > { %3020 = vrot.lane.b32.xlu0 %v8739_v22, %s7151_s21  ;;  %3018 = vrot.lane.b32.xlu1 %v8733_v2, %s7151_s21  ;;  %v3753_v2 = vpop.xlane.xlu1 %3752 }
 0x4ab   : > { %v6925_v5 = vpop.eup %6924 }
 0x4ac   : > { %v4063_v62 = vmul.f32 %v6925_v5, %v8710_v14  ;;  %v3750_v16 = vpop.xlane.xlu2 %3749  ;;  %v6125_v5 = vld [vmem:[#allocation8 + $0x54] sm:$0xf0] }
 0x4ad   : > { %6926 = vrcp.f32 %v3750_v16  ;;  %v6128_v41 = vor.u32 %v6601_v19, %v6125_v5  ;;  %v6599_v16 = vld [vmem:[#allocation8 + $0x38] sm:$0xf0]  ;;  %v6620_v19 = vld [vmem:[#allocation8 + $0xe0] sm:$0xf0]  ;;  %v6183_v5 = vld [vmem:[#allocation8 + $0xc0] sm:$0xf] }
 0x4ae   : > { %v4068_v58 = vpack.c.bf16 %v4063_v62, %v4062_v55  ;;  %6928 = vrcp.f32 %v4046_v44  ;;  %v6111_v62 = vld [vmem:[#allocation8 + $0x30] sm:$0xf] }
 0x4af   : > { %6930 = vrcp.f32 %v3753_v2  ;;  %v6112_v44 = vor.u32 %v6599_v16, %v6111_v62  ;;  %v6113_v2 = vld [vmem:[#allocation8 + $0x3c] sm:$0xf0] }
 0x4b0   : > { %3024 = vrot.lane.b32.xlu0 %v8753_v39, %s7151_s21  ;;  %6024 = vmatmul.msk.bf16.gmra.mxu0 %vm2489_vm0, %v3239_v1 }
 0x4b1   : > { %3026 = vrot.lane.b32.xlu1 %v3000_v21, %s7151_s21  ;;  %6083 = vmatmul.msk.bf16.gmra.mxu2 %vm2489_vm0, %v4068_v58  ;;  %v6159_v21 = vld [vmem:[#allocation8 + $0x90] sm:$0xf] }
 0x4b2   : > { %v6160_v3 = vor.u32 %v6611_v60, %v6159_v21  ;;  %v6092_v60 = vor.u32 %v6592_v9, %v6089_v4 }
 0x4b3   : > { %v6927_v8 = vpop.eup %6926 }
 0x4b4   : > { %v4049_v0 = vpop.xlane.xlu2 %4048  ;;  %v6929_v14 = vpop.eup %6928  ;;  %v3780_v12 = vmul.f32 %v6927_v8, %v8718_v35 }
 0x4b5   : > { %6932 = vrcp.f32 %v4049_v0  ;;  %v6931_v22 = vpop.eup %6930  ;;  %v4064_v25 = vmul.f32 %v6929_v14, %v8699_v57 }
 0x4b6   : > { %v3781_v40 = vmul.f32 %v6931_v22, %v8677_v7  ;;  %v6099_v22 = vld [vmem:[#allocation8 + $0x18] sm:$0xf] }
 0x4b7   : > { %3022 = vrot.lane.b32.xlu2 %v8746_v53, %s7151_s21  ;;  %v3548_v53 = vpop.f32.mrf.mxu2 }
 0x4b8   : > { %3030 = vrot.lane.b32.xlu0 %v3005_v18, %s7151_s21  ;;  %v3788_v11 = vpack.c.bf16 %v3781_v40, %v3780_v12  ;;  %v6605_v18 = vld [vmem:[#allocation8 + $0x68] sm:$0xf0]  ;;  %v6267_v12 = vld [vmem:[#allocation8 + $0x168] sm:$0xf]  ;;  %v6595_v40 = vld [vmem:[#allocation8 + $0x1c] sm:$0xf] }
 0x4b9   : > { %3032 = vrot.lane.b32.xlu1 %v3007_v49, %s7151_s21  ;;  %v6136_v47 = vor.u32 %v6605_v18, %v6135_v32  ;;  %v6140_v49 = vor.u32 %v6604_v48, %v6137_v36  ;;  %v6219_v48 = vld [vmem:[#allocation8 + $0x108] sm:$0xf] }
 0x4bb   : > { %v6933_v39 = vpop.eup %6932 }
 0x4bc   : > { %v4065_v13 = vmul.f32 %v6933_v39, %v8723_v27  ;;  %v6171_v27 = vld [vmem:[#allocation8 + $0xa8] sm:$0xf]  ;;  %v6596_v39 = vld [vmem:[#allocation8 + $0x20] sm:$0xf0] }
 0x4bd   : > { %v6172_v17 = vor.u32 %v6614_v28, %v6171_v27  ;;  %v6087_v27 = vld [vmem:[#allocation8] sm:$0xf]  ;;  %v6255_v28 = vld [vmem:[#allocation8 + $0x150] sm:$0xf] }
 0x4be   : > { %v4069_v33 = vpack.c.bf16 %v4065_v13, %v4064_v25  ;;  %v6100_v25 = vor.u32 %v6596_v39, %v6099_v22  ;;  %v6638_v13 = vld [vmem:[#allocation8 + $0x170] sm:$0xf0]  ;;  %v6637_v39 = vld [vmem:[#allocation8 + $0x16c] sm:$0xf] }
 0x4bf   : > { %3028 = vrot.lane.b32.xlu2 %v8772_v61, %s7151_s21  ;;  %v8812_v57 = vpop.f32.mrf.mxu2  ;;  %4687 = vmatpush.bf16.msrb.mxu3 %v6172_v17  ;;  %v6164_v61 = vor.u32 %v6610_v20, %v6161_v59  ;;  %v6635_v17 = vld [vmem:[#allocation8 + $0x158] sm:$0xf0]  ;;  %v6243_v59 = vld [vmem:[#allocation8 + $0x138] sm:$0xf] }
 0x4c0   : > { %3573 = vrot.lane.b32.xlu0 %v3545_v37, %s7151_s21  ;;  %6061 = vmatmul.msk.bf16.vlgmr.msrb.gmra.mxu0 %vm2489_vm0, %v3788_v11  ;;  %v6256_v21 = vor.u32 %v6635_v17, %v6255_v28 }
 0x4c1   : > { %6084 = vmatmul.msk.bf16.gmra.mxu2 %vm2489_vm0, %v4069_v33  ;;  %v6101_v33 = vld [vmem:[#allocation8 + $0x24] sm:$0xf0] }
 0x4c2   : > { %4775 = vmatpush.bf16.msra.mxu2 %v6164_v61  ;;  %v6632_v61 = vld [vmem:[#allocation8 + $0x140] sm:$0xf0] }
 0x4c3   : > { %4688 = vmatpush.bf16.msrb.mxu3 %v6160_v3  ;;  %v6244_v6 = vor.u32 %v6632_v61, %v6243_v59  ;;  %v6633_v59 = vld [vmem:[#allocation8 + $0x148] sm:$0xf0] }
 0x4c6   : > { %4776 = vmatpush.bf16.msra.mxu2 %v6152_v56 }
 0x4c7   : > { %3571 = vrot.lane.b32.xlu2 %v3543_v30, %s7151_s21  ;;  %v8814_v35 = vpop.f32.mrf.mxu2  ;;  %4689 = vmatpush.bf16.msrb.mxu3 %v6148_v10  ;;  %v6598_v30 = vld [vmem:[#allocation8 + $0x34] sm:$0xf] }
 0x4c8   : > { %3575 = vrot.lane.b32.xlu0 %v3548_v53, %s7151_s21  ;;  %v6116_v37 = vor.u32 %v6598_v30, %v6113_v2  ;;  %v6268_v53 = vor.u32 %v6638_v13, %v6267_v12  ;;  %v6269_v12 = vld [vmem:[#allocation8 + $0x174] sm:$0xf0]  ;;  %v6275_v13 = vld [vmem:[#allocation8 + $0x170] sm:$0xf] }
 0x4ca   : > { %4777 = vmatpush.bf16.msra.mxu2 %v6140_v49  ;;  %4716 = vmatpush.bf16.msra.mxu0 %v6268_v53  ;;  %v6623_v49 = vld [vmem:[#allocation8 + $0xf8] sm:$0xf0]  ;;  %v6257_v53 = vld [vmem:[#allocation8 + $0x15c] sm:$0xf0] }
 0x4cb   : > { %4690 = vmatpush.bf16.msrb.mxu3 %v6136_v47  ;;  %v6626_v47 = vld [vmem:[#allocation8 + $0x110] sm:$0xf0] }
 0x4cc   : > { %v6220_v36 = vor.u32 %v6626_v47, %v6219_v48 }
 0x4ce   : > { %4778 = vmatpush.bf16.msra.mxu2 %v6128_v41  ;;  %4717 = vmatpush.bf16.msra.mxu0 %v6256_v21  ;;  %v6617_v41 = vld [vmem:[#allocation8 + $0xc8] sm:$0xf0]  ;;  %v6631_v21 = vld [vmem:[#allocation8 + $0x13c] sm:$0xf] }
 0x4cf   : > { %v8816_v7 = vpop.f32.mrf.mxu2  ;;  %4691 = vmatpush.bf16.msrb.mxu3 %v6124_v34  ;;  %v6184_v62 = vor.u32 %v6617_v41, %v6183_v5  ;;  %v6209_v5 = vld [vmem:[#allocation8 + $0xfc] sm:$0xf0]  ;;  %v6215_v41 = vld [vmem:[#allocation8 + $0xf8] sm:$0xf] }
 0x4d2   : > { %4779 = vmatpush.bf16.msra.mxu2 %v6116_v37  ;;  %4718 = vmatpush.bf16.msra.mxu0 %v6244_v6  ;;  %v6628_v6 = vld [vmem:[#allocation8 + $0x124] sm:$0xf] }
 0x4d3   : > { %4692 = vmatpush.bf16.msrb.mxu3 %v6112_v44 }
 0x4d6   : > { %4719 = vmatpush.bf16.msra.mxu0 %v6232_v51  ;;  %v6630_v51 = vld [vmem:[#allocation8 + $0x130] sm:$0xf0] }
 0x4d7   : > { %4693 = vmatpush.bf16.msrb.mxu3 %v6100_v25  ;;  %v6272_v25 = vor.u32 %v6637_v39, %v6269_v12  ;;  %v6621_v39 = vld [vmem:[#allocation8 + $0xe8] sm:$0xf0]  ;;  %v6339_v12 = vld [vmem:[#allocation8 + $0x1f8] sm:$0xf] }
 0x4da   : > { %v8818_v63 = vpop.f32.mrf.mxu2  ;;  %4720 = vmatpush.bf16.msra.mxu0 %v6220_v36  ;;  %v6625_v36 = vld [vmem:[#allocation8 + $0x10c] sm:$0xf] }
 0x4df   : > { %v3756_v23 = vpop.xlane.xlu1 %3755 }
 0x4e0   : > { %6934 = vrcp.f32 %v3756_v23 }
 0x4e2   : > { %v8820_v46 = vpop.f32.mrf.mxu2 }
 0x4e6   : > { %v6935_v55 = vpop.eup %6934 }
 0x4e7   : > { %v3782_v0 = vmul.f32 %v6935_v55, %v8737_v26  ;;  %v6104_v26 = vor.u32 %v6595_v40, %v6101_v33  ;;  %v6639_v40 = vld [vmem:[#allocation8 + $0x178] sm:$0xf0] }
 0x4e8   : > { %v6276_v33 = vor.u32 %v6639_v40, %v6275_v13 }
 0x4e9   : > { %4780 = vmatpush.bf16.msra.mxu2 %v6104_v26  ;;  %v6263_v26 = vld [vmem:[#allocation8 + $0x158] sm:$0xf] }
 0x4ed   : > { %4781 = vmatpush.bf16.msra.mxu2 %v6092_v60  ;;  %v6245_v60 = vld [vmem:[#allocation8 + $0x144] sm:$0xf0] }
 0x4f1   : > { %4890 = vmatpush.bf16.msrb.mxu2 %v6276_v33  ;;  %v6616_v33 = vld [vmem:[#allocation8 + $0xc4] sm:$0xf] }
 0x4f2   : > { %v3759_v24 = vpop.xlane.xlu0 %3758 }
 0x4f3   : > { %6936 = vrcp.f32 %v3759_v24  ;;  %v6207_v24 = vld [vmem:[#allocation8 + $0xf0] sm:$0xf] }
 0x4f7   : > { %v3762_v11 = vpop.xlane.xlu2 %3761 }
 0x4f8   : > { %6938 = vrcp.f32 %v3762_v11  ;;  %v6634_v11 = vld [vmem:[#allocation8 + $0x154] sm:$0xf] }
 0x4f9   : > { %v6937_v1 = vpop.eup %6936  ;;  %v4103_v58 = vpop.f32.mrf.mxu2 }
 0x4fa   : > { %v3783_v8 = vmul.f32 %v6937_v1, %v8751_v38  ;;  %4131 = vrot.lane.b32.xlu1 %v4103_v58, %s7151_s21  ;;  %v6593_v38 = vld [vmem:[#allocation8 + $0x8] sm:$0xf0] }
 0x4fb   : > { %v6088_v15 = vor.u32 %v6593_v38, %v6087_v27  ;;  %v6260_v27 = vor.u32 %v6634_v11, %v6257_v53  ;;  %v6636_v38 = vld [vmem:[#allocation8 + $0x160] sm:$0xf0]  ;;  %v6185_v11 = vld [vmem:[#allocation8 + $0xcc] sm:$0xf0]  ;;  %v6191_v53 = vld [vmem:[#allocation8 + $0xc8] sm:$0xf] }
 0x4fc   : > { %v3789_v14 = vpack.c.bf16 %v3783_v8, %v3782_v0  ;;  %v6264_v28 = vor.u32 %v6636_v38, %v6263_v26  ;;  %v6618_v26 = vld [vmem:[#allocation8 + $0xd0] sm:$0xf0]  ;;  %v6653_v38 = vld [vmem:[#allocation8 + $0x1e8] sm:$0xf0] }
 0x4fd   : > { %4694 = vmatpush.bf16.msrb.mxu3 %v6088_v15 }
 0x4fe   : > { %6062 = vmatmul.msk.bf16.gmra.mxu0 %vm2489_vm0, %v3789_v14  ;;  %v6939_v10 = vpop.eup %6938  ;;  %4891 = vmatpush.bf16.msrb.mxu2 %v6264_v28 }
 0x4ff   : > { %v3784_v56 = vmul.f32 %v6939_v10, %v8757_v50  ;;  %v6208_v50 = vor.u32 %v6623_v49, %v6207_v24  ;;  %v6236_v10 = vor.u32 %v6628_v6, %v6233_v43  ;;  %v6221_v24 = vld [vmem:[#allocation8 + $0x114] sm:$0xf0]  ;;  %v6227_v49 = vld [vmem:[#allocation8 + $0x110] sm:$0xf]  ;;  %v6647_v6 = vld [vmem:[#allocation8 + $0x1b8] sm:$0xf0] }
 0x501   : > { %v4105_v20 = vpop.f32.mrf.mxu2  ;;  %4721 = vmatpush.bf16.msra.mxu0 %v6208_v50  ;;  %4803 = vmatpush.bf16.msra.mxu3 %v6272_v25  ;;  %v6627_v50 = vld [vmem:[#allocation8 + $0x118] sm:$0xf0]  ;;  %v6656_v25 = vld [vmem:[#allocation8 + $0x200] sm:$0xf0] }
 0x502   : > { %3577 = vrot.lane.b32.xlu1 %v8812_v57, %s7151_s21  ;;  %4133 = vrot.lane.b32.xlu2 %v4105_v20, %s7151_s21  ;;  %v3765_v3 = vpop.xlane.xlu1 %3764  ;;  %v6248_v20 = vor.u32 %v6631_v21, %v6245_v60  ;;  %v6340_v40 = vor.u32 %v6656_v25, %v6339_v12 }
 0x503   : > { %6940 = vrcp.f32 %v3765_v3  ;;  %v6251_v3 = vld [vmem:[#allocation8 + $0x140] sm:$0xf] }
 0x504   : > { %v6252_v61 = vor.u32 %v6633_v59, %v6251_v3  ;;  %v6650_v3 = vld [vmem:[#allocation8 + $0x1d0] sm:$0xf0] }
 0x505   : > { %4804 = vmatpush.bf16.msra.mxu3 %v6260_v27  ;;  %v6327_v27 = vld [vmem:[#allocation8 + $0x1e0] sm:$0xf] }
 0x506   : > { %4892 = vmatpush.bf16.msrb.mxu2 %v6252_v61  ;;  %v6303_v61 = vld [vmem:[#allocation8 + $0x1b0] sm:$0xf] }
 0x507   : > { %v3768_v45 = vpop.xlane.xlu0 %3767 }
 0x508   : > { %6942 = vrcp.f32 %v3768_v45  ;;  %v6224_v45 = vor.u32 %v6625_v36, %v6221_v24 }
 0x509   : > { %v6941_v23 = vpop.eup %6940  ;;  %4805 = vmatpush.bf16.msra.mxu3 %v6248_v20  ;;  %v6315_v20 = vld [vmem:[#allocation8 + $0x1c8] sm:$0xf] }
 0x50a   : > { %v3785_v57 = vmul.f32 %v6941_v23, %v8766_v52  ;;  %3579 = vrot.lane.b32.xlu1 %v8814_v35, %s7151_s21  ;;  %v6195_v35 = vld [vmem:[#allocation8 + $0xd8] sm:$0xf]  ;;  %v6240_v23 = vor.u32 %v6630_v51, %v6239_v29  ;;  %v6316_v59 = vor.u32 %v6650_v3, %v6315_v20  ;;  %v6304_v29 = vor.u32 %v6647_v6, %v6303_v61  ;;  %v6644_v51 = vld [vmem:[#allocation8 + $0x1a0] sm:$0xf0]  ;;  %v6329_v6 = vld [vmem:[#allocation8 + $0x1ec] sm:$0xf0] }
 0x50b   : > { %v4108_v32 = vpop.f32.mrf.mxu2  ;;  %v6196_v34 = vor.u32 %v6620_v19, %v6195_v35  ;;  %v6662_v35 = vld [vmem:[#allocation8 + $0x230] sm:$0xf0]  ;;  %v6652_v61 = vld [vmem:[#allocation8 + $0x1e4] sm:$0xf] }
 0x50c   : > { %4135 = vrot.lane.b32.xlu2 %v4108_v32, %s7151_s21  ;;  %v3790_v18 = vpack.c.bf16 %v3785_v57, %v3784_v56  ;;  %4893 = vmatpush.bf16.msrb.mxu2 %v6240_v23  ;;  %v6622_v19 = vld [vmem:[#allocation8 + $0xf4] sm:$0xf] }
 0x50d   : > { %4722 = vmatpush.bf16.msra.mxu0 %v6196_v34  ;;  %4806 = vmatpush.bf16.msra.mxu3 %v6236_v10  ;;  %v6291_v10 = vld [vmem:[#allocation8 + $0x198] sm:$0xf] }
 0x50e   : > { %6063 = vmatmul.msk.bf16.gmra.mxu0 %vm2489_vm0, %v3790_v18  ;;  %v6943_v55 = vpop.eup %6942  ;;  %v6292_v23 = vor.u32 %v6644_v51, %v6291_v10  ;;  %v6332_v10 = vor.u32 %v6652_v61, %v6329_v6 }
 0x50f   : > { %v3786_v1 = vmul.f32 %v6943_v55, %v8770_v42  ;;  %v6624_v55 = vld [vmem:[#allocation8 + $0x100] sm:$0xf0] }
 0x511   : > { %4723 = vmatpush.bf16.msra.mxu0 %v6184_v62  ;;  %4807 = vmatpush.bf16.msra.mxu3 %v6224_v45  ;;  %v6212_v62 = vor.u32 %v6622_v19, %v6209_v5 }
 0x512   : > { %v3771_v31 = vpop.xlane.xlu2 %3770 }
 0x513   : > { %v4110_v52 = vpop.f32.mrf.mxu2  ;;  %6944 = vrcp.f32 %v3771_v31  ;;  %v6363_v31 = vld [vmem:[#allocation8 + $0x228] sm:$0xf] }
 0x514   : > { %3581 = vrot.lane.b32.xlu2 %v8816_v7, %s7151_s21  ;;  %4137 = vrot.lane.b32.xlu0 %v4110_v52, %s7151_s21  ;;  %v6228_v52 = vor.u32 %v6627_v50, %v6227_v49  ;;  %v6364_v34 = vor.u32 %v6662_v35, %v6363_v31 }
 0x515   : > { %4808 = vmatpush.bf16.msra.mxu3 %v6212_v62 }
 0x516   : > { %4894 = vmatpush.bf16.msrb.mxu2 %v6228_v52  ;;  %4745 = vmatpush.bf16.msra.mxu1 %v6364_v34 }
 0x519   : > { %v6945_v16 = vpop.eup %6944 }
 0x51a   : > { %v3021_v30 = vpop.permute.xlu0 %3020  ;;  %v3787_v58 = vmul.f32 %v6945_v16, %v8779_v54  ;;  %v3023_v7 = vpop.permute.xlu2 %3022  ;;  %v6351_v16 = vld [vmem:[#allocation8 + $0x210] sm:$0xf] }
 0x51b   : > { %3044 = vst.msk [vmem:[#allocation2 + $0x18] sm:$0xff] %vm3042_vm9, %v3021_v30  ;;  %v3019_v44 = vpop.permute.xlu1 %3018  ;;  %v6659_v30 = vld [vmem:[#allocation8 + $0x218] sm:$0xf0] }
 0x51c   : > { %3583 = vrot.lane.b32.xlu2 %v8818_v63, %s7151_s21  ;;  %3045 = vst.msk [vmem:[#allocation2 + $0x30] sm:$0xff] %vm3042_vm9, %v3023_v7  ;;  %v3791_v0 = vpack.c.bf16 %v3787_v58, %v3786_v1 }
 0x51d   : > { %3043 = vst.msk [vmem:[#allocation2] sm:$0xff] %vm3042_vm9, %v3019_v44  ;;  %v3287_v2 = vpop.f32.mrf.mxu0  ;;  %v6216_v44 = vor.u32 %v6624_v55, %v6215_v41 }
 0x51e   : > { %3301 = vst.msk [vmem:[#allocation2 + $0x68] sm:$0xff] %vm2489_vm0, %v3287_v2  ;;  %6064 = vmatmul.msk.bf16.gmra.mxu0 %vm2489_vm0, %v3791_v0  ;;  %v6352_v0 = vor.u32 %v6659_v30, %v6351_v16 }
 0x51f   : > { %4895 = vmatpush.bf16.msrb.mxu2 %v6216_v44  ;;  %v6365_v44 = vld [vmem:[#allocation8 + $0x234] sm:$0xf0] }
 0x520   : > { %4746 = vmatpush.bf16.msra.mxu1 %v6352_v0 }
 0x522   : > { %v3025_v42 = vpop.permute.xlu0 %3024  ;;  %v4166_v54 = vld [vmem:[#allocation2 + $0x18] sm:$0xff]  ;;  %v3029_v8 = vpop.permute.xlu2 %3028 }
 0x523   : > { %3046 = vst.msk [vmem:[#allocation2 + $0x48] sm:$0xff] %vm3042_vm9, %v3025_v42  ;;  %v3027_v37 = vpop.permute.xlu1 %3026  ;;  %v4169_v18 = vld [vmem:[#allocation2 + $0x30] sm:$0xff] }
 0x524   : > { %3048 = vst.msk [vmem:[#allocation2 + $0x78] sm:$0xff] %vm3042_vm9, %v3029_v8  ;;  %v4163_v63 = vld [vmem:[#allocation2] sm:$0xff]  ;;  %v6197_v8 = vld [vmem:[#allocation8 + $0xe4] sm:$0xf0]  ;;  %4747 = vmatpush.bf16.msra.mxu1 %v6340_v40  ;;  %v6658_v40 = vld [vmem:[#allocation8 + $0x214] sm:$0xf] }
 0x525   : > { %3047 = vst.msk [vmem:[#allocation2 + $0x60] sm:$0xff] %vm3042_vm9, %v3027_v37  ;;  %v8850_v14 = vpack.c.bf16 %v4166_v54, %v4163_v63  ;;  %v3289_v22 = vpop.f32.mrf.mxu0  ;;  %v6619_v54 = vld [vmem:[#allocation8 + $0xdc] sm:$0xf]  ;;  %v6203_v37 = vld [vmem:[#allocation8 + $0xe0] sm:$0xf] }
 0x526   : > { %3302 = vst.msk [vmem:[#allocation2 + $0x80] sm:$0xff] %vm2489_vm0, %v3289_v22  ;;  %v6200_v22 = vor.u32 %v6619_v54, %v6197_v8  ;;  %v6204_v13 = vor.u32 %v6621_v39, %v6203_v37  ;;  %v6179_v54 = vld [vmem:[#allocation8 + $0xb0] sm:$0xf]  ;;  %v6615_v8 = vld [vmem:[#allocation8 + $0xb8] sm:$0xf0] }
 0x527   : > { %4695 = vmatmul.bf16.vlgmr.msrb.gmra.mxu3 %v8850_v14  ;;  %4782 = vmatmul.bf16.vlgmr.msra.gmra.mxu2 %v8850_v14 }
 0x528   : > { %4809 = vmatpush.bf16.msra.mxu3 %v6200_v22  ;;  %4896 = vmatpush.bf16.msrb.mxu2 %v6204_v13  ;;  %v6180_v22 = vor.u32 %v6615_v8, %v6179_v54  ;;  %v6281_v54 = vld [vmem:[#allocation8 + $0x18c] sm:$0xf0]  ;;  %v6287_v8 = vld [vmem:[#allocation8 + $0x188] sm:$0xf] }
 0x52a   : > { %v3031_v15 = vpop.permute.xlu0 %3030  ;;  %v3572_v17 = vpop.permute.xlu2 %3571  ;;  %v4172_v57 = vld [vmem:[#allocation2 + $0x48] sm:$0xff] }
 0x52b   : > { %3049 = vst.msk [vmem:[#allocation2 + $0x90] sm:$0xff] %vm3042_vm9, %v3031_v15  ;;  %v3033_v9 = vpop.permute.xlu1 %3032  ;;  %v8861_v48 = vpack.c.bf16 %v4172_v57, %v4169_v18  ;;  %v4178_v15 = vld [vmem:[#allocation2 + $0x78] sm:$0xff]  ;;  %v6641_v57 = vld [vmem:[#allocation8 + $0x188] sm:$0xf0] }
 0x52c   : > { %3595 = vst.msk [vmem:[#allocation2 + $0x8] sm:$0xff] %vm3042_vm9, %v3572_v17  ;;  %v4175_v28 = vld [vmem:[#allocation2 + $0x60] sm:$0xff]  ;;  %v6192_v17 = vor.u32 %v6618_v26, %v6191_v53  ;;  %v6359_v53 = vld [vmem:[#allocation8 + $0x218] sm:$0xf] }
 0x52d   : > { %3050 = vst.msk [vmem:[#allocation2 + $0xa8] sm:$0xff] %vm3042_vm9, %v3033_v9  ;;  %v3292_v4 = vpop.f32.mrf.mxu0  ;;  %v8875_v21 = vpack.c.bf16 %v4178_v15, %v4175_v28  ;;  %v6660_v26 = vld [vmem:[#allocation8 + $0x220] sm:$0xf0]  ;;  %v6341_v28 = vld [vmem:[#allocation8 + $0x204] sm:$0xf0] }
 0x52e   : > { %3303 = vst.msk [vmem:[#allocation2 + $0x98] sm:$0xff] %vm2489_vm0, %v3292_v4  ;;  %v6328_v4 = vor.u32 %v6653_v38, %v6327_v27  ;;  %4897 = vmatpush.bf16.msrb.mxu2 %v6192_v17  ;;  %v6360_v27 = vor.u32 %v6660_v26, %v6359_v53  ;;  %v6655_v38 = vld [vmem:[#allocation8 + $0x1fc] sm:$0xf]  ;;  %v6347_v15 = vld [vmem:[#allocation8 + $0x200] sm:$0xf] }
 0x52f   : > { %v6344_v17 = vor.u32 %v6655_v38, %v6341_v28  ;;  %v6107_v38 = vld [vmem:[#allocation8 + $0x20] sm:$0xf]  ;;  %v6597_v28 = vld [vmem:[#allocation8 + $0x28] sm:$0xf0] }
 0x530   : > { %4748 = vmatpush.bf16.msra.mxu1 %v6328_v4  ;;  %v6167_v4 = vld [vmem:[#allocation8 + $0x98] sm:$0xf] }
 0x532   : > { %v3574_v56 = vpop.permute.xlu0 %3573 }
 0x533   : > { %3596 = vst.msk [vmem:[#allocation2 + $0x20] sm:$0xff] %vm3042_vm9, %v3574_v56  ;;  %v4164_v58 = vld [vmem:[#allocation2 + $0x8] sm:$0xff]  ;;  %v6279_v56 = vld [vmem:[#allocation8 + $0x180] sm:$0xf] }
 0x534   : > { %v4113_v32 = vpop.f32.mrf.mxu2  ;;  %4749 = vmatpush.bf16.msra.mxu1 %v6316_v59  ;;  %v4184_v18 = vld [vmem:[#allocation2 + $0xa8] sm:$0xff] }
 0x535   : > { %4139 = vrot.lane.b32.xlu0 %v4113_v32, %s7151_s21  ;;  %v3294_v47 = vpop.f32.mrf.mxu0  ;;  %v4181_v32 = vld [vmem:[#allocation2 + $0x90] sm:$0xff] }
 0x536   : > { %3304 = vst.msk [vmem:[#allocation2 + $0xb0] sm:$0xff] %vm2489_vm0, %v3294_v47  ;;  %v6280_v47 = vor.u32 %v6641_v57, %v6279_v56  ;;  %v8881_v36 = vpack.c.bf16 %v4184_v18, %v4181_v32  ;;  %v6317_v56 = vld [vmem:[#allocation8 + $0x1d4] sm:$0xf0]  ;;  %v6323_v57 = vld [vmem:[#allocation8 + $0x1d0] sm:$0xf] }
 0x537   : > { %4700 = vmatmul.bf16.gmra.mxu3 %v8861_v48  ;;  %4787 = vmatmul.bf16.gmra.mxu2 %v8861_v48  ;;  %v6651_v18 = vld [vmem:[#allocation8 + $0x1d8] sm:$0xf0] }
 0x538   : > { %4750 = vmatpush.bf16.msra.mxu1 %v6304_v29  ;;  %v6654_v29 = vld [vmem:[#allocation8 + $0x1f0] sm:$0xf0] }
 0x53a   : > { %v3576_v1 = vpop.permute.xlu0 %3575  ;;  %v4167_v7 = vld [vmem:[#allocation2 + $0x20] sm:$0xff] }
 0x53b   : > { %3597 = vst.msk [vmem:[#allocation2 + $0x38] sm:$0xff] %vm3042_vm9, %v3576_v1  ;;  %v8867_v2 = vpack.c.bf16 %v4167_v7, %v4164_v58  ;;  %v6661_v7 = vld [vmem:[#allocation8 + $0x22c] sm:$0xf] }
 0x53c   : > { %v4115_v42 = vpop.f32.mrf.mxu2  ;;  %4751 = vmatpush.bf16.msra.mxu1 %v6292_v23  ;;  %v6368_v0 = vor.u32 %v6661_v7, %v6365_v44  ;;  %v6649_v23 = vld [vmem:[#allocation8 + $0x1cc] sm:$0xf]  ;;  %v6143_v44 = vld [vmem:[#allocation8 + $0x68] sm:$0xf] }
 0x53d   : > { %4141 = vrot.lane.b32.xlu1 %v4115_v42, %s7151_s21  ;;  %3585 = vrot.lane.b32.xlu0 %v8820_v46, %s7151_s21  ;;  %v3837_v63 = vpop.f32.mrf.mxu0  ;;  %v6188_v46 = vor.u32 %v6616_v33, %v6185_v11  ;;  %v6663_v42 = vld [vmem:[#allocation8 + $0x238] sm:$0xf0]  ;;  %v6353_v33 = vld [vmem:[#allocation8 + $0x21c] sm:$0xf0]  ;;  %v6320_v32 = vor.u32 %v6649_v23, %v6317_v56 }
 0x53e   : > { %4724 = vmatmul.bf16.vlgmr.msra.gmra.mxu0 %v8867_v2  ;;  %3857 = vst.msk [vmem:[#allocation2 + $0x10] sm:$0xff] %vm2489_vm0, %v3837_v63 }
 0x53f   : > { %4810 = vmatpush.bf16.msra.mxu3 %v6188_v46  ;;  %4832 = vmatpush.bf16.msrb.mxu0 %v6368_v0  ;;  %v6356_v46 = vor.u32 %v6658_v40, %v6353_v33  ;;  %v6640_v0 = vld [vmem:[#allocation8 + $0x184] sm:$0xf]  ;;  %v6119_v33 = vld [vmem:[#allocation8 + $0x38] sm:$0xf] }
 0x540   : > { %4752 = vmatpush.bf16.msra.mxu1 %v6280_v47 }
 0x542   : > { %v4170_v55 = vld [vmem:[#allocation2 + $0x38] sm:$0xff] }
 0x543   : > { %4833 = vmatpush.bf16.msrb.mxu0 %v6356_v46  ;;  %v6600_v46 = vld [vmem:[#allocation8 + $0x40] sm:$0xf0] }
 0x544   : > { %v4118_v9 = vpop.f32.mrf.mxu2  ;;  %4861 = vmatpush.bf16.msrb.mxu1 %v6180_v22  ;;  %v6120_v53 = vor.u32 %v6600_v46, %v6119_v33 }
 0x545   : > { %4143 = vrot.lane.b32.xlu1 %v4118_v9, %s7151_s21  ;;  %v3839_v60 = vpop.f32.mrf.mxu0  ;;  %v6657_v9 = vld [vmem:[#allocation8 + $0x208] sm:$0xf0] }
 0x546   : > { %3858 = vst.msk [vmem:[#allocation2 + $0x28] sm:$0xff] %vm2489_vm0, %v3839_v60  ;;  %v6612_v60 = vld [vmem:[#allocation8 + $0xa0] sm:$0xf0]  ;;  %v6348_v3 = vor.u32 %v6657_v9, %v6347_v15  ;;  %v6108_v15 = vor.u32 %v6597_v28, %v6107_v38  ;;  %v6594_v9 = vld [vmem:[#allocation8 + $0x10] sm:$0xf0] }
 0x547   : > { %4705 = vmatmul.bf16.gmra.mxu3 %v8875_v21  ;;  %4792 = vmatmul.bf16.gmra.mxu2 %v8875_v21  ;;  %v6168_v59 = vor.u32 %v6612_v60, %v6167_v4 }
 0x548   : > { %4834 = vmatpush.bf16.msrb.mxu0 %v6344_v17  ;;  %v6095_v17 = vld [vmem:[#allocation8 + $0x8] sm:$0xf] }
 0x549   : > { %4862 = vmatpush.bf16.msrb.mxu1 %v6168_v59  ;;  %v6096_v60 = vor.u32 %v6594_v9, %v6095_v17 }
 0x54c   : > { %v4120_v43 = vpop.f32.mrf.mxu2  ;;  %4835 = vmatpush.bf16.msrb.mxu0 %v6332_v10 }
 0x54d   : > { %4145 = vrot.lane.b32.xlu2 %v4120_v43, %s7151_s21  ;;  %v6335_v43 = vld [vmem:[#allocation8 + $0x1e8] sm:$0xf] }
 0x54e   : > { %v6336_v51 = vor.u32 %v6654_v29, %v6335_v43 }
 0x550   : > { %4836 = vmatpush.bf16.msrb.mxu0 %v6320_v32 }
 0x557   : > { %4710 = vmatmul.bf16.gmra.mxu3 %v8881_v36  ;;  %4797 = vmatmul.bf16.gmra.mxu2 %v8881_v36 }
 0x55c   : > { %v4134_v24 = vpop.permute.xlu2 %4133 }
 0x55d   : > { %4156 = vst.msk [vmem:[#allocation2 + $0x28] sm:$0xff] %vm3042_vm9, %v4134_v24  ;;  %v6324_v24 = vor.u32 %v6651_v18, %v6323_v57 }
 0x564   : > { %v4168_v35 = vld [vmem:[#allocation2 + $0x28] sm:$0xff] }
 0x566   : > { %v4136_v49 = vpop.permute.xlu2 %4135 }
 0x567   : > { %4811 = vmatmul.bf16.vlgmr.msra.gmra.mxu3 %v8867_v2  ;;  %4898 = vmatmul.bf16.vlgmr.msrb.gmra.mxu2 %v8867_v2  ;;  %v6371_v2 = vld [vmem:[#allocation8 + $0x230] sm:$0xf] }
 0x568   : > { %v6372_v63 = vor.u32 %v6663_v42, %v6371_v2  ;;  %v6606_v2 = vld [vmem:[#allocation8 + $0x70] sm:$0xf0] }
 0x569   : > { %v6144_v42 = vor.u32 %v6606_v2, %v6143_v44 }
 0x56a   : > { %4919 = vmatpush.bf16.msrb.mxu3 %v6372_v63  ;;  %v6642_v63 = vld [vmem:[#allocation8 + $0x190] sm:$0xf0] }
 0x56c   : > { %v4132_v45 = vpop.permute.xlu1 %4131 }
 0x56d   : > { %4155 = vst.msk [vmem:[#allocation2 + $0x10] sm:$0xff] %vm3042_vm9, %v4132_v45  ;;  %v6609_v45 = vld [vmem:[#allocation8 + $0x88] sm:$0xf0] }
 0x56e   : > { %v3582_v50 = vpop.permute.xlu2 %3581  ;;  %4920 = vmatpush.bf16.msrb.mxu3 %v6360_v27 }
 0x56f   : > { %3600 = vst.msk [vmem:[#allocation2 + $0x80] sm:$0xff] %vm3042_vm9, %v3582_v50  ;;  %v6646_v50 = vld [vmem:[#allocation8 + $0x1b4] sm:$0xf] }
 0x572   : > { %4921 = vmatpush.bf16.msrb.mxu3 %v6348_v3 }
 0x574   : > { %v3578_v52 = vpop.permute.xlu1 %3577  ;;  %v4165_v31 = vld [vmem:[#allocation2 + $0x10] sm:$0xff] }
 0x575   : > { %3598 = vst.msk [vmem:[#allocation2 + $0x50] sm:$0xff] %vm3042_vm9, %v3578_v52  ;;  %v8891_v34 = vpack.c.bf16 %v4168_v35, %v4165_v31  ;;  %v6305_v31 = vld [vmem:[#allocation8 + $0x1bc] sm:$0xf0]  ;;  %v6311_v35 = vld [vmem:[#allocation8 + $0x1b8] sm:$0xf] }
 0x576   : > { %v3584_v19 = vpop.permute.xlu2 %3583  ;;  %v4179_v39 = vld [vmem:[#allocation2 + $0x80] sm:$0xff]  ;;  %4922 = vmatpush.bf16.msrb.mxu3 %v6336_v51 }
 0x577   : > { %3601 = vst.msk [vmem:[#allocation2 + $0x98] sm:$0xff] %vm3042_vm9, %v3584_v19  ;;  %4753 = vmatmul.bf16.vlgmr.msra.gmra.mxu1 %v8891_v34  ;;  %v6308_v19 = vor.u32 %v6646_v50, %v6305_v31 }
 0x579   : > { %4837 = vmatpush.bf16.msrb.mxu0 %v6308_v19 }
 0x57a   : > { %4923 = vmatpush.bf16.msrb.mxu3 %v6324_v24  ;;  %v8917_v24 = vld [vmem:[#allocation9] sm:$0x7] }
 0x57b   : > { %v3842_v5 = vpop.f32.mrf.mxu0 }
 0x57c   : > { %3859 = vst.msk [vmem:[#allocation2 + $0x40] sm:$0xff] %vm2489_vm0, %v3842_v5  ;;  %v3580_v41 = vpop.permute.xlu1 %3579  ;;  %v4173_v62 = vld [vmem:[#allocation2 + $0x50] sm:$0xff]  ;;  %v6648_v5 = vld [vmem:[#allocation8 + $0x1c0] sm:$0xf0] }
 0x57d   : > { %4157 = vst.msk [vmem:[#allocation2 + $0x40] sm:$0xff] %vm3042_vm9, %v4136_v49  ;;  %v4191_v16 = vpack.c.bf16 %v4173_v62, %v4170_v55  ;;  %v6155_v49 = vld [vmem:[#allocation8 + $0x80] sm:$0xf]  ;;  %v6643_v55 = vld [vmem:[#allocation8 + $0x19c] sm:$0xf] }
 0x57e   : > { %3599 = vst.msk [vmem:[#allocation2 + $0x68] sm:$0xff] %vm3042_vm9, %v3580_v41  ;;  %v6156_v52 = vor.u32 %v6609_v45, %v6155_v49  ;;  %v6312_v41 = vor.u32 %v6648_v5, %v6311_v35  ;;  %v6293_v62 = vld [vmem:[#allocation8 + $0x1a4] sm:$0xf0]  ;;  %v4182_v3 = vld [vmem:[#allocation2 + $0x98] sm:$0xff]  ;;  %v8921_v49 = vperm.slane %v8917_v24, 0 }
 0x57f   : > { %4729 = vmatmul.bf16.gmra.mxu0 %v4191_v16  ;;  %4816 = vmatmul.bf16.gmra.mxu3 %v4191_v16 }
 0x580   : > { %4903 = vmatmul.bf16.gmra.mxu2 %v4191_v16  ;;  %4863 = vmatpush.bf16.msrb.mxu1 %v6156_v52  ;;  %v6299_v16 = vld [vmem:[#allocation8 + $0x1a0] sm:$0xf] }
 0x581   : > { %4924 = vmatpush.bf16.msrb.mxu3 %v6312_v41 }
 0x583   : > { %v3844_v30 = vpop.f32.mrf.mxu0 }
 0x584   : > { %3860 = vst.msk [vmem:[#allocation2 + $0x58] sm:$0xff] %vm2489_vm0, %v3844_v30  ;;  %v4171_v12 = vld [vmem:[#allocation2 + $0x40] sm:$0xff]  ;;  %v6296_v30 = vor.u32 %v6643_v55, %v6293_v62  ;;  %4864 = vmatpush.bf16.msrb.mxu1 %v6144_v42 }
 0x585   : > { %v4176_v58 = vld [vmem:[#allocation2 + $0x68] sm:$0xff] }
 0x586   : > { %v4138_v1 = vpop.permute.xlu0 %4137  ;;  %v4194_v25 = vpack.c.bf16 %v4179_v39, %v4176_v58  ;;  %4838 = vmatpush.bf16.msrb.mxu0 %v6296_v30 }
 0x587   : > { %4158 = vst.msk [vmem:[#allocation2 + $0x58] sm:$0xff] %vm3042_vm9, %v4138_v1  ;;  %v6645_v1 = vld [vmem:[#allocation8 + $0x1a8] sm:$0xf0] }
 0x588   : > { %v6300_v7 = vor.u32 %v6645_v1, %v6299_v16 }
 0x58a   : > { %4925 = vmatpush.bf16.msrb.mxu3 %v6300_v7 }
 0x58b   : > { %v3847_v37 = vpop.f32.mrf.mxu0 }
 0x58c   : > { %3861 = vst.msk [vmem:[#allocation2 + $0x70] sm:$0xff] %vm2489_vm0, %v3847_v37  ;;  %v6284_v37 = vor.u32 %v6640_v0, %v6281_v54 }
 0x58e   : > { %v4174_v13 = vld [vmem:[#allocation2 + $0x58] sm:$0xff]  ;;  %4839 = vmatpush.bf16.msrb.mxu0 %v6284_v37 }
 0x58f   : > { %v8901_v11 = vpack.c.bf16 %v4174_v13, %v4171_v12  ;;  %4734 = vmatmul.bf16.gmra.mxu0 %v4194_v25  ;;  %4821 = vmatmul.bf16.gmra.mxu3 %v4194_v25  ;;  %v6288_v12 = vor.u32 %v6642_v63, %v6287_v8  ;;  %v6603_v13 = vld [vmem:[#allocation8 + $0x58] sm:$0xf0] }
 0x590   : > { %4908 = vmatmul.bf16.gmra.mxu2 %v4194_v25  ;;  %v6131_v25 = vld [vmem:[#allocation8 + $0x50] sm:$0xf] }
 0x591   : > { %4758 = vmatmul.bf16.gmra.mxu1 %v8901_v11  ;;  %4926 = vmatpush.bf16.msrb.mxu3 %v6288_v12  ;;  %v6132_v40 = vor.u32 %v6603_v13, %v6131_v25 }
 0x593   : > { %v3849_v20 = vpop.f32.mrf.mxu0  ;;  %4865 = vmatpush.bf16.msrb.mxu1 %v6132_v40 }
 0x594   : > { %3862 = vst.msk [vmem:[#allocation2 + $0x88] sm:$0xff] %vm2489_vm0, %v3849_v20 }
 0x597   : > { %4866 = vmatpush.bf16.msrb.mxu1 %v6120_v53 }
 0x59b   : > { %v3852_v47 = vpop.f32.mrf.mxu0  ;;  %4867 = vmatpush.bf16.msrb.mxu1 %v6108_v15 }
 0x59c   : > { %3863 = vst.msk [vmem:[#allocation2 + $0xa0] sm:$0xff] %vm2489_vm0, %v3852_v47 }
 0x59f   : > { %4868 = vmatpush.bf16.msrb.mxu1 %v6096_v60  ;;  %v8953_v60 = vperm.slane %v8917_v24, 1 }
 0x5a3   : > { %v3854_v58 = vpop.f32.mrf.mxu0 }
 0x5a4   : > { %3864 = vst.msk [vmem:[#allocation2 + $0xb8] sm:$0xff] %vm2489_vm0, %v3854_v58 }
 0x5a7   : > { %v4146_v22 = vpop.permute.xlu2 %4145  ;;  %v4140_v39 = vpop.permute.xlu0 %4139 }
 0x5a8   : > { %4162 = vst.msk [vmem:[#allocation2 + $0xb8] sm:$0xff] %vm3042_vm9, %v4146_v22 }
 0x5a9   : > { %4159 = vst.msk [vmem:[#allocation2 + $0x70] sm:$0xff] %vm3042_vm9, %v4140_v39 }
 0x5aa   : > { %v4696_v4 = vpop.f32.mrf.mxu3  ;;  %v4783_v55 = vpop.f32.mrf.mxu2 }
 0x5ab   : > { %v4697_v50 = vadd.f32 %v4696_v4, %v8921_v49 }
 0x5af   : > { %v3586_v26 = vpop.permute.xlu0 %3585  ;;  %v4142_v27 = vpop.permute.xlu1 %4141  ;;  %v4186_v23 = vld [vmem:[#allocation2 + $0xb8] sm:$0xff] }
 0x5b0   : > { %3602 = vst.msk [vmem:[#allocation2 + $0xb0] sm:$0xff] %vm3042_vm9, %v3586_v26  ;;  %v4177_v6 = vld [vmem:[#allocation2 + $0x70] sm:$0xff] }
 0x5b1   : > { %4160 = vst.msk [vmem:[#allocation2 + $0x88] sm:$0xff] %vm3042_vm9, %v4142_v27 }
 0x5b2   : > { %v4698_v10 = vpop.f32.mrf.mxu3  ;;  %v4785_v30 = vpop.f32.mrf.mxu2 }
 0x5b3   : > { %v4699_v35 = vadd.f32 %v4698_v10, %v8921_v49 }
 0x5b7   : > { %v4144_v20 = vpop.permute.xlu1 %4143  ;;  %v4185_v59 = vld [vmem:[#allocation2 + $0xb0] sm:$0xff] }
 0x5b8   : > { %4161 = vst.msk [vmem:[#allocation2 + $0xa0] sm:$0xff] %vm3042_vm9, %v4144_v20  ;;  %v4197_v61 = vpack.c.bf16 %v4185_v59, %v4182_v3  ;;  %v4180_v43 = vld [vmem:[#allocation2 + $0x88] sm:$0xff]  ;;  %v4784_v59 = vadd.f32 %v4783_v55, %v8953_v60 }
 0x5b9   : > { %v4195_v29 = vpack.c.bf16 %v4180_v43, %v4177_v6 }
 0x5ba   : > { %4739 = vmatmul.bf16.gmra.mxu0 %v4197_v61  ;;  %4826 = vmatmul.bf16.gmra.mxu3 %v4197_v61  ;;  %v4701_v56 = vpop.f32.mrf.mxu3 }
 0x5bb   : > { %4763 = vmatmul.bf16.gmra.mxu1 %v4195_v29  ;;  %4913 = vmatmul.bf16.gmra.mxu2 %v4197_v61  ;;  %v4702_v1 = vadd.f32 %v4701_v56, %v8921_v49 }
 0x5bf   : > { %v4183_v51 = vld [vmem:[#allocation2 + $0xa0] sm:$0xff] }
 0x5c0   : > { %v4198_v57 = vpack.c.bf16 %v4186_v23, %v4183_v51 }
 0x5c2   : > { %v4703_v32 = vpop.f32.mrf.mxu3 }
 0x5c3   : > { %v4704_v42 = vadd.f32 %v4703_v32, %v8921_v49  ;;  %v4786_v32 = vadd.f32 %v4785_v30, %v8953_v60 }
 0x5ca   : > { %4840 = vmatmul.bf16.vlgmr.msrb.gmra.mxu0 %v8891_v34  ;;  %4927 = vmatmul.bf16.vlgmr.msrb.gmra.mxu3 %v8891_v34  ;;  %v4706_v18 = vpop.f32.mrf.mxu3  ;;  %v4725_v34 = vpop.f32.mrf.mxu0 }
 0x5cb   : > { %4768 = vmatmul.bf16.gmra.mxu1 %v4198_v57  ;;  %v4726_v52 = vadd.f32 %v4725_v34, %v4697_v50  ;;  %v4707_v33 = vadd.f32 %v4706_v18, %v8921_v49 }
 0x5d2   : > { %v4708_v47 = vpop.f32.mrf.mxu3 }
 0x5d3   : > { %v4709_v15 = vadd.f32 %v4708_v47, %v8921_v49 }
 0x5da   : > { %4845 = vmatmul.bf16.gmra.mxu0 %v8901_v11  ;;  %4932 = vmatmul.bf16.gmra.mxu3 %v8901_v11  ;;  %v4711_v45 = vpop.f32.mrf.mxu3 }
 0x5db   : > { %4869 = vmatmul.bf16.vlgmr.msrb.gmra.mxu1 %v8850_v14  ;;  %v4727_v14 = vpop.f32.mrf.mxu0  ;;  %v4712_v61 = vadd.f32 %v4711_v45, %v8921_v49 }
 0x5dc   : > { %v4728_v19 = vadd.f32 %v4727_v14, %v4699_v35 }
 0x5ea   : > { %4850 = vmatmul.bf16.gmra.mxu0 %v4195_v29  ;;  %4937 = vmatmul.bf16.gmra.mxu3 %v4195_v29 }
 0x5eb   : > { %4874 = vmatmul.bf16.gmra.mxu1 %v8861_v48  ;;  %v4713_v48 = vpop.f32.mrf.mxu3 }
 0x5ec   : > { %v4714_v18 = vadd.f32 %v4713_v48, %v8921_v49 }
 0x5f3   : > { %v4812_v62 = vpop.f32.mrf.mxu3 }
 0x5f4   : > { %v4754_v31 = vpop.f32.mrf.mxu1  ;;  %v4813_v29 = vadd.f32 %v4812_v62, %v4784_v59 }
 0x5f5   : > { %v4755_v11 = vadd.f32 %v4754_v31, %v4726_v52 }
 0x5f7   : > { %4948 = vst [vmem:[%s8926_s26] sm:$0xff] %v4755_v11 }
 0x5fa   : > { %4855 = vmatmul.bf16.gmra.mxu0 %v4198_v57  ;;  %4942 = vmatmul.bf16.gmra.mxu3 %v4198_v57 }
 0x5fb   : > { %4879 = vmatmul.bf16.gmra.mxu1 %v8875_v21  ;;  %v4814_v44 = vpop.f32.mrf.mxu3  ;;  %v4788_v21 = vpop.f32.mrf.mxu2 }
 0x5fc   : > { %v4756_v5 = vpop.f32.mrf.mxu1  ;;  %v4730_v16 = vpop.f32.mrf.mxu0  ;;  %v4815_v47 = vadd.f32 %v4814_v44, %v4786_v32  ;;  %v4789_v35 = vadd.f32 %v4788_v21, %v8953_v60 }
 0x5fd   : > { %v4757_v41 = vadd.f32 %v4756_v5, %v4728_v19  ;;  %v4731_v58 = vadd.f32 %v4730_v16, %v4702_v1  ;;  %v8970_v19 = vperm.slane %v8917_v24, 2 }
 0x5ff   : > { %4951 = vst [vmem:[%s8926_s26 + $0x18] sm:$0xff] %v4757_v41 }
 0x603   : > { %v4817_v37 = vpop.f32.mrf.mxu3  ;;  %v4790_v22 = vpop.f32.mrf.mxu2 }
 0x604   : > { %v4732_v0 = vpop.f32.mrf.mxu0  ;;  %v4818_v5 = vadd.f32 %v4817_v37, %v4789_v35  ;;  %v4791_v1 = vadd.f32 %v4790_v22, %v8953_v60 }
 0x605   : > { %v4733_v54 = vadd.f32 %v4732_v0, %v4704_v42 }
 0x60b   : > { %4884 = vmatmul.bf16.gmra.mxu1 %v8881_v36  ;;  %v4819_v39 = vpop.f32.mrf.mxu3  ;;  %v8937_v25 = vpop.f32.mrf.mxu2 }
 0x60c   : > { %v4735_v12 = vpop.f32.mrf.mxu0 }
 0x60d   : > { %v4736_v53 = vadd.f32 %v4735_v12, %v4707_v33 }
 0x60e   : > { %v4759_v7 = vpop.f32.mrf.mxu1 }
 0x60f   : > { %v4760_v2 = vadd.f32 %v4759_v7, %v4731_v58  ;;  %v4820_v7 = vadd.f32 %v4819_v39, %v4791_v1 }
 0x611   : > { %4954 = vst [vmem:[%s8926_s26 + $0x30] sm:$0xff] %v4760_v2 }
 0x613   : > { %v8939_v36 = vpop.f32.mrf.mxu3  ;;  %v8941_v40 = vpop.f32.mrf.mxu2 }
 0x614   : > { %v4737_v13 = vpop.f32.mrf.mxu0 }
 0x615   : > { %v4738_v9 = vadd.f32 %v4737_v13, %v4709_v15 }
 0x616   : > { %v4761_v8 = vpop.f32.mrf.mxu1 }
 0x617   : > { %v4762_v63 = vadd.f32 %v4761_v8, %v4733_v54  ;;  %v4794_v8 = vadd.f32 %v8937_v25, %v8953_v60 }
 0x619   : > { %4957 = vst [vmem:[%s8926_s26 + $0x48] sm:$0xff] %v4762_v63  ;;  %v4823_v63 = vadd.f32 %v8939_v36, %v4794_v8 }
 0x61b   : > { %v8944_v46 = vpop.f32.mrf.mxu3  ;;  %v8946_v28 = vpop.f32.mrf.mxu2 }
 0x623   : > { %v8958_v6 = vpop.f32.mrf.mxu2 }
 0x62b   : > { %v4899_v45 = vpop.f32.mrf.mxu2 }
 0x633   : > { %v4901_v62 = vpop.f32.mrf.mxu2 }
 0x637   : > { %v4740_v26 = vpop.f32.mrf.mxu0 }
 0x638   : > { %v4764_v27 = vpop.f32.mrf.mxu1  ;;  %v4741_v10 = vadd.f32 %v4740_v26, %v4712_v61  ;;  %v4796_v26 = vadd.f32 %v8941_v40, %v8953_v60 }
 0x639   : > { %v4765_v38 = vadd.f32 %v4764_v27, %v4736_v53 }
 0x63a   : > { %v4825_v25 = vadd.f32 %v8944_v46, %v4796_v26 }
 0x63b   : > { %4960 = vst [vmem:[%s8926_s26 + $0x60] sm:$0xff] %v4765_v38  ;;  %v4904_v0 = vpop.f32.mrf.mxu2 }
 0x63d   : > { %v8950_v17 = vpop.f32.mrf.mxu3 }
 0x63f   : > { %v4742_v4 = vpop.f32.mrf.mxu0 }
 0x640   : > { %v4766_v20 = vpop.f32.mrf.mxu1  ;;  %v4743_v50 = vadd.f32 %v4742_v4, %v4714_v18 }
 0x641   : > { %v4767_v3 = vadd.f32 %v4766_v20, %v4738_v9 }
 0x643   : > { %4963 = vst [vmem:[%s8926_s26 + $0x78] sm:$0xff] %v4767_v3  ;;  %v4906_v33 = vpop.f32.mrf.mxu2  ;;  %v4799_v3 = vadd.f32 %v8946_v28, %v8953_v60 }
 0x645   : > { %v8960_v43 = vpop.f32.mrf.mxu3  ;;  %v4828_v61 = vadd.f32 %v8950_v17, %v4799_v3 }
 0x647   : > { %v4841_v51 = vpop.f32.mrf.mxu0 }
 0x648   : > { %v4769_v23 = vpop.f32.mrf.mxu1  ;;  %v4842_v56 = vadd.f32 %v4841_v51, %v4813_v29 }
 0x649   : > { %v4770_v57 = vadd.f32 %v4769_v23, %v4741_v10 }
 0x64a   : > { %4949 = vst [vmem:[%s8926_s26 + $0x8] sm:$0xff] %v4842_v56 }
 0x64b   : > { %4966 = vst [vmem:[%s8926_s26 + $0x90] sm:$0xff] %v4770_v57  ;;  %v4909_v59 = vpop.f32.mrf.mxu2  ;;  %v4801_v57 = vadd.f32 %v8958_v6, %v8953_v60 }
 0x64d   : > { %v4928_v34 = vpop.f32.mrf.mxu3  ;;  %v4830_v32 = vadd.f32 %v8960_v43, %v4801_v57 }
 0x64f   : > { %v4843_v52 = vpop.f32.mrf.mxu0 }
 0x650   : > { %v4771_v31 = vpop.f32.mrf.mxu1  ;;  %v4844_v11 = vadd.f32 %v4843_v52, %v4815_v47 }
 0x651   : > { %v4772_v14 = vadd.f32 %v4771_v31, %v4743_v50 }
 0x652   : > { %4952 = vst [vmem:[%s8926_s26 + $0x20] sm:$0xff] %v4844_v11 }
 0x653   : > { %4969 = vst [vmem:[%s8926_s26 + $0xa8] sm:$0xff] %v4772_v14  ;;  %v4911_v18 = vpop.f32.mrf.mxu2 }
 0x655   : > { %v4930_v49 = vpop.f32.mrf.mxu3 }
 0x657   : > { %v4846_v41 = vpop.f32.mrf.mxu0 }
 0x658   : > { %v4847_v48 = vadd.f32 %v4846_v41, %v4818_v5  ;;  %v4870_v55 = vpop.f32.mrf.mxu1 }
 0x659   : > { %v4871_v16 = vadd.f32 %v4870_v55, %v8970_v19 }
 0x65a   : > { %4955 = vst [vmem:[%s8926_s26 + $0x38] sm:$0xff] %v4847_v48 }
 0x65b   : > { %v4900_v30 = vadd.f32 %v4899_v45, %v4871_v16  ;;  %v4914_v11 = vpop.f32.mrf.mxu2 }
 0x65d   : > { %v4929_v58 = vadd.f32 %v4928_v34, %v4900_v30  ;;  %v4933_v42 = vpop.f32.mrf.mxu3 }
 0x65f   : > { %4950 = vst [vmem:[%s8926_s26 + $0x10] sm:$0xff] %v4929_v58  ;;  %v4848_v44 = vpop.f32.mrf.mxu0 }
 0x660   : > { %v4849_v24 = vadd.f32 %v4848_v44, %v4820_v7  ;;  %v4872_v2 = vpop.f32.mrf.mxu1 }
 0x661   : > { %v4873_v21 = vadd.f32 %v4872_v2, %v8970_v19 }
 0x662   : > { %4958 = vst [vmem:[%s8926_s26 + $0x50] sm:$0xff] %v4849_v24 }
 0x663   : > { %v4902_v54 = vadd.f32 %v4901_v62, %v4873_v21 }
 0x665   : > { %v4931_v37 = vadd.f32 %v4930_v49, %v4902_v54  ;;  %v4935_v27 = vpop.f32.mrf.mxu3  ;;  %v4916_v49 = vpop.f32.mrf.mxu2 }
 0x667   : > { %4953 = vst [vmem:[%s8926_s26 + $0x28] sm:$0xff] %v4931_v37  ;;  %v4851_v22 = vpop.f32.mrf.mxu0 }
 0x668   : > { %v4852_v39 = vadd.f32 %v4851_v22, %v4823_v63  ;;  %v4875_v12 = vpop.f32.mrf.mxu1 }
 0x669   : > { %v4876_v13 = vadd.f32 %v4875_v12, %v8970_v19 }
 0x66a   : > { %4961 = vst [vmem:[%s8926_s26 + $0x68] sm:$0xff] %v4852_v39 }
 0x66b   : > { %v4905_v53 = vadd.f32 %v4904_v0, %v4876_v13 }
 0x66d   : > { %v4934_v38 = vadd.f32 %v4933_v42, %v4905_v53  ;;  %v4938_v29 = vpop.f32.mrf.mxu3 }
 0x66f   : > { %4956 = vst [vmem:[%s8926_s26 + $0x40] sm:$0xff] %v4934_v38  ;;  %v4853_v36 = vpop.f32.mrf.mxu0 }
 0x670   : > { %v4854_v15 = vadd.f32 %v4853_v36, %v4825_v25  ;;  %v4877_v9 = vpop.f32.mrf.mxu1 }
 0x671   : > { %v4878_v4 = vadd.f32 %v4877_v9, %v8970_v19 }
 0x672   : > { %4964 = vst [vmem:[%s8926_s26 + $0x80] sm:$0xff] %v4854_v15 }
 0x673   : > { %v4907_v20 = vadd.f32 %v4906_v33, %v4878_v4 }
 0x675   : > { %v4936_v40 = vadd.f32 %v4935_v27, %v4907_v20  ;;  %v4940_v47 = vpop.f32.mrf.mxu3 }
 0x677   : > { %4959 = vst [vmem:[%s8926_s26 + $0x58] sm:$0xff] %v4936_v40  ;;  %v4856_v46 = vpop.f32.mrf.mxu0 }
 0x678   : > { %v4857_v10 = vadd.f32 %v4856_v46, %v4828_v61  ;;  %v4880_v51 = vpop.f32.mrf.mxu1 }
 0x679   : > { %v4881_v23 = vadd.f32 %v4880_v51, %v8970_v19 }
 0x67a   : > { %4967 = vst [vmem:[%s8926_s26 + $0x98] sm:$0xff] %v4857_v10 }
 0x67b   : > { %v4910_v56 = vadd.f32 %v4909_v59, %v4881_v23 }
 0x67d   : > { %v4939_v28 = vadd.f32 %v4938_v29, %v4910_v56  ;;  %v4943_v43 = vpop.f32.mrf.mxu3 }
 0x67f   : > { %4962 = vst [vmem:[%s8926_s26 + $0x70] sm:$0xff] %v4939_v28  ;;  %v4858_v17 = vpop.f32.mrf.mxu0 }
 0x680   : > { %v4859_v34 = vadd.f32 %v4858_v17, %v4830_v32  ;;  %v4882_v45 = vpop.f32.mrf.mxu1 }
 0x681   : > { %v4883_v50 = vadd.f32 %v4882_v45, %v8970_v19 }
 0x682   : > { %4970 = vst [vmem:[%s8926_s26 + $0xb0] sm:$0xff] %v4859_v34 }
 0x683   : > { %v4912_v52 = vadd.f32 %v4911_v18, %v4883_v50 }
 0x685   : > { %v4941_v31 = vadd.f32 %v4940_v47, %v4912_v52  ;;  %v4945_v55 = vpop.f32.mrf.mxu3 }
 0x687   : > { %4965 = vst [vmem:[%s8926_s26 + $0x88] sm:$0xff] %v4941_v31 }
 0x688   : > { %v4885_v60 = vpop.f32.mrf.mxu1 }
 0x689   : > { %v4886_v6 = vadd.f32 %v4885_v60, %v8970_v19 }
 0x68b   : > { %v4915_v14 = vadd.f32 %v4914_v11, %v4886_v6 }
 0x68d   : > { %v4944_v35 = vadd.f32 %v4943_v43, %v4915_v14 }
 0x68f   : > { %4968 = vst [vmem:[%s8926_s26 + $0xa0] sm:$0xff] %v4944_v35 }
 0x690   : > { %v4887_v5 = vpop.f32.mrf.mxu1 }
 0x691   : > { %v4888_v41 = vadd.f32 %v4887_v5, %v8970_v19 }
 0x693   : > { %v4917_v48 = vadd.f32 %v4916_v49, %v4888_v41 }
 0x695   : > { %v4946_v62 = vadd.f32 %v4945_v55, %v4917_v48 }
 0x697   : > { %4971 = vst [vmem:[%s8926_s26 + $0xb8] sm:$0xff] %v4946_v62 }
 0x698   : > { %7093 = shalt.err (!%p7090_p10)
}
 0x699   : > { %s7152_s10 = smov 384   ;;  %s7153_s24 = smov 24  }
 0x69a   : > { %6682 = dma.vmem_to_hbm [thread:$0]  (%p7262_p7), %s4986_s27, 3072, %s4988_s28, %s4973_s19, %s7152_s10, %s7152_s10, %s7153_s24  }
 0x69b PF: > { %s5002_s21 = sand.u32 1, %s7128_s15   ;;  %p9134_p12 = scmp.ge.s32.totalorder %s7140_s18, 2 }
 0x69c   : > { %s5003_s26 = scalar_lea.sflag [#allocation5], %s5002_s21 }
 0x69d   : > { %p6699_p13 = pnand %p9134_p12, %p7214_p6 }
 0x69f   : > { %p6700_p0 = pneg %p6699_p13 }
 0x6a1   : > { %7123 = dma.done.wait (%p6700_p0), %s5003_s26, 3072  }
 0x6a2   : > { %7125 = vsyncadd (%p6700_p0), %s5003_s26, 4294964224  ;;  %p19_p3 = scmp.ge.s32.totalorder %s7248_s25, 4   ;;  %s9135_s15 = smov %s7132_s16 }
 0x6a3   : > { %s9136_s16 = smov %s7136_s17  ;;  %s9137_s17 = smov %s7258_s30 }
 0x6a4   : > { %s9138_s18 = smov %s7248_s25  ;;  %21 = sbr.rel (!%p19_p3) target bundleno = 7 (0x7), region = 93 }
 0x6a9   :  { %5009 = vsyncpa [#allocation4], 1 }
 0x6aa   :  { %5011 = vsyncpa [#allocation4 + $0x1], 1 }
 0x6ab   :  { %5012 = vsyncpa [#allocation7], 1 }
 0x6ac   :  { %5013 = vsyncpa [#allocation10], 1 }
 0x6ad   :  { %5014 = vsyncpa [#allocation5], 1 }
 0x6ae   :  { %5016 = vsyncpa [#allocation5 + $0x1], 1 }

</bundles_post_ra>
